<compile_context>
chip_gen: v7x
topology: tpu7x:2x2x1
jax: 0.10.0
libtpu: 0.0.40
codegen_flags: <defaults>
</compile_context>

<pallas_src>
import math
import functools

import jax
import jax.numpy as jnp
from jax import lax
from jax.experimental import pallas as pl
from jax.experimental.pallas import tpu as pltpu


# ----------------------------------------------------------------------------
# Fused kernel: PE add -> num_layers encoder layers -> x[:, 0, :]
# ----------------------------------------------------------------------------
def transformer_layer_kernel(x_ref, pe_ref, wq_ref, wk_ref, wv_ref, bqkv_ref,
                             wo_ref, w1_ref, w2_ref, b1_ref, vece_ref, o_ref,
                             *, nhead, num_layers, eps=1e-5):
    B, S, E = x_ref.shape
    H = nhead
    hd = E // H
    HB = H * B                       # heads folded (head-major) into one batch dim
    scale = 1.0 / math.sqrt(hd)
    f32 = jnp.float32

    # ---- sinusoidal positional encoding (pe is (1, S, E); broadcasts over batch) ----
    x2 = (x_ref[...].astype(f32) + pe_ref[...]).reshape(B * S, E)      # (B*S, E)

    for l in range(num_layers):                     # static unroll over encoder layers
        # ================= multi-head self-attention =================
        # xh[n] == x[b] for n = h*B + b  (pure leading-dim broadcast, no transposes)
        x3 = x2.reshape(B, S, E)
        xh = jnp.broadcast_to(x3[None], (H, B, S, E)).reshape(HB, S, E)

        wq = wq_ref[l * HB:(l + 1) * HB]            # (HB, E, hd), pre head-split
        wk = wk_ref[l * HB:(l + 1) * HB]
        wv = wv_ref[l * HB:(l + 1) * HB]
        bq = bqkv_ref[3 * l + 0][:, None, :]        # (HB, 1, hd)
        bk = bqkv_ref[3 * l + 1][:, None, :]
        bv = bqkv_ref[3 * l + 2][:, None, :]

        q = jnp.einsum('nse,ned->nsd', xh, wq, preferred_element_type=f32) + bq
        k = jnp.einsum('nse,ned->nsd', xh, wk, preferred_element_type=f32) + bk
        v = jnp.einsum('nse,ned->nsd', xh, wv, preferred_element_type=f32) + bv

        # scores + softmax, vectorized over all B*H heads at once
        s = jnp.einsum('nqd,nkd->nqk', q, k, preferred_element_type=f32) * scale
        s = s - jnp.max(s, axis=-1, keepdims=True)
        p = jnp.exp(s)
        p = p * pl.reciprocal(jnp.sum(p, axis=-1, keepdims=True), approx=True)
        ctx = jnp.einsum('nqk,nkd->nqd', p, v, preferred_element_type=f32)   # (HB, S, hd)

        # per-head slice of the output projection, then sum over heads
        # (mathematically identical to concat(heads) @ Wo^T)
        wo = wo_ref[l * HB:(l + 1) * HB]            # (HB, hd, E)
        attn_ph = jnp.einsum('nsd,nde->nse', ctx, wo, preferred_element_type=f32)
        attn3 = attn_ph[0:B]                        # head 0 -> (B, S, E)
        for h in range(1, H):
            attn3 = attn3 + attn_ph[h * B:(h + 1) * B]

        vec = vece_ref[l]                           # (6, E): bo, ln1w, ln1b, ln2w, ln2b, b2
        bo, ln1w, ln1b = vec[0:1], vec[1:2], vec[2:3]
        ln2w, ln2b, b2 = vec[3:4], vec[4:5], vec[5:6]

        attn = attn3.reshape(B * S, E) + bo

        # ================= residual + LayerNorm 1 (post-norm) =================
        h1 = x2 + attn
        mu1 = jnp.mean(h1, axis=-1, keepdims=True)
        var1 = jnp.mean((h1 - mu1) ** 2, axis=-1, keepdims=True)
        h1n = (h1 - mu1) * lax.rsqrt(var1 + eps) * ln1w + ln1b

        # ================= feed-forward (relu); weights pre-transposed (in, out) =========
        ff = jnp.dot(h1n, w1_ref[l], preferred_element_type=f32) + b1_ref[l]
        ff = jnp.maximum(ff, 0.0)
        ff = jnp.dot(ff, w2_ref[l], preferred_element_type=f32) + b2

        # ================= residual + LayerNorm 2 =================
        h2 = h1n + ff
        mu2 = jnp.mean(h2, axis=-1, keepdims=True)
        var2 = jnp.mean((h2 - mu2) ** 2, axis=-1, keepdims=True)
        x2 = (h2 - mu2) * lax.rsqrt(var2 + eps) * ln2w + ln2b

    # ---- final x[:, 0, :]  (row b*S of the flattened activations) ----
    for b in range(B):
        o_ref[b:b + 1, :] = x2[b * S:b * S + 1, :].astype(o_ref.dtype)


# ----------------------------------------------------------------------------
# Trace-time parameter re-layout (pre-transpose / head-split / pack)
# ----------------------------------------------------------------------------
def pack_params(layers_params, nhead, batch):
    """Re-layout torch-style per-layer params for the fused kernel (one-off, outside kernel)."""
    E = layers_params[0][2].shape[0]      # wo: (E, E)
    F = layers_params[0][8].shape[0]      # w1: (F, E)
    H = nhead
    hd = E // H
    HB = H * batch

    def tile_heads(a):                    # (H, ...) -> (H*B, ...): n = h*B + b
        return jnp.broadcast_to(a[:, None], (H, batch) + a.shape[1:]).reshape((HB,) + a.shape[1:])

    wq_l, wk_l, wv_l, bqkv_l, wo_l = [], [], [], [], []
    w1_l, w2_l, b1_l, vece_l = [], [], [], []
    for (wqkv, bqkv, wo, bo, ln1w, ln1b, ln2w, ln2b, w1, b1, w2, b2) in layers_params:
        # torch Linear layout is (out, in); head-split the output dim -> (H, E_in, hd)
        for dst, w in zip((wq_l, wk_l, wv_l), (wqkv[:E], wqkv[E:2 * E], wqkv[2 * E:])):
            dst.append(tile_heads(jnp.transpose(w.T.reshape(E, H, hd), (1, 0, 2))))
        for j in range(3):                                             # q, k, v biases
            bqkv_l.append(tile_heads(bqkv[j * E:(j + 1) * E].reshape(H, hd)))
        wo_l.append(tile_heads(wo.T.reshape(H, hd, E)))                # (H, hd, E)
        w1_l.append(w1.T)                                              # (E, F)
        w2_l.append(w2.T)                                              # (F, E)
        b1_l.append(b1.reshape(1, F))
        vece_l.append(jnp.stack([bo, ln1w, ln1b, ln2w, ln2b, b2]))     # (6, E)

    return (jnp.concatenate(wq_l, 0),      # (L*HB, E, hd)
            jnp.concatenate(wk_l, 0),      # (L*HB, E, hd)
            jnp.concatenate(wv_l, 0),      # (L*HB, E, hd)
            jnp.stack(bqkv_l, 0),          # (3*L, HB, hd)
            jnp.concatenate(wo_l, 0),      # (L*HB, hd, E)
            jnp.stack(w1_l, 0),            # (L, E, F)
            jnp.stack(w2_l, 0),            # (L, F, E)
            jnp.stack(b1_l, 0),            # (L, 1, F)
            jnp.stack(vece_l, 0))          # (L, 6, E)


def transformer_layer_forward(x, pe, layers_params, nhead):
    """Full TransformerLayer.forward as a single fused Pallas call."""
    B, S, E = x.shape
    L = len(layers_params)
    packed = pack_params(layers_params, nhead, B)
    kernel = functools.partial(transformer_layer_kernel, nhead=nhead, num_layers=L)
    n_in = 2 + len(packed)
    vmem = lambda: pl.BlockSpec(memory_space=pltpu.MemorySpace.VMEM)
    return pl.pallas_call(
        kernel,
        out_shape=jax.ShapeDtypeStruct((B, E), x.dtype),
        in_specs=[vmem() for _ in range(n_in)],
        out_specs=vmem(),
    )(x, pe, *packed)


# ----------------------------------------------------------------------------
# Module construction helpers (match the PyTorch spec)
# ----------------------------------------------------------------------------
def make_sine_pe(input_len, emb_dim):
    position = jnp.arange(input_len, dtype=jnp.float32)[:, None]
    div_term = jnp.exp(jnp.arange(0, emb_dim, 2, dtype=jnp.float32)
                       * (-math.log(10000.0) / emb_dim))
    pe = jnp.zeros((input_len, emb_dim), dtype=jnp.float32)
    pe = pe.at[:, 0::2].set(jnp.sin(position * div_term))
    pe = pe.at[:, 1::2].set(jnp.cos(position * div_term))
    return pe[None, :, :]                                           # (1, S, E)


def init_layer_params(key, emb_dim, dim_feedforward):
    """torch-style parameter shapes for one nn.TransformerEncoderLayer."""
    E, F = emb_dim, dim_feedforward
    ks = jax.random.split(key, 12)
    s = 0.02
    return (
        jax.random.normal(ks[0], (3 * E, E), jnp.float32) * s,      # in_proj weight
        jax.random.normal(ks[1], (3 * E,), jnp.float32) * s,        # in_proj bias
        jax.random.normal(ks[2], (E, E), jnp.float32) * s,          # out_proj weight
        jax.random.normal(ks[3], (E,), jnp.float32) * s,            # out_proj bias
        1.0 + 0.1 * jax.random.normal(ks[4], (E,), jnp.float32),    # norm1 weight
        0.1 * jax.random.normal(ks[5], (E,), jnp.float32),          # norm1 bias
        1.0 + 0.1 * jax.random.normal(ks[6], (E,), jnp.float32),    # norm2 weight
        0.1 * jax.random.normal(ks[7], (E,), jnp.float32),          # norm2 bias
        jax.random.normal(ks[8], (F, E), jnp.float32) * s,          # linear1 weight
        jax.random.normal(ks[9], (F,), jnp.float32) * s,            # linear1 bias
        jax.random.normal(ks[10], (E, F), jnp.float32) * s,         # linear2 weight
        jax.random.normal(ks[11], (E,), jnp.float32) * s,           # linear2 bias
    )


def reference_forward(x, pe, layers_params, nhead, eps=1e-5):
    """Pure-JAX reference of the PyTorch module (eval mode), for verification."""
    B, S, E = x.shape
    H, hd = nhead, E // nhead
    x = x + pe
    for (wqkv, bqkv, wo, bo, ln1w, ln1b, ln2w, ln2b, w1, b1, w2, b2) in layers_params:
        qkv = x @ wqkv.T + bqkv
        q, k, v = qkv[..., :E], qkv[..., E:2 * E], qkv[..., 2 * E:]
        q = q.reshape(B, S, H, hd).transpose(0, 2, 1, 3) / math.sqrt(hd)
        k = k.reshape(B, S, H, hd).transpose(0, 2, 1, 3)
        v = v.reshape(B, S, H, hd).transpose(0, 2, 1, 3)
        p = jax.nn.softmax(jnp.einsum('bhqd,bhkd->bhqk', q, k), axis=-1)
        ctx = jnp.einsum('bhqk,bhkd->bhqd', p, v).transpose(0, 2, 1, 3).reshape(B, S, E)
        attn = ctx @ wo.T + bo
        h1 = x + attn
        mu = h1.mean(-1, keepdims=True)
        var = ((h1 - mu) ** 2).mean(-1, keepdims=True)
        h1 = (h1 - mu) / jnp.sqrt(var + eps) * ln1w + ln1b
        f = jnp.maximum(h1 @ w1.T + b1, 0.0) @ w2.T + b2
        h2 = h1 + f
        mu = h2.mean(-1, keepdims=True)
        var = ((h2 - mu) ** 2).mean(-1, keepdims=True)
        x = (h2 - mu) / jnp.sqrt(var + eps) * ln2w + ln2b
    return x[:, 0, :]


# ----------------------------------------------------------------------------
# Demo
# ----------------------------------------------------------------------------
if __name__ == "__main__":
    params = dict(emb_dim=32, dim_feedforward=64, nhead=4,
                  dropout=0.1, pe_dropout=0.1, num_layers=2)
    input_len = 8          # chunk_num + 1
    batch = 2

    key = jax.random.PRNGKey(0)
    kx, kp = jax.random.split(key)
    x = jax.random.normal(kx, (batch, input_len, params['emb_dim']), jnp.float32)
    pe = make_sine_pe(input_len, params['emb_dim'])
    layers_params = [init_layer_params(k, params['emb_dim'], params['dim_feedforward'])
                     for k in jax.random.split(kp, params['num_layers'])]

    fwd = jax.jit(transformer_layer_forward, static_argnames="nhead")
    out = jax.block_until_ready(fwd(x, pe, layers_params, nhead=params['nhead']))
    assert out.shape == (batch, params['emb_dim'])

    ref = jax.block_until_ready(reference_forward(x, pe, layers_params, params['nhead']))
    assert bool(jnp.allclose(out, ref, atol=1e-2, rtol=1e-2)), "kernel mismatch vs reference"
    print("KERNEL_OK")
</pallas_src>

<mosaic_0001>
module attributes {stable_mosaic.version = 11 : i64} {
  func.func @transformer_layer_kernel(%arg0: memref<2x8x32xf32, #tpu.memory_space<vmem>>, %arg1: memref<1x8x32xf32, #tpu.memory_space<vmem>>, %arg2: memref<16x32x8xf32, #tpu.memory_space<vmem>>, %arg3: memref<16x32x8xf32, #tpu.memory_space<vmem>>, %arg4: memref<16x32x8xf32, #tpu.memory_space<vmem>>, %arg5: memref<6x8x8xf32, #tpu.memory_space<vmem>>, %arg6: memref<16x8x32xf32, #tpu.memory_space<vmem>>, %arg7: memref<2x32x64xf32, #tpu.memory_space<vmem>>, %arg8: memref<2x64x32xf32, #tpu.memory_space<vmem>>, %arg9: memref<2x1x64xf32, #tpu.memory_space<vmem>>, %arg10: memref<2x6x32xf32, #tpu.memory_space<vmem>>, %arg11: memref<2x32xf32, #tpu.memory_space<vmem>>) attributes {dimension_semantics = [], scalar_prefetch = 0 : i64, scratch_operands = 0 : i64, tpu.core_type = #tpu.core_type<tc>} {
    %c0 = arith.constant 0 : index
    %c0_0 = arith.constant 0 : index
    %c0_1 = arith.constant 0 : index
    %0 = vector.load %arg0[%c0, %c0_0, %c0_1] : memref<2x8x32xf32, #tpu.memory_space<vmem>>, vector<2x8x32xf32>
    %c0_2 = arith.constant 0 : index
    %c0_3 = arith.constant 0 : index
    %c0_4 = arith.constant 0 : index
    %1 = vector.load %arg1[%c0_2, %c0_3, %c0_4] : memref<1x8x32xf32, #tpu.memory_space<vmem>>, vector<1x8x32xf32>
    %2 = vector.broadcast %1 : vector<1x8x32xf32> to vector<2x8x32xf32>
    %3 = arith.addf %0, %2 : vector<2x8x32xf32>
    %4 = vector.shape_cast %3 : vector<2x8x32xf32> to vector<16x32xf32>
    %5 = vector.shape_cast %4 : vector<16x32xf32> to vector<2x8x32xf32>
    %6 = vector.shape_cast %5 : vector<2x8x32xf32> to vector<1x2x8x32xf32>
    %7 = vector.shape_cast %6 : vector<1x2x8x32xf32> to vector<1x2x8x32xf32>
    %8 = vector.broadcast %7 : vector<1x2x8x32xf32> to vector<4x2x8x32xf32>
    %9 = vector.shape_cast %8 : vector<4x2x8x32xf32> to vector<8x8x32xf32>
    %c0_5 = arith.constant 0 : index
    %c0_6 = arith.constant 0 : index
    %c0_7 = arith.constant 0 : index
    %10 = vector.load %arg2[%c0_5, %c0_6, %c0_7] : memref<16x32x8xf32, #tpu.memory_space<vmem>>, vector<8x32x8xf32>
    %c0_8 = arith.constant 0 : index
    %c0_9 = arith.constant 0 : index
    %c0_10 = arith.constant 0 : index
    %11 = vector.load %arg3[%c0_8, %c0_9, %c0_10] : memref<16x32x8xf32, #tpu.memory_space<vmem>>, vector<8x32x8xf32>
    %c0_11 = arith.constant 0 : index
    %c0_12 = arith.constant 0 : index
    %c0_13 = arith.constant 0 : index
    %12 = vector.load %arg4[%c0_11, %c0_12, %c0_13] : memref<16x32x8xf32, #tpu.memory_space<vmem>>, vector<8x32x8xf32>
    %c0_14 = arith.constant 0 : index
    %c0_15 = arith.constant 0 : index
    %c0_16 = arith.constant 0 : index
    %13 = vector.load %arg5[%c0_14, %c0_15, %c0_16] : memref<6x8x8xf32, #tpu.memory_space<vmem>>, vector<1x8x8xf32>
    %14 = vector.shape_cast %13 : vector<1x8x8xf32> to vector<8x8xf32>
    %15 = vector.shape_cast %14 : vector<8x8xf32> to vector<8x1x8xf32>
    %c1 = arith.constant 1 : index
    %c0_17 = arith.constant 0 : index
    %c0_18 = arith.constant 0 : index
    %16 = vector.load %arg5[%c1, %c0_17, %c0_18] : memref<6x8x8xf32, #tpu.memory_space<vmem>>, vector<1x8x8xf32>
    %17 = vector.shape_cast %16 : vector<1x8x8xf32> to vector<8x8xf32>
    %18 = vector.shape_cast %17 : vector<8x8xf32> to vector<8x1x8xf32>
    %c2 = arith.constant 2 : index
    %c0_19 = arith.constant 0 : index
    %c0_20 = arith.constant 0 : index
    %19 = vector.load %arg5[%c2, %c0_19, %c0_20] : memref<6x8x8xf32, #tpu.memory_space<vmem>>, vector<1x8x8xf32>
    %20 = vector.shape_cast %19 : vector<1x8x8xf32> to vector<8x8xf32>
    %21 = vector.shape_cast %20 : vector<8x8xf32> to vector<8x1x8xf32>
    "tpu.trace_start"() <{level = 10 : i32, message = "nse,ned->nsd"}> : () -> ()
    %cst = arith.constant dense<0.000000e+00> : vector<8x8x8xf32>
    %22 = tpu.matmul %9, %10, %cst {dimension_numbers = #tpu.dot_dimension_numbers<[2], [1], [1], [2], [0, 0, 0, 1, 1, 2], [0], [0]>} : vector<8x8x32xf32>, vector<8x32x8xf32>, vector<8x8x8xf32> -> vector<8x8x8xf32>
    "tpu.trace_stop"() : () -> ()
    %23 = vector.broadcast %15 : vector<8x1x8xf32> to vector<8x8x8xf32>
    %24 = arith.addf %22, %23 : vector<8x8x8xf32>
    "tpu.trace_start"() <{level = 10 : i32, message = "nse,ned->nsd"}> : () -> ()
    %cst_21 = arith.constant dense<0.000000e+00> : vector<8x8x8xf32>
    %25 = tpu.matmul %9, %11, %cst_21 {dimension_numbers = #tpu.dot_dimension_numbers<[2], [1], [1], [2], [0, 0, 0, 1, 1, 2], [0], [0]>} : vector<8x8x32xf32>, vector<8x32x8xf32>, vector<8x8x8xf32> -> vector<8x8x8xf32>
    "tpu.trace_stop"() : () -> ()
    %26 = vector.broadcast %18 : vector<8x1x8xf32> to vector<8x8x8xf32>
    %27 = arith.addf %25, %26 : vector<8x8x8xf32>
    "tpu.trace_start"() <{level = 10 : i32, message = "nse,ned->nsd"}> : () -> ()
    %cst_22 = arith.constant dense<0.000000e+00> : vector<8x8x8xf32>
    %28 = tpu.matmul %9, %12, %cst_22 {dimension_numbers = #tpu.dot_dimension_numbers<[2], [1], [1], [2], [0, 0, 0, 1, 1, 2], [0], [0]>} : vector<8x8x32xf32>, vector<8x32x8xf32>, vector<8x8x8xf32> -> vector<8x8x8xf32>
    "tpu.trace_stop"() : () -> ()
    %29 = vector.broadcast %21 : vector<8x1x8xf32> to vector<8x8x8xf32>
    %30 = arith.addf %28, %29 : vector<8x8x8xf32>
    "tpu.trace_start"() <{level = 10 : i32, message = "nqd,nkd->nqk"}> : () -> ()
    %cst_23 = arith.constant dense<0.000000e+00> : vector<8x8x8xf32>
    %31 = tpu.matmul %24, %27, %cst_23 {dimension_numbers = #tpu.dot_dimension_numbers<[2], [2], [1], [1], [0, 0, 0, 1, 1, 1], [0], [0]>} : vector<8x8x8xf32>, vector<8x8x8xf32>, vector<8x8x8xf32> -> vector<8x8x8xf32>
    "tpu.trace_stop"() : () -> ()
    %cst_24 = arith.constant 0.353553385 : f32
    %32 = vector.broadcast %cst_24 : f32 to vector<8x8x8xf32>
    %33 = arith.mulf %31, %32 : vector<8x8x8xf32>
    %cst_25 = arith.constant dense<0xFF800000> : vector<8x8xf32>
    %34 = vector.multi_reduction <maximumf>, %33, %cst_25 [2] : vector<8x8x8xf32> to vector<8x8xf32>
    %35 = vector.shape_cast %34 : vector<8x8xf32> to vector<8x8x1xf32>
    %36 = vector.broadcast %35 : vector<8x8x1xf32> to vector<8x8x8xf32>
    %37 = arith.subf %33, %36 : vector<8x8x8xf32>
    %38 = math.exp %37 : vector<8x8x8xf32>
    %cst_26 = arith.constant dense<0.000000e+00> : vector<8x8xf32>
    %39 = vector.multi_reduction <add>, %38, %cst_26 [2] : vector<8x8x8xf32> to vector<8x8xf32>
    %40 = vector.shape_cast %39 : vector<8x8xf32> to vector<8x8x1xf32>
    %41 = tpu.reciprocal %40 {approx = true} : vector<8x8x1xf32> -> vector<8x8x1xf32>
    %42 = vector.broadcast %41 : vector<8x8x1xf32> to vector<8x8x8xf32>
    %43 = arith.mulf %38, %42 : vector<8x8x8xf32>
    "tpu.trace_start"() <{level = 10 : i32, message = "nqk,nkd->nqd"}> : () -> ()
    %cst_27 = arith.constant dense<0.000000e+00> : vector<8x8x8xf32>
    %44 = tpu.matmul %43, %30, %cst_27 {dimension_numbers = #tpu.dot_dimension_numbers<[2], [1], [1], [2], [0, 0, 0, 1, 1, 2], [0], [0]>} : vector<8x8x8xf32>, vector<8x8x8xf32>, vector<8x8x8xf32> -> vector<8x8x8xf32>
    "tpu.trace_stop"() : () -> ()
    %c0_28 = arith.constant 0 : index
    %c0_29 = arith.constant 0 : index
    %c0_30 = arith.constant 0 : index
    %45 = vector.load %arg6[%c0_28, %c0_29, %c0_30] : memref<16x8x32xf32, #tpu.memory_space<vmem>>, vector<8x8x32xf32>
    "tpu.trace_start"() <{level = 10 : i32, message = "nsd,nde->nse"}> : () -> ()
    %cst_31 = arith.constant dense<0.000000e+00> : vector<8x8x32xf32>
    %46 = tpu.matmul %44, %45, %cst_31 {dimension_numbers = #tpu.dot_dimension_numbers<[2], [1], [1], [2], [0, 0, 0, 1, 1, 2], [0], [0]>} : vector<8x8x8xf32>, vector<8x8x32xf32>, vector<8x8x32xf32> -> vector<8x8x32xf32>
    "tpu.trace_stop"() : () -> ()
    %47 = vector.extract_strided_slice %46 {offsets = [0, 0, 0], sizes = [2, 8, 32], strides = [1, 1, 1]} : vector<8x8x32xf32> to vector<2x8x32xf32>
    %48 = vector.extract_strided_slice %46 {offsets = [2, 0, 0], sizes = [2, 8, 32], strides = [1, 1, 1]} : vector<8x8x32xf32> to vector<2x8x32xf32>
    %49 = arith.addf %47, %48 : vector<2x8x32xf32>
    %50 = vector.extract_strided_slice %46 {offsets = [4, 0, 0], sizes = [2, 8, 32], strides = [1, 1, 1]} : vector<8x8x32xf32> to vector<2x8x32xf32>
    %51 = arith.addf %49, %50 : vector<2x8x32xf32>
    %52 = vector.extract_strided_slice %46 {offsets = [6, 0, 0], sizes = [2, 8, 32], strides = [1, 1, 1]} : vector<8x8x32xf32> to vector<2x8x32xf32>
    %53 = arith.addf %51, %52 : vector<2x8x32xf32>
    %c0_32 = arith.constant 0 : index
    %c0_33 = arith.constant 0 : index
    %c0_34 = arith.constant 0 : index
    %54 = vector.load %arg10[%c0_32, %c0_33, %c0_34] : memref<2x6x32xf32, #tpu.memory_space<vmem>>, vector<1x6x32xf32>
    %55 = vector.shape_cast %54 : vector<1x6x32xf32> to vector<6x32xf32>
    %56 = vector.extract_strided_slice %55 {offsets = [0, 0], sizes = [1, 32], strides = [1, 1]} : vector<6x32xf32> to vector<1x32xf32>
    %57 = vector.extract_strided_slice %55 {offsets = [1, 0], sizes = [1, 32], strides = [1, 1]} : vector<6x32xf32> to vector<1x32xf32>
    %58 = vector.extract_strided_slice %55 {offsets = [2, 0], sizes = [1, 32], strides = [1, 1]} : vector<6x32xf32> to vector<1x32xf32>
    %59 = vector.extract_strided_slice %55 {offsets = [3, 0], sizes = [1, 32], strides = [1, 1]} : vector<6x32xf32> to vector<1x32xf32>
    %60 = vector.extract_strided_slice %55 {offsets = [4, 0], sizes = [1, 32], strides = [1, 1]} : vector<6x32xf32> to vector<1x32xf32>
    %61 = vector.extract_strided_slice %55 {offsets = [5, 0], sizes = [1, 32], strides = [1, 1]} : vector<6x32xf32> to vector<1x32xf32>
    %62 = vector.shape_cast %53 : vector<2x8x32xf32> to vector<16x32xf32>
    %63 = vector.broadcast %56 : vector<1x32xf32> to vector<16x32xf32>
    %64 = arith.addf %62, %63 : vector<16x32xf32>
    %65 = arith.addf %4, %64 : vector<16x32xf32>
    %cst_35 = arith.constant dense<0.000000e+00> : vector<16xf32>
    %66 = vector.multi_reduction <add>, %65, %cst_35 [1] : vector<16x32xf32> to vector<16xf32>
    %67 = vector.shape_cast %66 : vector<16xf32> to vector<16x1xf32>
    %cst_36 = arith.constant 3.200000e+01 : f32
    %68 = vector.broadcast %cst_36 : f32 to vector<16x1xf32>
    %69 = arith.divf %67, %68 : vector<16x1xf32>
    %70 = vector.broadcast %69 : vector<16x1xf32> to vector<16x32xf32>
    %71 = arith.subf %65, %70 : vector<16x32xf32>
    %72 = arith.mulf %71, %71 : vector<16x32xf32>
    %cst_37 = arith.constant dense<0.000000e+00> : vector<16xf32>
    %73 = vector.multi_reduction <add>, %72, %cst_37 [1] : vector<16x32xf32> to vector<16xf32>
    %74 = vector.shape_cast %73 : vector<16xf32> to vector<16x1xf32>
    %cst_38 = arith.constant 3.200000e+01 : f32
    %75 = vector.broadcast %cst_38 : f32 to vector<16x1xf32>
    %76 = arith.divf %74, %75 : vector<16x1xf32>
    %77 = vector.broadcast %69 : vector<16x1xf32> to vector<16x32xf32>
    %78 = arith.subf %65, %77 : vector<16x32xf32>
    %cst_39 = arith.constant 9.99999974E-6 : f32
    %79 = vector.broadcast %cst_39 : f32 to vector<16x1xf32>
    %80 = arith.addf %76, %79 : vector<16x1xf32>
    %81 = math.rsqrt %80 : vector<16x1xf32>
    %82 = vector.broadcast %81 : vector<16x1xf32> to vector<16x32xf32>
    %83 = arith.mulf %78, %82 : vector<16x32xf32>
    %84 = vector.broadcast %57 : vector<1x32xf32> to vector<16x32xf32>
    %85 = arith.mulf %83, %84 : vector<16x32xf32>
    %86 = vector.broadcast %58 : vector<1x32xf32> to vector<16x32xf32>
    %87 = arith.addf %85, %86 : vector<16x32xf32>
    %c0_40 = arith.constant 0 : index
    %c0_41 = arith.constant 0 : index
    %c0_42 = arith.constant 0 : index
    %88 = vector.load %arg7[%c0_40, %c0_41, %c0_42] : memref<2x32x64xf32, #tpu.memory_space<vmem>>, vector<1x32x64xf32>
    %89 = vector.shape_cast %88 : vector<1x32x64xf32> to vector<32x64xf32>
    %cst_43 = arith.constant dense<0.000000e+00> : vector<16x64xf32>
    %90 = tpu.matmul %87, %89, %cst_43 {dimension_numbers = #tpu.dot_dimension_numbers<[1], [0], [0], [1], [0, 0, 1, 1], [], []>} : vector<16x32xf32>, vector<32x64xf32>, vector<16x64xf32> -> vector<16x64xf32>
    %c0_44 = arith.constant 0 : index
    %c0_45 = arith.constant 0 : index
    %c0_46 = arith.constant 0 : index
    %91 = vector.load %arg9[%c0_44, %c0_45, %c0_46] : memref<2x1x64xf32, #tpu.memory_space<vmem>>, vector<1x1x64xf32>
    %92 = vector.shape_cast %91 : vector<1x1x64xf32> to vector<1x64xf32>
    %93 = vector.broadcast %92 : vector<1x64xf32> to vector<16x64xf32>
    %94 = arith.addf %90, %93 : vector<16x64xf32>
    %cst_47 = arith.constant 0.000000e+00 : f32
    %95 = vector.broadcast %cst_47 : f32 to vector<16x64xf32>
    %96 = arith.maximumf %94, %95 : vector<16x64xf32>
    %c0_48 = arith.constant 0 : index
    %c0_49 = arith.constant 0 : index
    %c0_50 = arith.constant 0 : index
    %97 = vector.load %arg8[%c0_48, %c0_49, %c0_50] : memref<2x64x32xf32, #tpu.memory_space<vmem>>, vector<1x64x32xf32>
    %98 = vector.shape_cast %97 : vector<1x64x32xf32> to vector<64x32xf32>
    %cst_51 = arith.constant dense<0.000000e+00> : vector<16x32xf32>
    %99 = tpu.matmul %96, %98, %cst_51 {dimension_numbers = #tpu.dot_dimension_numbers<[1], [0], [0], [1], [0, 0, 1, 1], [], []>} : vector<16x64xf32>, vector<64x32xf32>, vector<16x32xf32> -> vector<16x32xf32>
    %100 = vector.broadcast %61 : vector<1x32xf32> to vector<16x32xf32>
    %101 = arith.addf %99, %100 : vector<16x32xf32>
    %102 = arith.addf %87, %101 : vector<16x32xf32>
    %cst_52 = arith.constant dense<0.000000e+00> : vector<16xf32>
    %103 = vector.multi_reduction <add>, %102, %cst_52 [1] : vector<16x32xf32> to vector<16xf32>
    %104 = vector.shape_cast %103 : vector<16xf32> to vector<16x1xf32>
    %cst_53 = arith.constant 3.200000e+01 : f32
    %105 = vector.broadcast %cst_53 : f32 to vector<16x1xf32>
    %106 = arith.divf %104, %105 : vector<16x1xf32>
    %107 = vector.broadcast %106 : vector<16x1xf32> to vector<16x32xf32>
    %108 = arith.subf %102, %107 : vector<16x32xf32>
    %109 = arith.mulf %108, %108 : vector<16x32xf32>
    %cst_54 = arith.constant dense<0.000000e+00> : vector<16xf32>
    %110 = vector.multi_reduction <add>, %109, %cst_54 [1] : vector<16x32xf32> to vector<16xf32>
    %111 = vector.shape_cast %110 : vector<16xf32> to vector<16x1xf32>
    %cst_55 = arith.constant 3.200000e+01 : f32
    %112 = vector.broadcast %cst_55 : f32 to vector<16x1xf32>
    %113 = arith.divf %111, %112 : vector<16x1xf32>
    %114 = vector.broadcast %106 : vector<16x1xf32> to vector<16x32xf32>
    %115 = arith.subf %102, %114 : vector<16x32xf32>
    %cst_56 = arith.constant 9.99999974E-6 : f32
    %116 = vector.broadcast %cst_56 : f32 to vector<16x1xf32>
    %117 = arith.addf %113, %116 : vector<16x1xf32>
    %118 = math.rsqrt %117 : vector<16x1xf32>
    %119 = vector.broadcast %118 : vector<16x1xf32> to vector<16x32xf32>
    %120 = arith.mulf %115, %119 : vector<16x32xf32>
    %121 = vector.broadcast %59 : vector<1x32xf32> to vector<16x32xf32>
    %122 = arith.mulf %120, %121 : vector<16x32xf32>
    %123 = vector.broadcast %60 : vector<1x32xf32> to vector<16x32xf32>
    %124 = arith.addf %122, %123 : vector<16x32xf32>
    %125 = vector.shape_cast %124 : vector<16x32xf32> to vector<2x8x32xf32>
    %126 = vector.shape_cast %125 : vector<2x8x32xf32> to vector<1x2x8x32xf32>
    %127 = vector.shape_cast %126 : vector<1x2x8x32xf32> to vector<1x2x8x32xf32>
    %128 = vector.broadcast %127 : vector<1x2x8x32xf32> to vector<4x2x8x32xf32>
    %129 = vector.shape_cast %128 : vector<4x2x8x32xf32> to vector<8x8x32xf32>
    %c8 = arith.constant 8 : index
    %c0_57 = arith.constant 0 : index
    %c0_58 = arith.constant 0 : index
    %130 = vector.load %arg2[%c8, %c0_57, %c0_58] : memref<16x32x8xf32, #tpu.memory_space<vmem>>, vector<8x32x8xf32>
    %c8_59 = arith.constant 8 : index
    %c0_60 = arith.constant 0 : index
    %c0_61 = arith.constant 0 : index
    %131 = vector.load %arg3[%c8_59, %c0_60, %c0_61] : memref<16x32x8xf32, #tpu.memory_space<vmem>>, vector<8x32x8xf32>
    %c8_62 = arith.constant 8 : index
    %c0_63 = arith.constant 0 : index
    %c0_64 = arith.constant 0 : index
    %132 = vector.load %arg4[%c8_62, %c0_63, %c0_64] : memref<16x32x8xf32, #tpu.memory_space<vmem>>, vector<8x32x8xf32>
    %c3 = arith.constant 3 : index
    %c0_65 = arith.constant 0 : index
    %c0_66 = arith.constant 0 : index
    %133 = vector.load %arg5[%c3, %c0_65, %c0_66] : memref<6x8x8xf32, #tpu.memory_space<vmem>>, vector<1x8x8xf32>
    %134 = vector.shape_cast %133 : vector<1x8x8xf32> to vector<8x8xf32>
    %135 = vector.shape_cast %134 : vector<8x8xf32> to vector<8x1x8xf32>
    %c4 = arith.constant 4 : index
    %c0_67 = arith.constant 0 : index
    %c0_68 = arith.constant 0 : index
    %136 = vector.load %arg5[%c4, %c0_67, %c0_68] : memref<6x8x8xf32, #tpu.memory_space<vmem>>, vector<1x8x8xf32>
    %137 = vector.shape_cast %136 : vector<1x8x8xf32> to vector<8x8xf32>
    %138 = vector.shape_cast %137 : vector<8x8xf32> to vector<8x1x8xf32>
    %c5 = arith.constant 5 : index
    %c0_69 = arith.constant 0 : index
    %c0_70 = arith.constant 0 : index
    %139 = vector.load %arg5[%c5, %c0_69, %c0_70] : memref<6x8x8xf32, #tpu.memory_space<vmem>>, vector<1x8x8xf32>
    %140 = vector.shape_cast %139 : vector<1x8x8xf32> to vector<8x8xf32>
    %141 = vector.shape_cast %140 : vector<8x8xf32> to vector<8x1x8xf32>
    "tpu.trace_start"() <{level = 10 : i32, message = "nse,ned->nsd"}> : () -> ()
    %cst_71 = arith.constant dense<0.000000e+00> : vector<8x8x8xf32>
    %142 = tpu.matmul %129, %130, %cst_71 {dimension_numbers = #tpu.dot_dimension_numbers<[2], [1], [1], [2], [0, 0, 0, 1, 1, 2], [0], [0]>} : vector<8x8x32xf32>, vector<8x32x8xf32>, vector<8x8x8xf32> -> vector<8x8x8xf32>
    "tpu.trace_stop"() : () -> ()
    %143 = vector.broadcast %135 : vector<8x1x8xf32> to vector<8x8x8xf32>
    %144 = arith.addf %142, %143 : vector<8x8x8xf32>
    "tpu.trace_start"() <{level = 10 : i32, message = "nse,ned->nsd"}> : () -> ()
    %cst_72 = arith.constant dense<0.000000e+00> : vector<8x8x8xf32>
    %145 = tpu.matmul %129, %131, %cst_72 {dimension_numbers = #tpu.dot_dimension_numbers<[2], [1], [1], [2], [0, 0, 0, 1, 1, 2], [0], [0]>} : vector<8x8x32xf32>, vector<8x32x8xf32>, vector<8x8x8xf32> -> vector<8x8x8xf32>
    "tpu.trace_stop"() : () -> ()
    %146 = vector.broadcast %138 : vector<8x1x8xf32> to vector<8x8x8xf32>
    %147 = arith.addf %145, %146 : vector<8x8x8xf32>
    "tpu.trace_start"() <{level = 10 : i32, message = "nse,ned->nsd"}> : () -> ()
    %cst_73 = arith.constant dense<0.000000e+00> : vector<8x8x8xf32>
    %148 = tpu.matmul %129, %132, %cst_73 {dimension_numbers = #tpu.dot_dimension_numbers<[2], [1], [1], [2], [0, 0, 0, 1, 1, 2], [0], [0]>} : vector<8x8x32xf32>, vector<8x32x8xf32>, vector<8x8x8xf32> -> vector<8x8x8xf32>
    "tpu.trace_stop"() : () -> ()
    %149 = vector.broadcast %141 : vector<8x1x8xf32> to vector<8x8x8xf32>
    %150 = arith.addf %148, %149 : vector<8x8x8xf32>
    "tpu.trace_start"() <{level = 10 : i32, message = "nqd,nkd->nqk"}> : () -> ()
    %cst_74 = arith.constant dense<0.000000e+00> : vector<8x8x8xf32>
    %151 = tpu.matmul %144, %147, %cst_74 {dimension_numbers = #tpu.dot_dimension_numbers<[2], [2], [1], [1], [0, 0, 0, 1, 1, 1], [0], [0]>} : vector<8x8x8xf32>, vector<8x8x8xf32>, vector<8x8x8xf32> -> vector<8x8x8xf32>
    "tpu.trace_stop"() : () -> ()
    %cst_75 = arith.constant 0.353553385 : f32
    %152 = vector.broadcast %cst_75 : f32 to vector<8x8x8xf32>
    %153 = arith.mulf %151, %152 : vector<8x8x8xf32>
    %cst_76 = arith.constant dense<0xFF800000> : vector<8x8xf32>
    %154 = vector.multi_reduction <maximumf>, %153, %cst_76 [2] : vector<8x8x8xf32> to vector<8x8xf32>
    %155 = vector.shape_cast %154 : vector<8x8xf32> to vector<8x8x1xf32>
    %156 = vector.broadcast %155 : vector<8x8x1xf32> to vector<8x8x8xf32>
    %157 = arith.subf %153, %156 : vector<8x8x8xf32>
    %158 = math.exp %157 : vector<8x8x8xf32>
    %cst_77 = arith.constant dense<0.000000e+00> : vector<8x8xf32>
    %159 = vector.multi_reduction <add>, %158, %cst_77 [2] : vector<8x8x8xf32> to vector<8x8xf32>
    %160 = vector.shape_cast %159 : vector<8x8xf32> to vector<8x8x1xf32>
    %161 = tpu.reciprocal %160 {approx = true} : vector<8x8x1xf32> -> vector<8x8x1xf32>
    %162 = vector.broadcast %161 : vector<8x8x1xf32> to vector<8x8x8xf32>
    %163 = arith.mulf %158, %162 : vector<8x8x8xf32>
    "tpu.trace_start"() <{level = 10 : i32, message = "nqk,nkd->nqd"}> : () -> ()
    %cst_78 = arith.constant dense<0.000000e+00> : vector<8x8x8xf32>
    %164 = tpu.matmul %163, %150, %cst_78 {dimension_numbers = #tpu.dot_dimension_numbers<[2], [1], [1], [2], [0, 0, 0, 1, 1, 2], [0], [0]>} : vector<8x8x8xf32>, vector<8x8x8xf32>, vector<8x8x8xf32> -> vector<8x8x8xf32>
    "tpu.trace_stop"() : () -> ()
    %c8_79 = arith.constant 8 : index
    %c0_80 = arith.constant 0 : index
    %c0_81 = arith.constant 0 : index
    %165 = vector.load %arg6[%c8_79, %c0_80, %c0_81] : memref<16x8x32xf32, #tpu.memory_space<vmem>>, vector<8x8x32xf32>
    "tpu.trace_start"() <{level = 10 : i32, message = "nsd,nde->nse"}> : () -> ()
    %cst_82 = arith.constant dense<0.000000e+00> : vector<8x8x32xf32>
    %166 = tpu.matmul %164, %165, %cst_82 {dimension_numbers = #tpu.dot_dimension_numbers<[2], [1], [1], [2], [0, 0, 0, 1, 1, 2], [0], [0]>} : vector<8x8x8xf32>, vector<8x8x32xf32>, vector<8x8x32xf32> -> vector<8x8x32xf32>
    "tpu.trace_stop"() : () -> ()
    %167 = vector.extract_strided_slice %166 {offsets = [0, 0, 0], sizes = [2, 8, 32], strides = [1, 1, 1]} : vector<8x8x32xf32> to vector<2x8x32xf32>
    %168 = vector.extract_strided_slice %166 {offsets = [2, 0, 0], sizes = [2, 8, 32], strides = [1, 1, 1]} : vector<8x8x32xf32> to vector<2x8x32xf32>
    %169 = arith.addf %167, %168 : vector<2x8x32xf32>
    %170 = vector.extract_strided_slice %166 {offsets = [4, 0, 0], sizes = [2, 8, 32], strides = [1, 1, 1]} : vector<8x8x32xf32> to vector<2x8x32xf32>
    %171 = arith.addf %169, %170 : vector<2x8x32xf32>
    %172 = vector.extract_strided_slice %166 {offsets = [6, 0, 0], sizes = [2, 8, 32], strides = [1, 1, 1]} : vector<8x8x32xf32> to vector<2x8x32xf32>
    %173 = arith.addf %171, %172 : vector<2x8x32xf32>
    %c1_83 = arith.constant 1 : index
    %c0_84 = arith.constant 0 : index
    %c0_85 = arith.constant 0 : index
    %174 = vector.load %arg10[%c1_83, %c0_84, %c0_85] : memref<2x6x32xf32, #tpu.memory_space<vmem>>, vector<1x6x32xf32>
    %175 = vector.shape_cast %174 : vector<1x6x32xf32> to vector<6x32xf32>
    %176 = vector.extract_strided_slice %175 {offsets = [0, 0], sizes = [1, 32], strides = [1, 1]} : vector<6x32xf32> to vector<1x32xf32>
    %177 = vector.extract_strided_slice %175 {offsets = [1, 0], sizes = [1, 32], strides = [1, 1]} : vector<6x32xf32> to vector<1x32xf32>
    %178 = vector.extract_strided_slice %175 {offsets = [2, 0], sizes = [1, 32], strides = [1, 1]} : vector<6x32xf32> to vector<1x32xf32>
    %179 = vector.extract_strided_slice %175 {offsets = [3, 0], sizes = [1, 32], strides = [1, 1]} : vector<6x32xf32> to vector<1x32xf32>
    %180 = vector.extract_strided_slice %175 {offsets = [4, 0], sizes = [1, 32], strides = [1, 1]} : vector<6x32xf32> to vector<1x32xf32>
    %181 = vector.extract_strided_slice %175 {offsets = [5, 0], sizes = [1, 32], strides = [1, 1]} : vector<6x32xf32> to vector<1x32xf32>
    %182 = vector.shape_cast %173 : vector<2x8x32xf32> to vector<16x32xf32>
    %183 = vector.broadcast %176 : vector<1x32xf32> to vector<16x32xf32>
    %184 = arith.addf %182, %183 : vector<16x32xf32>
    %185 = arith.addf %124, %184 : vector<16x32xf32>
    %cst_86 = arith.constant dense<0.000000e+00> : vector<16xf32>
    %186 = vector.multi_reduction <add>, %185, %cst_86 [1] : vector<16x32xf32> to vector<16xf32>
    %187 = vector.shape_cast %186 : vector<16xf32> to vector<16x1xf32>
    %cst_87 = arith.constant 3.200000e+01 : f32
    %188 = vector.broadcast %cst_87 : f32 to vector<16x1xf32>
    %189 = arith.divf %187, %188 : vector<16x1xf32>
    %190 = vector.broadcast %189 : vector<16x1xf32> to vector<16x32xf32>
    %191 = arith.subf %185, %190 : vector<16x32xf32>
    %192 = arith.mulf %191, %191 : vector<16x32xf32>
    %cst_88 = arith.constant dense<0.000000e+00> : vector<16xf32>
    %193 = vector.multi_reduction <add>, %192, %cst_88 [1] : vector<16x32xf32> to vector<16xf32>
    %194 = vector.shape_cast %193 : vector<16xf32> to vector<16x1xf32>
    %cst_89 = arith.constant 3.200000e+01 : f32
    %195 = vector.broadcast %cst_89 : f32 to vector<16x1xf32>
    %196 = arith.divf %194, %195 : vector<16x1xf32>
    %197 = vector.broadcast %189 : vector<16x1xf32> to vector<16x32xf32>
    %198 = arith.subf %185, %197 : vector<16x32xf32>
    %cst_90 = arith.constant 9.99999974E-6 : f32
    %199 = vector.broadcast %cst_90 : f32 to vector<16x1xf32>
    %200 = arith.addf %196, %199 : vector<16x1xf32>
    %201 = math.rsqrt %200 : vector<16x1xf32>
    %202 = vector.broadcast %201 : vector<16x1xf32> to vector<16x32xf32>
    %203 = arith.mulf %198, %202 : vector<16x32xf32>
    %204 = vector.broadcast %177 : vector<1x32xf32> to vector<16x32xf32>
    %205 = arith.mulf %203, %204 : vector<16x32xf32>
    %206 = vector.broadcast %178 : vector<1x32xf32> to vector<16x32xf32>
    %207 = arith.addf %205, %206 : vector<16x32xf32>
    %c1_91 = arith.constant 1 : index
    %c0_92 = arith.constant 0 : index
    %c0_93 = arith.constant 0 : index
    %208 = vector.load %arg7[%c1_91, %c0_92, %c0_93] : memref<2x32x64xf32, #tpu.memory_space<vmem>>, vector<1x32x64xf32>
    %209 = vector.shape_cast %208 : vector<1x32x64xf32> to vector<32x64xf32>
    %cst_94 = arith.constant dense<0.000000e+00> : vector<16x64xf32>
    %210 = tpu.matmul %207, %209, %cst_94 {dimension_numbers = #tpu.dot_dimension_numbers<[1], [0], [0], [1], [0, 0, 1, 1], [], []>} : vector<16x32xf32>, vector<32x64xf32>, vector<16x64xf32> -> vector<16x64xf32>
    %c1_95 = arith.constant 1 : index
    %c0_96 = arith.constant 0 : index
    %c0_97 = arith.constant 0 : index
    %211 = vector.load %arg9[%c1_95, %c0_96, %c0_97] : memref<2x1x64xf32, #tpu.memory_space<vmem>>, vector<1x1x64xf32>
    %212 = vector.shape_cast %211 : vector<1x1x64xf32> to vector<1x64xf32>
    %213 = vector.broadcast %212 : vector<1x64xf32> to vector<16x64xf32>
    %214 = arith.addf %210, %213 : vector<16x64xf32>
    %cst_98 = arith.constant 0.000000e+00 : f32
    %215 = vector.broadcast %cst_98 : f32 to vector<16x64xf32>
    %216 = arith.maximumf %214, %215 : vector<16x64xf32>
    %c1_99 = arith.constant 1 : index
    %c0_100 = arith.constant 0 : index
    %c0_101 = arith.constant 0 : index
    %217 = vector.load %arg8[%c1_99, %c0_100, %c0_101] : memref<2x64x32xf32, #tpu.memory_space<vmem>>, vector<1x64x32xf32>
    %218 = vector.shape_cast %217 : vector<1x64x32xf32> to vector<64x32xf32>
    %cst_102 = arith.constant dense<0.000000e+00> : vector<16x32xf32>
    %219 = tpu.matmul %216, %218, %cst_102 {dimension_numbers = #tpu.dot_dimension_numbers<[1], [0], [0], [1], [0, 0, 1, 1], [], []>} : vector<16x64xf32>, vector<64x32xf32>, vector<16x32xf32> -> vector<16x32xf32>
    %220 = vector.broadcast %181 : vector<1x32xf32> to vector<16x32xf32>
    %221 = arith.addf %219, %220 : vector<16x32xf32>
    %222 = arith.addf %207, %221 : vector<16x32xf32>
    %cst_103 = arith.constant dense<0.000000e+00> : vector<16xf32>
    %223 = vector.multi_reduction <add>, %222, %cst_103 [1] : vector<16x32xf32> to vector<16xf32>
    %224 = vector.shape_cast %223 : vector<16xf32> to vector<16x1xf32>
    %cst_104 = arith.constant 3.200000e+01 : f32
    %225 = vector.broadcast %cst_104 : f32 to vector<16x1xf32>
    %226 = arith.divf %224, %225 : vector<16x1xf32>
    %227 = vector.broadcast %226 : vector<16x1xf32> to vector<16x32xf32>
    %228 = arith.subf %222, %227 : vector<16x32xf32>
    %229 = arith.mulf %228, %228 : vector<16x32xf32>
    %cst_105 = arith.constant dense<0.000000e+00> : vector<16xf32>
    %230 = vector.multi_reduction <add>, %229, %cst_105 [1] : vector<16x32xf32> to vector<16xf32>
    %231 = vector.shape_cast %230 : vector<16xf32> to vector<16x1xf32>
    %cst_106 = arith.constant 3.200000e+01 : f32
    %232 = vector.broadcast %cst_106 : f32 to vector<16x1xf32>
    %233 = arith.divf %231, %232 : vector<16x1xf32>
    %234 = vector.broadcast %226 : vector<16x1xf32> to vector<16x32xf32>
    %235 = arith.subf %222, %234 : vector<16x32xf32>
    %cst_107 = arith.constant 9.99999974E-6 : f32
    %236 = vector.broadcast %cst_107 : f32 to vector<16x1xf32>
    %237 = arith.addf %233, %236 : vector<16x1xf32>
    %238 = math.rsqrt %237 : vector<16x1xf32>
    %239 = vector.broadcast %238 : vector<16x1xf32> to vector<16x32xf32>
    %240 = arith.mulf %235, %239 : vector<16x32xf32>
    %241 = vector.broadcast %179 : vector<1x32xf32> to vector<16x32xf32>
    %242 = arith.mulf %240, %241 : vector<16x32xf32>
    %243 = vector.broadcast %180 : vector<1x32xf32> to vector<16x32xf32>
    %244 = arith.addf %242, %243 : vector<16x32xf32>
    %245 = vector.extract_strided_slice %244 {offsets = [0, 0], sizes = [1, 32], strides = [1, 1]} : vector<16x32xf32> to vector<1x32xf32>
    %c0_108 = arith.constant 0 : index
    %c0_109 = arith.constant 0 : index
    %246 = vector.load %arg11[%c0_108, %c0_109] : memref<2x32xf32, #tpu.memory_space<vmem>>, vector<1x32xf32>
    tpu.vector_store %arg11[%c0_108, %c0_109], %245 {strides = array<i32>} : memref<2x32xf32, #tpu.memory_space<vmem>>, vector<1x32xf32>,
    %247 = vector.extract_strided_slice %244 {offsets = [8, 0], sizes = [1, 32], strides = [1, 1]} : vector<16x32xf32> to vector<1x32xf32>
    %c1_110 = arith.constant 1 : index
    %c0_111 = arith.constant 0 : index
    %248 = vector.load %arg11[%c1_110, %c0_111] : memref<2x32xf32, #tpu.memory_space<vmem>>, vector<1x32xf32>
    tpu.vector_store %arg11[%c1_110, %c0_111], %247 {strides = array<i32>} : memref<2x32xf32, #tpu.memory_space<vmem>>, vector<1x32xf32>,
    return
  }
}

</mosaic_0001>

<bundles_post_ra>
// kernel: transformer_layer_forward.1
= control target key start
LH: loop header
LB: loop body
LE: loop exit
PB: predicated region body
PF: predicated region fallthrough
CT: control target
= control target key end

     0   :  { %v10400_v3 = vmov 0.0|0.0   ;;  %vm10401_vm0 = vmmov 0   ;;  %v10402_v11 = vmov 0.0   ;;  %vm335_vm1 = vcmask 261120   ;;  %s11983_s0 = inlined_call_operand.vmem [shape: f32[2,8,32], index: 0, kind: input, shape index: {}]   ;;  %s11984_s1 = inlined_call_operand.vmem [shape: f32[1,8,32], index: 1, kind: input, shape index: {}]   ;;  %s11985_s2 = inlined_call_operand.vmem [shape: f32[16,32,8], index: 2, kind: input, shape index: {}]   ;;  %s11986_s3 = inlined_call_operand.vmem [shape: f32[16,32,8], index: 3, kind: input, shape index: {}]   ;;  %s11987_s4 = inlined_call_operand.vmem [shape: f32[16,32,8], index: 4, kind: input, shape index: {}]   ;;  %s11988_s5 = inlined_call_operand.vmem [shape: f32[6,8,8], index: 5, kind: input, shape index: {}]   ;;  %s11989_s6 = inlined_call_operand.vmem [shape: f32[16,8,32], index: 6, kind: input, shape index: {}]   ;;  %s11990_s7 = inlined_call_operand.vmem [shape: f32[2,32,64], index: 7, kind: input, shape index: {}]   ;;  %s11991_s8 = inlined_call_operand.vmem [shape: f32[2,64,32], index: 8, kind: input, shape index: {}]   ;;  %s11992_s9 = inlined_call_operand.vmem [shape: f32[2,1,64], index: 9, kind: input, shape index: {}]   ;;  %s11993_s10 = inlined_call_operand.vmem [shape: f32[2,6,32], index: 10, kind: input, shape index: {}]   ;;  %s11994_s11 = inlined_call_operand.hbm [shape: f32[2,32], index: 11, kind: output, shape index: {}]  }
   0x1   :  { %v44_v0 = vld [vmem:[%s11985_s2] sm:$0xff]  ;;  %v45_v1 = vld [vmem:[%s11985_s2 + $0x8] sm:$0xff]  ;;  %9949 = vmatprep.subr.bf16.mxu0 %v10400_v3  ;;  %9955 = vmatprep.subr.bf16.mxu1 %v10400_v3  ;;  %v46_v6 = vld [vmem:[%s11985_s2 + $0x10] sm:$0xff] }
   0x2   :  { %v48_v2 = vld [vmem:[%s11985_s2 + $0x20] sm:$0xff]  ;;  %v9950_v4 = vpack.c.bf16 %v45_v1, %v44_v0  ;;  %v49_v5 = vld [vmem:[%s11985_s2 + $0x28] sm:$0xff]  ;;  %v47_v7 = vld [vmem:[%s11985_s2 + $0x18] sm:$0xff]  ;;  %9129 = vmatprep.mubr.msk.f32.mxu0 %vm10401_vm0, %v10402_v11  ;;  %9140 = vmatprep.mubr.msk.f32.mxu1 %vm10401_vm0, %v10402_v11 }
   0x3   :  { %v9956_v8 = vpack.c.bf16 %v49_v5, %v48_v2  ;;  %v50_v9 = vld [vmem:[%s11985_s2 + $0x30] sm:$0xff]  ;;  %v51_v10 = vld [vmem:[%s11985_s2 + $0x38] sm:$0xff]  ;;  %v9953_v12 = vpack.c.bf16 %v47_v7, %v46_v6  ;;  %v39_v13 = vld [vmem:[%s11983_s0] sm:$0xff] }
   0x4   :  { %9951 = vmatpush3.bf16.msra.mxu0 %v9950_v4  ;;  %v41_v14 = vld [vmem:[%s11984_s1] sm:$0xff]  ;;  %v9959_v15 = vpack.c.bf16 %v51_v10, %v50_v9  ;;  %v40_v16 = vld [vmem:[%s11983_s0 + $0x8] sm:$0xff]  ;;  %v54_v25 = vld [vmem:[%s11985_s2 + $0x50] sm:$0xff] }
   0x5   :  { %9957 = vmatpush3.bf16.msra.mxu1 %v9956_v8  ;;  %9952 = vmatprep.subr.bf16.mxu0 %v10400_v3  ;;  %v52_v17 = vld [vmem:[%s11985_s2 + $0x40] sm:$0xff]  ;;  %v53_v18 = vld [vmem:[%s11985_s2 + $0x48] sm:$0xff]  ;;  %v10518_v21 = vadd.f32 %v41_v14, %v39_v13  ;;  %v10520_v22 = vadd.f32 %v41_v14, %v40_v16  ;;  %v55_v26 = vld [vmem:[%s11985_s2 + $0x58] sm:$0xff] }
   0x6   :  { %9958 = vmatprep.subr.bf16.mxu1 %v10400_v3  ;;  %v56_v19 = vld [vmem:[%s11985_s2 + $0x60] sm:$0xff]  ;;  %v57_v20 = vld [vmem:[%s11985_s2 + $0x68] sm:$0xff]  ;;  %v9962_v23 = vpack.c.bf16 %v53_v18, %v52_v17  ;;  %v58_v27 = vld [vmem:[%s11985_s2 + $0x70] sm:$0xff]  ;;  %v9965_v29 = vpack.c.bf16 %v55_v26, %v54_v25 }
   0x7   :  { %v9968_v24 = vpack.c.bf16 %v57_v20, %v56_v19  ;;  %v59_v28 = vld [vmem:[%s11985_s2 + $0x78] sm:$0xff]  ;;  %v60_v31 = vld [vmem:[%s11985_s2 + $0x80] sm:$0xff]  ;;  %v61_v32 = vld [vmem:[%s11985_s2 + $0x88] sm:$0xff] }
   0x8   :  { %9954 = vmatpush3.bf16.msra.mxu0 %v9953_v12  ;;  %v9971_v30 = vpack.c.bf16 %v59_v28, %v58_v27  ;;  %v64_v33 = vld [vmem:[%s11985_s2 + $0xa0] sm:$0xff]  ;;  %v65_v34 = vld [vmem:[%s11985_s2 + $0xa8] sm:$0xff]  ;;  %v9974_v35 = vpack.c.bf16 %v61_v32, %v60_v31  ;;  %v62_v37 = vld [vmem:[%s11985_s2 + $0x90] sm:$0xff] }
   0x9   :  { %9960 = vmatpush3.bf16.msra.mxu1 %v9959_v15  ;;  %9961 = vmatprep.subr.bf16.mxu0 %v10400_v3  ;;  %v9980_v36 = vpack.c.bf16 %v65_v34, %v64_v33  ;;  %v63_v38 = vld [vmem:[%s11985_s2 + $0x98] sm:$0xff]  ;;  %v66_v39 = vld [vmem:[%s11985_s2 + $0xb0] sm:$0xff]  ;;  %v68_v43 = vld [vmem:[%s11985_s2 + $0xc0] sm:$0xff] }
   0xa   :  { %9967 = vmatprep.subr.bf16.mxu1 %v10400_v3  ;;  %v67_v40 = vld [vmem:[%s11985_s2 + $0xb8] sm:$0xff]  ;;  %v9977_v41 = vpack.c.bf16 %v63_v38, %v62_v37  ;;  %v69_v44 = vld [vmem:[%s11985_s2 + $0xc8] sm:$0xff]  ;;  %v72_v45 = vld [vmem:[%s11985_s2 + $0xe0] sm:$0xff] }
   0xb   :  { %9130 = vmatmul.mubr.msk.f32.vlgmr.msra.gmra.mrb[0].mxu0 %vm335_vm1, %v10518_v21  ;;  %v9983_v42 = vpack.c.bf16 %v67_v40, %v66_v39  ;;  %v73_v46 = vld [vmem:[%s11985_s2 + $0xe8] sm:$0xff]  ;;  %v9986_v47 = vpack.c.bf16 %v69_v44, %v68_v43 }
   0xc   :  { %9141 = vmatmul.mubr.msk.f32.vlgmr.msra.gmra.mrb[0].mxu1 %vm335_vm1, %v10520_v22  ;;  %9963 = vmatpush3.bf16.msra.mxu0 %v9962_v23 }
   0xd   :  { %9969 = vmatpush3.bf16.msra.mxu1 %v9968_v24  ;;  %9964 = vmatprep.subr.bf16.mxu0 %v10400_v3 }
   0xe   :  { %9970 = vmatprep.subr.bf16.mxu1 %v10400_v3  ;;  %9151 = vmatprep.mubr.msk.f32.mxu0 %vm10401_vm0, %v10402_v11 }
   0xf   :  { %9162 = vmatprep.mubr.msk.f32.mxu1 %vm10401_vm0, %v10402_v11 }
  0x10   :  { %9966 = vmatpush3.bf16.msra.mxu0 %v9965_v29 }
  0x11   :  { %9972 = vmatpush3.bf16.msra.mxu1 %v9971_v30  ;;  %9973 = vmatprep.subr.bf16.mxu0 %v10400_v3 }
  0x12   :  { %9979 = vmatprep.subr.bf16.mxu1 %v10400_v3 }
  0x13   :  { %9152 = vmatmul.mubr.msk.f32.vlgmr.msra.gmra.mrb[2].mxu0 %vm335_vm1, %v10518_v21 }
  0x14   :  { %9163 = vmatmul.mubr.msk.f32.vlgmr.msra.gmra.mrb[2].mxu1 %vm335_vm1, %v10520_v22  ;;  %9975 = vmatpush3.bf16.msra.mxu0 %v9974_v35 }
  0x15   :  { %9981 = vmatpush3.bf16.msra.mxu1 %v9980_v36  ;;  %9976 = vmatprep.subr.bf16.mxu0 %v10400_v3 }
  0x16   :  { %9982 = vmatprep.subr.bf16.mxu1 %v10400_v3  ;;  %9173 = vmatprep.mubr.msk.f32.mxu0 %vm10401_vm0, %v10402_v11 }
  0x17   :  { %9184 = vmatprep.mubr.msk.f32.mxu1 %vm10401_vm0, %v10402_v11 }
  0x18   :  { %9978 = vmatpush3.bf16.msra.mxu0 %v9977_v41 }
  0x19   :  { %16 = vsyncpa [#allocation3], 0  ;;  %9984 = vmatpush3.bf16.msra.mxu1 %v9983_v42  ;;  %9985 = vmatprep.subr.bf16.mxu0 %v10400_v3  ;;  %v9992_v48 = vpack.c.bf16 %v73_v46, %v72_v45  ;;  %v70_v49 = vld [vmem:[%s11985_s2 + $0xd0] sm:$0xff]  ;;  %v71_v50 = vld [vmem:[%s11985_s2 + $0xd8] sm:$0xff]  ;;  %vm2102_vm2 = vcmask 64512   ;;  %vm4143_vm3 = vcmask 523264  }
  0x1a   :  { %9991 = vmatprep.subr.bf16.mxu1 %v10400_v3  ;;  %v74_v51 = vld [vmem:[%s11985_s2 + $0xf0] sm:$0xff]  ;;  %v75_v52 = vld [vmem:[%s11985_s2 + $0xf8] sm:$0xff]  ;;  %v9989_v53 = vpack.c.bf16 %v71_v50, %v70_v49  ;;  %v76_v55 = vld [vmem:[%s11986_s3] sm:$0xff]  ;;  %vm8491_vm4 = vcmask 253952  }
  0x1b   :  { %9174 = vmatmul.mubr.msk.f32.vlgmr.msra.gmra.mrb[4].mxu0 %vm335_vm1, %v10518_v21  ;;  %v9995_v54 = vpack.c.bf16 %v75_v52, %v74_v51  ;;  %v77_v56 = vld [vmem:[%s11986_s3 + $0x8] sm:$0xff]  ;;  %v80_v57 = vld [vmem:[%s11986_s3 + $0x20] sm:$0xff]  ;;  %v78_v61 = vld [vmem:[%s11986_s3 + $0x10] sm:$0xff] }
  0x1c   :  { %9185 = vmatmul.mubr.msk.f32.vlgmr.msra.gmra.mrb[4].mxu1 %vm335_vm1, %v10520_v22  ;;  %9987 = vmatpush3.bf16.msra.mxu0 %v9986_v47  ;;  %v81_v58 = vld [vmem:[%s11986_s3 + $0x28] sm:$0xff]  ;;  %v9998_v59 = vpack.c.bf16 %v77_v56, %v76_v55  ;;  %v79_v62 = vld [vmem:[%s11986_s3 + $0x18] sm:$0xff]  ;;  %v82_v63 = vld [vmem:[%s11986_s3 + $0x30] sm:$0xff] }
  0x1d   :  { %9993 = vmatpush3.bf16.msra.mxu1 %v9992_v48  ;;  %9988 = vmatprep.subr.bf16.mxu0 %v10400_v3  ;;  %v10004_v60 = vpack.c.bf16 %v81_v58, %v80_v57  ;;  %v83_v0 = vld [vmem:[%s11986_s3 + $0x38] sm:$0xff]  ;;  %v10001_v1 = vpack.c.bf16 %v79_v62, %v78_v61  ;;  %v84_v4 = vld [vmem:[%s11986_s3 + $0x40] sm:$0xff]  ;;  %v85_v5 = vld [vmem:[%s11986_s3 + $0x48] sm:$0xff] }
  0x1e   :  { %9994 = vmatprep.subr.bf16.mxu1 %v10400_v3  ;;  %9195 = vmatprep.mubr.msk.f32.mxu0 %vm10401_vm0, %v10402_v11  ;;  %v10007_v2 = vpack.c.bf16 %v83_v0, %v82_v63  ;;  %v88_v6 = vld [vmem:[%s11986_s3 + $0x60] sm:$0xff]  ;;  %v89_v7 = vld [vmem:[%s11986_s3 + $0x68] sm:$0xff]  ;;  %v10010_v8 = vpack.c.bf16 %v85_v5, %v84_v4  ;;  %v86_v10 = vld [vmem:[%s11986_s3 + $0x50] sm:$0xff] }
  0x1f   :  { %9206 = vmatprep.mubr.msk.f32.mxu1 %vm10401_vm0, %v10402_v11  ;;  %v10016_v9 = vpack.c.bf16 %v89_v7, %v88_v6  ;;  %v87_v12 = vld [vmem:[%s11986_s3 + $0x58] sm:$0xff]  ;;  %v90_v13 = vld [vmem:[%s11986_s3 + $0x70] sm:$0xff]  ;;  %v92_v17 = vld [vmem:[%s11986_s3 + $0x80] sm:$0xff] }
  0x20   :  { %9990 = vmatpush3.bf16.msra.mxu0 %v9989_v53  ;;  %v91_v14 = vld [vmem:[%s11986_s3 + $0x78] sm:$0xff]  ;;  %v10013_v15 = vpack.c.bf16 %v87_v12, %v86_v10  ;;  %v93_v18 = vld [vmem:[%s11986_s3 + $0x88] sm:$0xff]  ;;  %v96_v19 = vld [vmem:[%s11986_s3 + $0xa0] sm:$0xff] }
  0x21   :  { %9996 = vmatpush3.bf16.msra.mxu1 %v9995_v54  ;;  %9997 = vmatprep.subr.bf16.mxu0 %v10400_v3  ;;  %v10019_v16 = vpack.c.bf16 %v91_v14, %v90_v13  ;;  %v97_v20 = vld [vmem:[%s11986_s3 + $0xa8] sm:$0xff]  ;;  %v10022_v23 = vpack.c.bf16 %v93_v18, %v92_v17  ;;  %v94_v25 = vld [vmem:[%s11986_s3 + $0x90] sm:$0xff]  ;;  %v95_v26 = vld [vmem:[%s11986_s3 + $0x98] sm:$0xff] }
  0x22   :  { %10003 = vmatprep.subr.bf16.mxu1 %v10400_v3  ;;  %v10028_v24 = vpack.c.bf16 %v97_v20, %v96_v19  ;;  %v98_v27 = vld [vmem:[%s11986_s3 + $0xb0] sm:$0xff]  ;;  %v99_v28 = vld [vmem:[%s11986_s3 + $0xb8] sm:$0xff]  ;;  %v10025_v29 = vpack.c.bf16 %v95_v26, %v94_v25  ;;  %v100_v31 = vld [vmem:[%s11986_s3 + $0xc0] sm:$0xff] }
  0x23   :  { %9196 = vmatmul.mubr.msk.f32.vlgmr.msra.gmra.mrb[6].mxu0 %vm335_vm1, %v10518_v21  ;;  %v10031_v30 = vpack.c.bf16 %v99_v28, %v98_v27  ;;  %v101_v32 = vld [vmem:[%s11986_s3 + $0xc8] sm:$0xff]  ;;  %v104_v33 = vld [vmem:[%s11986_s3 + $0xe0] sm:$0xff]  ;;  %v102_v37 = vld [vmem:[%s11986_s3 + $0xd0] sm:$0xff] }
  0x24   :  { %9207 = vmatmul.mubr.msk.f32.vlgmr.msra.gmra.mrb[6].mxu1 %vm335_vm1, %v10520_v22  ;;  %9999 = vmatpush3.bf16.msra.mxu0 %v9998_v59  ;;  %v105_v34 = vld [vmem:[%s11986_s3 + $0xe8] sm:$0xff]  ;;  %v10034_v35 = vpack.c.bf16 %v101_v32, %v100_v31  ;;  %v103_v38 = vld [vmem:[%s11986_s3 + $0xd8] sm:$0xff]  ;;  %v106_v39 = vld [vmem:[%s11986_s3 + $0xf0] sm:$0xff] }
  0x25   :  { %10005 = vmatpush3.bf16.msra.mxu1 %v10004_v60  ;;  %10000 = vmatprep.subr.bf16.mxu0 %v10400_v3  ;;  %v10040_v36 = vpack.c.bf16 %v105_v34, %v104_v33  ;;  %v107_v40 = vld [vmem:[%s11986_s3 + $0xf8] sm:$0xff]  ;;  %v10037_v41 = vpack.c.bf16 %v103_v38, %v102_v37  ;;  %v108_v43 = vld [vmem:[%s11987_s4] sm:$0xff]  ;;  %v109_v44 = vld [vmem:[%s11987_s4 + $0x8] sm:$0xff] }
  0x26   :  { %10006 = vmatprep.subr.bf16.mxu1 %v10400_v3  ;;  %9217 = vmatprep.mubr.msk.f32.mxu0 %vm10401_vm0, %v10402_v11  ;;  %v10043_v42 = vpack.c.bf16 %v107_v40, %v106_v39  ;;  %v10046_v45 = vpack.c.bf16 %v109_v44, %v108_v43  ;;  %v110_v46 = vld [vmem:[%s11987_s4 + $0x10] sm:$0xff]  ;;  %v111_v47 = vld [vmem:[%s11987_s4 + $0x18] sm:$0xff]  ;;  %v112_v49 = vld [vmem:[%s11987_s4 + $0x20] sm:$0xff]  ;;  %v10403_v39 = vmov 1966171168  }
  0x27   :  { %9228 = vmatprep.mubr.msk.f32.mxu1 %vm10401_vm0, %v10402_v11  ;;  %v10049_v48 = vpack.c.bf16 %v111_v47, %v110_v46  ;;  %v113_v50 = vld [vmem:[%s11987_s4 + $0x28] sm:$0xff]  ;;  %v116_v51 = vld [vmem:[%s11987_s4 + $0x40] sm:$0xff]  ;;  %v114_v55 = vld [vmem:[%s11987_s4 + $0x30] sm:$0xff]  ;;  %v144_v40 = vunpack.c.l.s4 %v10403_v39 }
  0x28   :  { %10002 = vmatpush3.bf16.msra.mxu0 %v10001_v1  ;;  %v10052_v52 = vpack.c.bf16 %v113_v50, %v112_v49  ;;  %v117_v53 = vld [vmem:[%s11987_s4 + $0x48] sm:$0xff]  ;;  %v115_v56 = vld [vmem:[%s11987_s4 + $0x38] sm:$0xff]  ;;  %v118_v57 = vld [vmem:[%s11987_s4 + $0x50] sm:$0xff] }
  0x29   :  { %10008 = vmatpush3.bf16.msra.mxu1 %v10007_v2  ;;  %10009 = vmatprep.subr.bf16.mxu0 %v10400_v3  ;;  %v10058_v54 = vpack.c.bf16 %v117_v53, %v116_v51  ;;  %v10055_v58 = vpack.c.bf16 %v115_v56, %v114_v55  ;;  %v119_v59 = vld [vmem:[%s11987_s4 + $0x58] sm:$0xff]  ;;  %v120_v61 = vld [vmem:[%s11987_s4 + $0x60] sm:$0xff]  ;;  %v121_v62 = vld [vmem:[%s11987_s4 + $0x68] sm:$0xff] }
  0x2a   :  { %10015 = vmatprep.subr.bf16.mxu1 %v10400_v3  ;;  %v10061_v60 = vpack.c.bf16 %v119_v59, %v118_v57  ;;  %v124_v63 = vld [vmem:[%s11987_s4 + $0x80] sm:$0xff]  ;;  %v10064_v0 = vpack.c.bf16 %v121_v62, %v120_v61  ;;  %v125_v1 = vld [vmem:[%s11987_s4 + $0x88] sm:$0xff]  ;;  %v122_v4 = vld [vmem:[%s11987_s4 + $0x70] sm:$0xff] }
  0x2b   :  { %9218 = vmatmul.mubr.msk.f32.vlgmr.msra.gmra.mrb[8].mxu0 %vm335_vm1, %v10518_v21  ;;  %v10070_v2 = vpack.c.bf16 %v125_v1, %v124_v63  ;;  %v123_v5 = vld [vmem:[%s11987_s4 + $0x78] sm:$0xff]  ;;  %v126_v6 = vld [vmem:[%s11987_s4 + $0x90] sm:$0xff]  ;;  %v128_v10 = vld [vmem:[%s11987_s4 + $0xa0] sm:$0xff] }
  0x2c   :  { %9229 = vmatmul.mubr.msk.f32.vlgmr.msra.gmra.mrb[8].mxu1 %vm335_vm1, %v10520_v22  ;;  %10011 = vmatpush3.bf16.msra.mxu0 %v10010_v8  ;;  %v10067_v7 = vpack.c.bf16 %v123_v5, %v122_v4  ;;  %v127_v8 = vld [vmem:[%s11987_s4 + $0x98] sm:$0xff]  ;;  %v129_v12 = vld [vmem:[%s11987_s4 + $0xa8] sm:$0xff]  ;;  %v132_v13 = vld [vmem:[%s11987_s4 + $0xc0] sm:$0xff] }
  0x2d   :  { %10017 = vmatpush3.bf16.msra.mxu1 %v10016_v9  ;;  %10012 = vmatprep.subr.bf16.mxu0 %v10400_v3  ;;  %v10073_v9 = vpack.c.bf16 %v127_v8, %v126_v6  ;;  %v10076_v14 = vpack.c.bf16 %v129_v12, %v128_v10  ;;  %v130_v17 = vld [vmem:[%s11987_s4 + $0xb0] sm:$0xff]  ;;  %v131_v18 = vld [vmem:[%s11987_s4 + $0xb8] sm:$0xff]  ;;  %v136_v25 = vld [vmem:[%s11987_s4 + $0xe0] sm:$0xff] }
  0x2e   :  { %10018 = vmatprep.subr.bf16.mxu1 %v10400_v3  ;;  %9239 = vmatprep.mubr.msk.f32.mxu0 %vm10401_vm0, %v10402_v11  ;;  %v134_v19 = vld [vmem:[%s11987_s4 + $0xd0] sm:$0xff]  ;;  %v10079_v20 = vpack.c.bf16 %v131_v18, %v130_v17  ;;  %v137_v26 = vld [vmem:[%s11987_s4 + $0xe8] sm:$0xff]  ;;  %v140_v50 = vld [vmem:[%s11988_s5] sm:$0xff] }
  0x2f   :  { %9250 = vmatprep.mubr.msk.f32.mxu1 %vm10401_vm0, %v10402_v11  ;;  %v10088_v27 = vpack.c.bf16 %v137_v26, %v136_v25  ;;  %v138_v28 = vld [vmem:[%s11987_s4 + $0xf0] sm:$0xff]  ;;  %v142_v5 = vcombine.high %v140_v50, %v140_v50 }
  0x30   :  { %10014 = vmatpush3.bf16.msra.mxu0 %v10013_v15  ;;  %v133_v15 = vld [vmem:[%s11987_s4 + $0xc8] sm:$0xff] }
  0x31   :  { %10020 = vmatpush3.bf16.msra.mxu1 %v10019_v16  ;;  %10021 = vmatprep.subr.bf16.mxu0 %v10400_v3  ;;  %v10082_v16 = vpack.c.bf16 %v133_v15, %v132_v13 }
  0x32   :  { %10027 = vmatprep.subr.bf16.mxu1 %v10400_v3 }
  0x33   :  { %9240 = vmatmul.mubr.msk.f32.vlgmr.msra.gmra.mrb[10].mxu0 %vm335_vm1, %v10518_v21 }
  0x34   :  { %9251 = vmatmul.mubr.msk.f32.vlgmr.msra.gmra.mrb[10].mxu1 %vm335_vm1, %v10520_v22  ;;  %10023 = vmatpush3.bf16.msra.mxu0 %v10022_v23  ;;  %v135_v23 = vld [vmem:[%s11987_s4 + $0xd8] sm:$0xff] }
  0x35   :  { %10029 = vmatpush3.bf16.msra.mxu1 %v10028_v24  ;;  %10024 = vmatprep.subr.bf16.mxu0 %v10400_v3  ;;  %v10085_v24 = vpack.c.bf16 %v135_v23, %v134_v19 }
  0x36   :  { %10030 = vmatprep.subr.bf16.mxu1 %v10400_v3  ;;  %9261 = vmatprep.mubr.msk.f32.mxu0 %vm10401_vm0, %v10402_v11 }
  0x37   :  { %9272 = vmatprep.mubr.msk.f32.mxu1 %vm10401_vm0, %v10402_v11 }
  0x38   :  { %10026 = vmatpush3.bf16.msra.mxu0 %v10025_v29  ;;  %v139_v29 = vld [vmem:[%s11987_s4 + $0xf8] sm:$0xff] }
  0x39   :  { %10032 = vmatpush3.bf16.msra.mxu1 %v10031_v30  ;;  %10033 = vmatprep.subr.bf16.mxu0 %v10400_v3  ;;  %v10091_v30 = vpack.c.bf16 %v139_v29, %v138_v28 }
  0x3a   :  { %10039 = vmatprep.subr.bf16.mxu1 %v10400_v3 }
  0x3b   :  { %9262 = vmatmul.mubr.msk.f32.vlgmr.msra.gmra.mrb[12].mxu0 %vm335_vm1, %v10518_v21 }
  0x3c   :  { %9273 = vmatmul.mubr.msk.f32.vlgmr.msra.gmra.mrb[12].mxu1 %vm335_vm1, %v10520_v22  ;;  %10035 = vmatpush3.bf16.msra.mxu0 %v10034_v35 }
  0x3d   :  { %10041 = vmatpush3.bf16.msra.mxu1 %v10040_v36  ;;  %10036 = vmatprep.subr.bf16.mxu0 %v10400_v3 }
  0x3e   :  { %10042 = vmatprep.subr.bf16.mxu1 %v10400_v3  ;;  %9283 = vmatprep.mubr.msk.f32.mxu0 %vm10401_vm0, %v10402_v11 }
  0x3f   :  { %9294 = vmatprep.mubr.msk.f32.mxu1 %vm10401_vm0, %v10402_v11 }
  0x40   :  { %10038 = vmatpush3.bf16.msra.mxu0 %v10037_v41  ;;  %v146_v41 = vlaneseq }
  0x41   :  { %10044 = vmatpush3.bf16.msra.mxu1 %v10043_v42  ;;  %10045 = vmatprep.subr.bf16.mxu0 %v10400_v3  ;;  %v145_v42 = vunpack.c.0.s8 %v144_v40 }
  0x42   :  { %10051 = vmatprep.subr.bf16.mxu1 %v10400_v3  ;;  %v10920_v43 = vshrl.u32 %v146_v41, 7 }
  0x43   :  { %9284 = vmatmul.mubr.msk.f32.vlgmr.msra.gmra.mrb[14].mxu0 %vm335_vm1, %v10518_v21 }
  0x44   :  { %9295 = vmatmul.mubr.msk.f32.vlgmr.msra.gmra.mrb[14].mxu1 %vm335_vm1, %v10520_v22  ;;  %10047 = vmatpush3.bf16.msra.mxu0 %v10046_v45  ;;  %v10930_v49 = vsub.s32 %v145_v42, %v10920_v43  ;;  %v10943_v59 = vsub.s32 0, %v10920_v43 }
  0x45   :  { %10048 = vmatprep.subr.bf16.mxu0 %v10400_v3  ;;  %9305 = vmatprep.mubr.msk.f32.mxu0 %vm10401_vm0, %v10402_v11 }
  0x46   :  { %9316 = vmatprep.mubr.msk.f32.mxu1 %vm10401_vm0, %v10402_v11  ;;  %10053 = vmatpush3.bf16.msra.mxu1 %v10052_v52  ;;  %v149_v52 = vrot.slane %v140_v50, %v10930_v49  ;;  %v156_v19 = vrot.slane %v142_v5, %v10930_v49 }
  0x47   :  { %10054 = vmatprep.subr.bf16.mxu1 %v10400_v3 }
  0x48   :  { %10050 = vmatpush3.bf16.msra.mxu0 %v10049_v48  ;;  %v8508_v48 = vld [vmem:[%s11988_s5 + $0x8] sm:$0xff]  ;;  %v157_v61 = vcombine.high %v149_v52, %v149_v52  ;;  %v172_v41 = vrot.slane %v156_v19, %v10930_v49 }
  0x49   :  { %10057 = vmatprep.subr.bf16.mxu0 %v10400_v3  ;;  %v201_v51 = vrot.slane %v8508_v48, %v10930_v49 }
  0x4a   :  { %10056 = vmatpush3.bf16.msra.mxu1 %v10055_v58 }
  0x4b   :  { %9306 = vmatmul.mubr.msk.f32.vlgmr.msra.gmra.mrb[16].mxu0 %vm335_vm1, %v10518_v21  ;;  %10063 = vmatprep.subr.bf16.mxu1 %v10400_v3  ;;  %v217_v56 = vrot.slane %v201_v51, %v10930_v49  ;;  %v209_v57 = vcombine.high %v201_v51, %v201_v51 }
  0x4c   :  { %10059 = vmatpush3.bf16.msra.mxu0 %v10058_v54  ;;  %9327 = vmatprep.mubr.msk.f32.mxu0 %vm10401_vm0, %v10402_v11 }
  0x4d   :  { %10060 = vmatprep.subr.bf16.mxu0 %v10400_v3  ;;  %9317 = vmatmul.mubr.msk.f32.vlgmr.msra.gmra.mrb[16].mxu1 %vm335_vm1, %v10520_v22  ;;  %v905_v62 = vrot.slane %v217_v56, %v10943_v59  ;;  %v231_v63 = vrot.slane %v209_v57, %v10930_v49  ;;  %v239_v10 = vcombine.high %v217_v56, %v217_v56 }
  0x4e   :  { %10065 = vmatpush3.bf16.msra.mxu1 %v10064_v0  ;;  %9338 = vmatprep.mubr.msk.f32.mxu1 %vm10401_vm0, %v10402_v11  ;;  %v194_v0 = vcombine.high %v8508_v48, %v8508_v48 }
  0x4f   :  { %10066 = vmatprep.subr.bf16.mxu1 %v10400_v3  ;;  %v909_v8 = vrot.slane %v231_v63, %v10943_v59  ;;  %v241_v13 = vcombine.high %v231_v63, %v231_v63  ;;  %v913_v23 = vrot.slane %v239_v10, %v10943_v59 }
  0x50   :  { %10062 = vmatpush3.bf16.msra.mxu0 %v10061_v60  ;;  %v165_v60 = vrot.slane %v149_v52, %v10930_v49 }
  0x51   :  { %10069 = vmatprep.subr.bf16.mxu0 %v10400_v3 }
  0x52   :  { %10068 = vmatpush3.bf16.msra.mxu1 %v10067_v7  ;;  %v298_v1 = vrot.slane %v165_v60, %v10943_v59  ;;  %v187_v17 = vcombine.high %v165_v60, %v165_v60 }
  0x53   :  { %9328 = vmatmul.mubr.msk.f32.vlgmr.msra.gmra.mrb[18].mxu0 %vm335_vm1, %v10518_v21  ;;  %10075 = vmatprep.subr.bf16.mxu1 %v10400_v3 }
  0x54   :  { %10071 = vmatpush3.bf16.msra.mxu0 %v10070_v2  ;;  %9349 = vmatprep.mubr.msk.f32.mxu0 %vm10401_vm0, %v10402_v11  ;;  %v179_v2 = vrot.slane %v157_v61, %v10930_v49 }
  0x55   :  { %10072 = vmatprep.subr.bf16.mxu0 %v10400_v3  ;;  %9339 = vmatmul.mubr.msk.f32.vlgmr.msra.gmra.mrb[18].mxu1 %vm335_vm1, %v10520_v22 }
  0x56   :  { %10077 = vmatpush3.bf16.msra.mxu1 %v10076_v14  ;;  %9360 = vmatprep.mubr.msk.f32.mxu1 %vm10401_vm0, %v10402_v11  ;;  %v208_v14 = vrot.slane %v194_v0, %v10930_v49  ;;  %v189_v18 = vcombine.high %v179_v2, %v179_v2 }
  0x57   :  { %10078 = vmatprep.subr.bf16.mxu1 %v10400_v3 }
  0x58   :  { %10074 = vmatpush3.bf16.msra.mxu0 %v10073_v9  ;;  %v210_v25 = vcombine.high %v208_v14, %v208_v14  ;;  %v310_v29 = vrot.slane %v189_v18, %v10943_v59 }
  0x59   :  { %10081 = vmatprep.subr.bf16.mxu0 %v10400_v3 }
  0x5a   :  { %10080 = vmatpush3.bf16.msra.mxu1 %v10079_v20  ;;  %v238_v40 = vrot.slane %v210_v25, %v10930_v49 }
  0x5b   :  { %9350 = vmatmul.mubr.msk.f32.vlgmr.msra.gmra.mrb[20].mxu0 %vm335_vm1, %v10518_v21  ;;  %10087 = vmatprep.subr.bf16.mxu1 %v10400_v3 }
  0x5c   :  { %10083 = vmatpush3.bf16.msra.mxu0 %v10082_v16  ;;  %9371 = vmatprep.mubr.msk.f32.mxu0 %vm10401_vm0, %v10402_v11  ;;  %v302_v16 = vrot.slane %v179_v2, %v10943_v59  ;;  %v925_v48 = vrot.slane %v238_v40, %v10943_v59  ;;  %v242_v60 = vcombine.high %v238_v40, %v238_v40 }
  0x5d   :  { %10084 = vmatprep.subr.bf16.mxu0 %v10400_v3  ;;  %9361 = vmatmul.mubr.msk.f32.vlgmr.msra.gmra.mrb[20].mxu1 %vm335_vm1, %v10520_v22 }
  0x5e   :  { %10089 = vmatpush3.bf16.msra.mxu1 %v10088_v27  ;;  %9382 = vmatprep.mubr.msk.f32.mxu1 %vm10401_vm0, %v10402_v11  ;;  %v306_v27 = vrot.slane %v187_v17, %v10943_v59  ;;  %v933_v2 = vrot.slane %v242_v60, %v10943_v59 }
  0x5f   :  { %10090 = vmatprep.subr.bf16.mxu1 %v10400_v3 }
  0x60   :  { %10086 = vmatpush3.bf16.msra.mxu0 %v10085_v24  ;;  %v917_v24 = vrot.slane %v241_v13, %v10943_v59 }
  0x61   :  { %9385 = vmatprep.subr.mxu0 %v10402_v11 }
  0x62   :  { %10092 = vmatpush3.bf16.msra.mxu1 %v10091_v30  ;;  %v158_v30 = vcombine.high %v156_v19, %v156_v19 }
  0x63   :  { %9372 = vmatmul.mubr.msk.f32.vlgmr.msra.gmra.mrb[22].mxu0 %vm335_vm1, %v10518_v21  ;;  %9400 = vmatprep.subr.mxu1 %v10402_v11 }
  0x64   :  { %9387 = vmatprep.mubr.msk.f32.mxu0 %vm10401_vm0, %v10402_v11 }
  0x65   :  { %9383 = vmatmul.mubr.msk.f32.vlgmr.msra.gmra.mrb[22].mxu1 %vm335_vm1, %v10520_v22 }
  0x66   :  { %9402 = vmatprep.mubr.msk.f32.mxu1 %vm10401_vm0, %v10402_v11 }
  0xde   :  { %v405_v31 = vpop.f32.mrb[0].mxu0 }
  0xdf   :  { %v9131_v32 = vpop.f32.mrb[1].mxu0  ;;  %v478_v33 = vpop.f32.mrb[0].mxu1  ;;  %v406_v15 = vadd.f32 %v405_v31, %v298_v1 }
  0xe0   :  { %v9142_v34 = vpop.f32.mrb[1].mxu1  ;;  %v479_v26 = vadd.f32 %v478_v33, %v302_v16 }
  0xe6   :  { %v10916_v35 = vpop.f32.mrb[2].mxu0 }
  0xe7   :  { %v9153_v36 = vpop.f32.mrb[3].mxu0  ;;  %v10918_v37 = vpop.f32.mrb[2].mxu1  ;;  %v549_v33 = vadd.f32 %v10916_v35, %v306_v27  ;;  %v314_v35 = vrot.slane %v172_v41, %v10943_v59 }
  0xe8   :  { %v9164_v38 = vpop.f32.mrb[3].mxu1  ;;  %v224_v36 = vrot.slane %v208_v14, %v10930_v49  ;;  %v619_v42 = vadd.f32 %v10918_v37, %v310_v29 }
  0xea   :  { %v240_v56 = vcombine.high %v224_v36, %v224_v36 }
  0xec   :  { %v929_v1 = vrot.slane %v240_v56, %v10943_v59 }
  0xee   :  { %v10922_v44 = vpop.f32.mrb[4].mxu0 }
  0xef   :  { %v9175_v45 = vpop.f32.mrb[5].mxu0  ;;  %v10924_v46 = vpop.f32.mrb[4].mxu1  ;;  %v689_v61 = vadd.f32 %v10922_v44, %v314_v35 }
  0xf0   :  { %v9186_v47 = vpop.f32.mrb[5].mxu1  ;;  %v186_v45 = vrot.slane %v158_v30, %v10930_v49 }
  0xf1   :  { %v921_v47 = vrot.slane %v224_v36, %v10943_v59 }
  0xf2   :  { %v318_v37 = vrot.slane %v186_v45, %v10943_v59  ;;  %v190_v0 = vcombine.high %v186_v45, %v186_v45 }
  0xf4   :  { %v759_v63 = vadd.f32 %v10924_v46, %v318_v37  ;;  %v326_v46 = vrot.slane %v190_v0, %v10943_v59 }
  0xf6   :  { %v10937_v53 = vpop.f32.mrb[6].mxu0 }
  0xf7   :  { %v9197_v54 = vpop.f32.mrb[7].mxu0  ;;  %v10939_v55 = vpop.f32.mrb[6].mxu1 }
  0xf8   :  { %v9208_v58 = vpop.f32.mrb[7].mxu1 }
  0xfe   :  { %v1008_v4 = vpop.f32.mrb[8].mxu0 }
  0xff   :  { %v1009_v6 = vadd.f32 %v1008_v4, %v905_v62  ;;  %v9219_v7 = vpop.f32.mrb[9].mxu0  ;;  %v1078_v9 = vpop.f32.mrb[8].mxu1  ;;  %v188_v62 = vcombine.high %v172_v41, %v172_v41 }
 0x100   :  { %v9230_v12 = vpop.f32.mrb[9].mxu1  ;;  %v1079_v20 = vadd.f32 %v1078_v9, %v909_v8 }
 0x101   :  { %9386 = vmatpush3.xpose.msk.msra.mxu0 %vm2102_vm2, %v1009_v6  ;;  %v322_v44 = vrot.slane %v188_v62, %v10943_v59  ;;  %v899_v12 = vadd.f32 %v10939_v55, %v326_v46 }
 0x102   :  { %9390 = vmatprep.subr.mxu0 %v10402_v11 }
 0x103   :  { %v829_v10 = vadd.f32 %v10937_v53, %v322_v44  ;;  %v8509_v53 = vld [vmem:[%s11988_s5 + $0x10] sm:$0xff] }
 0x104   :  { %9388 = vmatmul.mubr.msk.f32.vlgmr.msra.gmra.mrb[24].mxu0 %vm2102_vm2, %v406_v15  ;;  %v253_v13 = vrot.slane %v8509_v53, %v10930_v49 }
 0x105   :  { %9391 = vmatpush3.xpose.msk.msra.mxu0 %vm2102_vm2, %v1079_v20  ;;  %9392 = vmatprep.mubr.msk.f32.mxu0 %vm10401_vm0, %v10402_v11 }
 0x106   :  { %v1148_v28 = vpop.f32.mrb[10].mxu0  ;;  %9395 = vmatprep.subr.mxu0 %v10402_v11  ;;  %v269_v55 = vrot.slane %v253_v13, %v10930_v49  ;;  %v261_v15 = vcombine.high %v253_v13, %v253_v13 }
 0x107   :  { %v1149_v31 = vadd.f32 %v1148_v28, %v913_v23  ;;  %v1218_v32 = vpop.f32.mrb[10].mxu1  ;;  %v9241_v34 = vpop.f32.mrb[11].mxu0  ;;  %v246_v23 = vcombine.high %v8509_v53, %v8509_v53 }
 0x108   :  { %v1219_v38 = vadd.f32 %v1218_v32, %v917_v24  ;;  %v9252_v39 = vpop.f32.mrb[11].mxu1  ;;  %9393 = vmatmul.mubr.msk.f32.vlgmr.msra.gmra.mrb[26].mxu0 %vm2102_vm2, %v479_v26  ;;  %v1505_v14 = vrot.slane %v269_v55, %v10943_v59  ;;  %v283_v19 = vrot.slane %v261_v15, %v10930_v49  ;;  %v291_v20 = vcombine.high %v269_v55, %v269_v55 }
 0x109   :  { %9396 = vmatpush3.xpose.msk.msra.mxu0 %vm2102_vm2, %v1149_v31  ;;  %9397 = vmatprep.mubr.msk.f32.mxu0 %vm10401_vm0, %v10402_v11  ;;  %v260_v26 = vrot.slane %v246_v23, %v10930_v49 }
 0x10a   :  { %9401 = vmatpush3.xpose.msk.msra.mxu1 %vm2102_vm2, %v1219_v38  ;;  %9405 = vmatprep.subr.mxu0 %v10402_v11  ;;  %v1509_v24 = vrot.slane %v283_v19, %v10943_v59  ;;  %v1513_v25 = vrot.slane %v291_v20, %v10943_v59  ;;  %v293_v31 = vcombine.high %v283_v19, %v283_v19 }
 0x10b   :  { %9410 = vmatprep.subr.mxu1 %v10402_v11  ;;  %v276_v36 = vrot.slane %v260_v26, %v10930_v49  ;;  %v262_v39 = vcombine.high %v260_v26, %v260_v26 }
 0x10c   :  { %9398 = vmatmul.mubr.msk.f32.vlgmr.msra.gmra.mrb[28].mxu0 %vm2102_vm2, %v549_v33  ;;  %v1517_v38 = vrot.slane %v293_v31, %v10943_v59 }
 0x10d   :  { %9403 = vmatmul.mubr.msk.f32.vlgmr.msra.gmra.mrb[24].mxu1 %vm2102_vm2, %v619_v42  ;;  %9407 = vmatprep.mubr.msk.f32.mxu0 %vm10401_vm0, %v10402_v11  ;;  %v1521_v40 = vrot.slane %v276_v36, %v10943_v59 }
 0x10e   :  { %v1288_v50 = vpop.f32.mrb[12].mxu0  ;;  %9412 = vmatprep.mubr.msk.f32.mxu1 %vm10401_vm0, %v10402_v11 }
 0x10f   :  { %v1289_v51 = vadd.f32 %v1288_v50, %v921_v47  ;;  %v1358_v52 = vpop.f32.mrb[12].mxu1  ;;  %v9263_v54 = vpop.f32.mrb[13].mxu0  ;;  %v290_v47 = vrot.slane %v262_v39, %v10930_v49  ;;  %v292_v50 = vcombine.high %v276_v36, %v276_v36 }
 0x110   :  { %v1359_v57 = vadd.f32 %v1358_v52, %v925_v48  ;;  %v9274_v58 = vpop.f32.mrb[13].mxu1 }
 0x111   :  { %9406 = vmatpush3.xpose.msk.msra.mxu0 %vm2102_vm2, %v1289_v51  ;;  %v1525_v37 = vrot.slane %v290_v47, %v10943_v59  ;;  %v1529_v51 = vrot.slane %v292_v50, %v10943_v59 }
 0x112   :  { %9411 = vmatpush3.xpose.msk.msra.mxu1 %vm2102_vm2, %v1359_v57  ;;  %9415 = vmatprep.subr.mxu0 %v10402_v11 }
 0x113   :  { %9420 = vmatprep.subr.mxu1 %v10402_v11 }
 0x114   :  { %9408 = vmatmul.mubr.msk.f32.vlgmr.msra.gmra.mrb[30].mxu0 %vm2102_vm2, %v689_v61  ;;  %v294_v61 = vcombine.high %v290_v47, %v290_v47 }
 0x115   :  { %9413 = vmatmul.mubr.msk.f32.vlgmr.msra.gmra.mrb[26].mxu1 %vm2102_vm2, %v759_v63  ;;  %9417 = vmatprep.mubr.msk.f32.mxu0 %vm10401_vm0, %v10402_v11 }
 0x116   :  { %v1428_v4 = vpop.f32.mrb[14].mxu0  ;;  %9422 = vmatprep.mubr.msk.f32.mxu1 %vm10401_vm0, %v10402_v11  ;;  %v1533_v0 = vrot.slane %v294_v61, %v10943_v59 }
 0x117   :  { %v1429_v5 = vadd.f32 %v1428_v4, %v929_v1  ;;  %v1498_v6 = vpop.f32.mrb[14].mxu1  ;;  %v9285_v7 = vpop.f32.mrb[15].mxu0 }
 0x118   :  { %v1499_v8 = vadd.f32 %v1498_v6, %v933_v2  ;;  %v9296_v9 = vpop.f32.mrb[15].mxu1 }
 0x119   :  { %9416 = vmatpush3.xpose.msk.msra.mxu0 %vm2102_vm2, %v1429_v5 }
 0x11a   :  { %9421 = vmatpush3.xpose.msk.msra.mxu1 %vm2102_vm2, %v1499_v8  ;;  %9425 = vmatprep.subr.mxu0 %v10402_v11 }
 0x11b   :  { %9430 = vmatprep.subr.mxu1 %v10402_v11 }
 0x11c   :  { %9418 = vmatmul.mubr.msk.f32.vlgmr.msra.gmra.mrb[32].mxu0 %vm2102_vm2, %v829_v10 }
 0x11d   :  { %9423 = vmatmul.mubr.msk.f32.vlgmr.msra.gmra.mrb[28].mxu1 %vm2102_vm2, %v899_v12  ;;  %9427 = vmatprep.mubr.msk.f32.mxu0 %vm10401_vm0, %v10402_v11 }
 0x11e   :  { %9432 = vmatprep.mubr.msk.f32.mxu1 %vm10401_vm0, %v10402_v11  ;;  %v1608_v16 = vpop.f32.mrb[16].mxu0 }
 0x11f   :  { %v1609_v17 = vadd.f32 %v1608_v16, %v1505_v14  ;;  %v9307_v18 = vpop.f32.mrb[17].mxu0 }
 0x120   :  { %v1678_v27 = vpop.f32.mrb[16].mxu1 }
 0x121   :  { %9426 = vmatpush3.msra.mxu0 %v1609_v17  ;;  %v1679_v29 = vadd.f32 %v1678_v27, %v1509_v24  ;;  %v9318_v30 = vpop.f32.mrb[17].mxu1 }
 0x122   :  { %9435 = vmatprep.subr.mxu0 %v10402_v11 }
 0x123   :  { %9431 = vmatpush3.msra.mxu1 %v1679_v29 }
 0x124   :  { %9440 = vmatprep.subr.mxu1 %v10402_v11 }
 0x126   :  { %v1748_v28 = vpop.f32.mrb[18].mxu0 }
 0x127   :  { %v11027_v32 = vadd.f32 %v1748_v28, %v1513_v25  ;;  %v9329_v34 = vpop.f32.mrb[19].mxu0 }
 0x128   :  { %v1818_v33 = vpop.f32.mrb[18].mxu1 }
 0x129   :  { %v11033_v42 = vadd.f32 %v1818_v33, %v1517_v38  ;;  %v9340_v45 = vpop.f32.mrb[19].mxu1 }
 0x12e   :  { %v1888_v41 = vpop.f32.mrb[20].mxu0 }
 0x12f   :  { %v11036_v48 = vadd.f32 %v1888_v41, %v1521_v40  ;;  %v9351_v35 = vpop.f32.mrb[21].mxu0 }
 0x130   :  { %v1958_v52 = vpop.f32.mrb[20].mxu1 }
 0x131   :  { %v11040_v56 = vadd.f32 %v1958_v52, %v1525_v37  ;;  %v9362_v57 = vpop.f32.mrb[21].mxu1 }
 0x136   :  { %v2028_v54 = vpop.f32.mrb[22].mxu0 }
 0x137   :  { %v11042_v58 = vadd.f32 %v2028_v54, %v1529_v51  ;;  %v9373_v60 = vpop.f32.mrb[23].mxu0 }
 0x138   :  { %v2098_v62 = vpop.f32.mrb[22].mxu1 }
 0x139   :  { %v9384_v63 = vpop.f32.mrb[23].mxu1  ;;  %v11045_v1 = vadd.f32 %v2098_v62, %v1533_v0 }
 0x1d7   :  { %v2175_v2 = vpop.f32.mrb[24].mxu0 }
 0x1d8   :  { %v2711_v44 = vmul.f32 0.35355338, %v2175_v2  ;;  %v9389_v4 = vpop.f32.mrb[25].mxu0 }
 0x1da   :  { %v2719_v46 = vsel %vm2102_vm2, %v2711_v44, -inf }
 0x1db   :  { %2720 = vmax.xlane.f32.xlu0 %v2719_v46  ;;  %v2251_v5 = vpop.f32.mrb[26].mxu0 }
 0x1dc   :  { %v2712_v6 = vmul.f32 0.35355338, %v2251_v5  ;;  %v9394_v7 = vpop.f32.mrb[27].mxu0 }
 0x1de   :  { %v2722_v8 = vsel %vm2102_vm2, %v2712_v6, -inf }
 0x1df   :  { %2723 = vmax.xlane.f32.xlu0 %v2722_v8  ;;  %v2327_v9 = vpop.f32.mrb[28].mxu0 }
 0x1e0   :  { %v2403_v10 = vpop.f32.mrb[24].mxu1  ;;  %v2713_v12 = vmul.f32 0.35355338, %v2327_v9  ;;  %v9399_v53 = vpop.f32.mrb[29].mxu0 }
 0x1e1   :  { %v9404_v13 = vpop.f32.mrb[25].mxu1  ;;  %v2714_v55 = vmul.f32 0.35355338, %v2403_v10 }
 0x1e2   :  { %v2725_v14 = vsel %vm2102_vm2, %v2713_v12, -inf }
 0x1e3   :  { %2726 = vmax.xlane.f32.xlu1 %v2725_v14  ;;  %v2728_v15 = vsel %vm2102_vm2, %v2714_v55, -inf }
 0x1e7   :  { %2729 = vmax.xlane.f32.xlu1 %v2728_v15  ;;  %v2479_v16 = vpop.f32.mrb[30].mxu0 }
 0x1e8   :  { %v2555_v17 = vpop.f32.mrb[26].mxu1  ;;  %v2715_v18 = vmul.f32 0.35355338, %v2479_v16  ;;  %v9409_v19 = vpop.f32.mrb[31].mxu0 }
 0x1e9   :  { %v2716_v20 = vmul.f32 0.35355338, %v2555_v17  ;;  %v9414_v23 = vpop.f32.mrb[27].mxu1 }
 0x1ea   :  { %v2731_v24 = vsel %vm2102_vm2, %v2715_v18, -inf }
 0x1eb   :  { %v2734_v25 = vsel %vm2102_vm2, %v2716_v20, -inf  ;;  %2732 = vmax.xlane.f32.xlu0 %v2731_v24 }
 0x1ec   :  { %2735 = vmax.xlane.f32.xlu1 %v2734_v25 }
 0x1ef   :  { %v2631_v26 = vpop.f32.mrb[32].mxu0 }
 0x1f0   :  { %v2717_v27 = vmul.f32 0.35355338, %v2631_v26  ;;  %v2707_v28 = vpop.f32.mrb[28].mxu1  ;;  %v9419_v29 = vpop.f32.mrb[33].mxu0 }
 0x1f1   :  { %v2718_v30 = vmul.f32 0.35355338, %v2707_v28  ;;  %v9424_v31 = vpop.f32.mrb[29].mxu1 }
 0x1f2   :  { %v2737_v34 = vsel %vm2102_vm2, %v2717_v27, -inf }
 0x1f3   :  { %v2740_v36 = vsel %vm2102_vm2, %v2718_v30, -inf  ;;  %2738 = vmax.xlane.f32.xlu0 %v2737_v34 }
 0x1f4   :  { %2741 = vmax.xlane.f32.xlu1 %v2740_v36 }
 0x268   :  { %v2721_v38 = vpop.xlane.xlu0 %2720 }
 0x269   :  { %v2743_v39 = vsub.f32 %v2711_v44, %v2721_v38 }
 0x26b   :  { %v2751_v40 = vmul.f32 1.442695, %v2743_v39 }
 0x26c   :  { %v2724_v33 = vpop.xlane.xlu0 %2723 }
 0x26d   :  { %10296 = vpow2.f32 %v2751_v40  ;;  %v2744_v41 = vsub.f32 %v2712_v6, %v2724_v33 }
 0x26f   :  { %v2753_v45 = vmul.f32 1.442695, %v2744_v41 }
 0x270   :  { %v2727_v47 = vpop.xlane.xlu1 %2726 }
 0x271   :  { %10298 = vpow2.f32 %v2753_v45  ;;  %v2745_v35 = vsub.f32 %v2713_v12, %v2727_v47 }
 0x273   :  { %v2755_v50 = vmul.f32 1.442695, %v2745_v35 }
 0x274   :  { %v2730_v37 = vpop.xlane.xlu1 %2729 }
 0x275   :  { %10300 = vpow2.f32 %v2755_v50  ;;  %v2746_v51 = vsub.f32 %v2714_v55, %v2730_v37  ;;  %v3393_v37 = vld [vmem:[%s11989_s6 + $0x10] sm:$0xff] }
 0x277   :  { %v10297_v52 = vpop.eup %10296  ;;  %v2757_v54 = vmul.f32 1.442695, %v2746_v51 }
 0x278   :  { %v2733_v57 = vpop.xlane.xlu0 %2732  ;;  %v2767_v60 = vsel %vm2102_vm2, %v10297_v52, 0.0 }
 0x279   :  { %10302 = vpow2.f32 %v2757_v54  ;;  %v2736_v61 = vpop.xlane.xlu1 %2735  ;;  %v2747_v62 = vsub.f32 %v2715_v18, %v2733_v57  ;;  %2768 = vadd.xlane.f32.xlu0 %v2767_v60  ;;  %v3394_v54 = vld [vmem:[%s11989_s6 + $0x18] sm:$0xff] }
 0x27a   :  { %v2748_v63 = vsub.f32 %v2716_v20, %v2736_v61  ;;  %v3395_v61 = vld [vmem:[%s11989_s6 + $0x20] sm:$0xff] }
 0x27b   :  { %v10299_v0 = vpop.eup %10298  ;;  %v2759_v2 = vmul.f32 1.442695, %v2747_v62 }
 0x27c   :  { %v2761_v44 = vmul.f32 1.442695, %v2748_v63  ;;  %v2770_v4 = vsel %vm2102_vm2, %v10299_v0, 0.0 }
 0x27d   :  { %10304 = vpow2.f32 %v2759_v2  ;;  %2771 = vadd.xlane.f32.xlu1 %v2770_v4  ;;  %v3397_v4 = vld [vmem:[%s11989_s6 + $0x30] sm:$0xff] }
 0x27e   :  { %10306 = vpow2.f32 %v2761_v44 }
 0x27f   :  { %v10301_v46 = vpop.eup %10300 }
 0x280   :  { %v2739_v5 = vpop.xlane.xlu0 %2738  ;;  %v2773_v6 = vsel %vm2102_vm2, %v10301_v46, 0.0 }
 0x281   :  { %v2742_v7 = vpop.xlane.xlu1 %2741  ;;  %v2749_v8 = vsub.f32 %v2717_v27, %v2739_v5  ;;  %2774 = vadd.xlane.f32.xlu0 %v2773_v6  ;;  %v3398_v5 = vld [vmem:[%s11989_s6 + $0x38] sm:$0xff] }
 0x282   :  { %v2750_v9 = vsub.f32 %v2718_v30, %v2742_v7 }
 0x283   :  { %v10303_v10 = vpop.eup %10302  ;;  %v2763_v12 = vmul.f32 1.442695, %v2749_v8 }
 0x284   :  { %v2765_v53 = vmul.f32 1.442695, %v2750_v9  ;;  %v2776_v13 = vsel %vm2102_vm2, %v10303_v10, 0.0 }
 0x285   :  { %10308 = vpow2.f32 %v2763_v12  ;;  %2777 = vadd.xlane.f32.xlu1 %v2776_v13 }
 0x286   :  { %10310 = vpow2.f32 %v2765_v53 }
 0x287   :  { %v10305_v55 = vpop.eup %10304 }
 0x288   :  { %v10307_v14 = vpop.eup %10306  ;;  %v2779_v15 = vsel %vm2102_vm2, %v10305_v55, 0.0 }
 0x289   :  { %v2782_v16 = vsel %vm2102_vm2, %v10307_v14, 0.0  ;;  %2780 = vadd.xlane.f32.xlu0 %v2779_v15 }
 0x28a   :  { %2783 = vadd.xlane.f32.xlu1 %v2782_v16 }
 0x28f   :  { %v10309_v17 = vpop.eup %10308 }
 0x290   :  { %v10311_v18 = vpop.eup %10310  ;;  %v2785_v19 = vsel %vm2102_vm2, %v10309_v17, 0.0 }
 0x291   :  { %v2788_v20 = vsel %vm2102_vm2, %v10311_v18, 0.0  ;;  %2786 = vadd.xlane.f32.xlu0 %v2785_v19 }
 0x292   :  { %2789 = vadd.xlane.f32.xlu1 %v2788_v20 }
 0x306   :  { %v2769_v23 = vpop.xlane.xlu0 %2768 }
 0x307   :  { %10312 = vrcp.f32 %v2769_v23 }
 0x30a   :  { %v2772_v24 = vpop.xlane.xlu1 %2771 }
 0x30b   :  { %10314 = vrcp.f32 %v2772_v24 }
 0x30e   :  { %v2775_v25 = vpop.xlane.xlu0 %2774 }
 0x30f   :  { %10316 = vrcp.f32 %v2775_v25 }
 0x311   :  { %v10313_v26 = vpop.eup %10312 }
 0x312   :  { %v2799_v27 = vmul.f32 %v10313_v26, %v10297_v52  ;;  %v2778_v28 = vpop.xlane.xlu1 %2777 }
 0x313   :  { %10318 = vrcp.f32 %v2778_v28 }
 0x314   :  { %9428 = vmatmul.mubr.msk.f32.vlgmr.msra.gmra.mrb[34].mxu0 %vm2102_vm2, %v2799_v27 }
 0x315   :  { %v10315_v29 = vpop.eup %10314  ;;  %9436 = vmatpush3.msra.mxu0 %v11027_v32  ;;  %9437 = vmatprep.mubr.msk.f32.mxu0 %vm10401_vm0, %v10402_v11 }
 0x316   :  { %v2800_v30 = vmul.f32 %v10315_v29, %v10299_v0  ;;  %v2781_v31 = vpop.xlane.xlu0 %2780  ;;  %9445 = vmatprep.subr.mxu0 %v10402_v11  ;;  %v3396_v0 = vld [vmem:[%s11989_s6 + $0x28] sm:$0xff] }
 0x317   :  { %v2784_v34 = vpop.xlane.xlu1 %2783  ;;  %10320 = vrcp.f32 %v2781_v31 }
 0x318   :  { %10322 = vrcp.f32 %v2784_v34  ;;  %9433 = vmatmul.mubr.msk.f32.vlgmr.msra.gmra.mrb[30].mxu1 %vm2102_vm2, %v2800_v30  ;;  %v11152_v30 = vld [vmem:[%s11993_s10] sm:$0x3f] }
 0x319   :  { %v10317_v36 = vpop.eup %10316  ;;  %9441 = vmatpush3.msra.mxu1 %v11033_v42  ;;  %9442 = vmatprep.mubr.msk.f32.mxu1 %vm10401_vm0, %v10402_v11  ;;  %v3993_v31 = vrot.slane %v11152_v30, %v10943_v59 }
 0x31a   :  { %v2801_v38 = vmul.f32 %v10317_v36, %v10301_v46  ;;  %9450 = vmatprep.subr.mxu1 %v10402_v11 }
 0x31c   :  { %9438 = vmatmul.mubr.msk.f32.vlgmr.msra.gmra.mrb[36].mxu0 %vm2102_vm2, %v2801_v38 }
 0x31d   :  { %v10319_v32 = vpop.eup %10318  ;;  %9446 = vmatpush3.msra.mxu0 %v11036_v48  ;;  %9447 = vmatprep.mubr.msk.f32.mxu0 %vm10401_vm0, %v10402_v11 }
 0x31e   :  { %v2802_v39 = vmul.f32 %v10319_v32, %v10303_v10  ;;  %v2787_v40 = vpop.xlane.xlu0 %2786  ;;  %9455 = vmatprep.subr.mxu0 %v10402_v11 }
 0x31f   :  { %v2790_v33 = vpop.xlane.xlu1 %2789  ;;  %10324 = vrcp.f32 %v2787_v40 }
 0x320   :  { %10326 = vrcp.f32 %v2790_v33  ;;  %9443 = vmatmul.mubr.msk.f32.vlgmr.msra.gmra.mrb[32].mxu1 %vm2102_vm2, %v2802_v39 }
 0x321   :  { %v10321_v42 = vpop.eup %10320  ;;  %9451 = vmatpush3.msra.mxu1 %v11040_v56  ;;  %9452 = vmatprep.mubr.msk.f32.mxu1 %vm10401_vm0, %v10402_v11 }
 0x322   :  { %v10323_v41 = vpop.eup %10322  ;;  %v2803_v48 = vmul.f32 %v10321_v42, %v10305_v55  ;;  %9460 = vmatprep.subr.mxu1 %v10402_v11 }
 0x323   :  { %v2804_v45 = vmul.f32 %v10323_v41, %v10307_v14 }
 0x324   :  { %9448 = vmatmul.mubr.msk.f32.vlgmr.msra.gmra.mrb[38].mxu0 %vm2102_vm2, %v2803_v48 }
 0x325   :  { %9453 = vmatmul.mubr.msk.f32.vlgmr.msra.gmra.mrb[34].mxu1 %vm2102_vm2, %v2804_v45  ;;  %9456 = vmatpush3.msra.mxu0 %v11042_v58  ;;  %v3391_v58 = vld [vmem:[%s11989_s6] sm:$0xff] }
 0x326   :  { %9461 = vmatpush3.msra.mxu1 %v11045_v1  ;;  %9457 = vmatprep.mubr.msk.f32.mxu0 %vm10401_vm0, %v10402_v11  ;;  %v3392_v1 = vld [vmem:[%s11989_s6 + $0x8] sm:$0xff] }
 0x327   :  { %9462 = vmatprep.mubr.msk.f32.mxu1 %vm10401_vm0, %v10402_v11  ;;  %9465 = vmatprep.subr.mxu0 %v10402_v11 }
 0x328   :  { %9470 = vmatprep.subr.mxu1 %v10402_v11 }
 0x329   :  { %v10325_v56 = vpop.eup %10324 }
 0x32a   :  { %v10327_v47 = vpop.eup %10326  ;;  %v2805_v35 = vmul.f32 %v10325_v56, %v10309_v17 }
 0x32b   :  { %v2806_v50 = vmul.f32 %v10327_v47, %v10311_v18 }
 0x32c   :  { %9458 = vmatmul.mubr.msk.f32.vlgmr.msra.gmra.mrb[40].mxu0 %vm2102_vm2, %v2805_v35 }
 0x32d   :  { %9463 = vmatmul.mubr.msk.f32.vlgmr.msra.gmra.mrb[36].mxu1 %vm2102_vm2, %v2806_v50  ;;  %9467 = vmatprep.mubr.msk.f32.mxu0 %vm10401_vm0, %v10402_v11 }
 0x32e   :  { %9472 = vmatprep.mubr.msk.f32.mxu1 %vm10401_vm0, %v10402_v11  ;;  %9466 = vmatpush3.msra.mxu0 %v3391_v58 }
 0x32f   :  { %9475 = vmatprep.subr.mxu0 %v10402_v11  ;;  %9471 = vmatpush3.msra.mxu1 %v3392_v1 }
 0x330   :  { %9480 = vmatprep.subr.mxu1 %v10402_v11 }
 0x3e7   :  { %v2876_v51 = vpop.f32.mrb[34].mxu0 }
 0x3e8   :  { %v9429_v52 = vpop.f32.mrb[35].mxu0  ;;  %9468 = vmatmul.mubr.msk.f32.vlgmr.msra.gmra.mrb[42].mxu0 %vm2102_vm2, %v2876_v51 }
 0x3e9   :  { %9476 = vmatpush3.msra.mxu0 %v3393_v37  ;;  %9477 = vmatprep.mubr.msk.f32.mxu0 %vm10401_vm0, %v10402_v11 }
 0x3ea   :  { %9485 = vmatprep.subr.mxu0 %v10402_v11 }
 0x3eb   :  { %v2949_v57 = vpop.f32.mrb[30].mxu1 }
 0x3ec   :  { %v9434_v60 = vpop.f32.mrb[31].mxu1  ;;  %9473 = vmatmul.mubr.msk.f32.vlgmr.msra.gmra.mrb[38].mxu1 %vm2102_vm2, %v2949_v57  ;;  %v4038_v57 = vld [vmem:[%s11990_s7 + $0x8] sm:$0xff] }
 0x3ed   :  { %9481 = vmatpush3.msra.mxu1 %v3394_v54  ;;  %9482 = vmatprep.mubr.msk.f32.mxu1 %vm10401_vm0, %v10402_v11 }
 0x3ee   :  { %9490 = vmatprep.subr.mxu1 %v10402_v11 }
 0x3ef   :  { %v3022_v62 = vpop.f32.mrb[36].mxu0 }
 0x3f0   :  { %v9439_v63 = vpop.f32.mrb[37].mxu0  ;;  %9478 = vmatmul.mubr.msk.f32.vlgmr.msra.gmra.mrb[44].mxu0 %vm2102_vm2, %v3022_v62  ;;  %v4040_v62 = vld [vmem:[%s11990_s7 + $0x18] sm:$0xff] }
 0x3f1   :  { %9486 = vmatpush3.msra.mxu0 %v3395_v61  ;;  %9487 = vmatprep.mubr.msk.f32.mxu0 %vm10401_vm0, %v10402_v11  ;;  %v4039_v61 = vld [vmem:[%s11990_s7 + $0x10] sm:$0xff] }
 0x3f2   :  { %9495 = vmatprep.subr.mxu0 %v10402_v11  ;;  %v10097_v63 = vpack.c.bf16 %v4040_v62, %v4039_v61 }
 0x3f3   :  { %v3095_v2 = vpop.f32.mrb[32].mxu1 }
 0x3f4   :  { %v9444_v44 = vpop.f32.mrb[33].mxu1  ;;  %9483 = vmatmul.mubr.msk.f32.vlgmr.msra.gmra.mrb[40].mxu1 %vm2102_vm2, %v3095_v2  ;;  %v4132_v2 = vld [vmem:[%s11991_s8 + $0x8] sm:$0xff] }
 0x3f5   :  { %9491 = vmatpush3.msra.mxu1 %v3396_v0  ;;  %9492 = vmatprep.mubr.msk.f32.mxu1 %vm10401_vm0, %v10402_v11  ;;  %v4131_v0 = vld [vmem:[%s11991_s8] sm:$0xff]  ;;  %v4133_v44 = vld [vmem:[%s11991_s8 + $0x10] sm:$0xff] }
 0x3f6   :  { %9500 = vmatprep.subr.mxu1 %v10402_v11 }
 0x3f7   :  { %v3168_v46 = vpop.f32.mrb[38].mxu0 }
 0x3f8   :  { %v3241_v6 = vpop.f32.mrb[34].mxu1  ;;  %v9449_v7 = vpop.f32.mrb[39].mxu0  ;;  %9488 = vmatmul.mubr.msk.f32.vlgmr.msra.gmra.mrb[46].mxu0 %vm2102_vm2, %v3168_v46  ;;  %v4134_v46 = vld [vmem:[%s11991_s8 + $0x18] sm:$0xff] }
 0x3f9   :  { %v9454_v8 = vpop.f32.mrb[35].mxu1  ;;  %9493 = vmatmul.mubr.msk.f32.vlgmr.msra.gmra.mrb[42].mxu1 %vm2102_vm2, %v3241_v6  ;;  %9496 = vmatpush3.msra.mxu0 %v3397_v4  ;;  %v10101_v4 = vpack.c.bf16 %v4132_v2, %v4131_v0  ;;  %v4135_v6 = vld [vmem:[%s11991_s8 + $0x20] sm:$0xff]  ;;  %v4136_v7 = vld [vmem:[%s11991_s8 + $0x28] sm:$0xff] }
 0x3fa   :  { %9501 = vmatpush3.msra.mxu1 %v3398_v5  ;;  %9497 = vmatprep.mubr.msk.f32.mxu0 %vm10401_vm0, %v10402_v11  ;;  %v10105_v5 = vpack.c.bf16 %v4134_v46, %v4133_v44  ;;  %v10109_v8 = vpack.c.bf16 %v4136_v7, %v4135_v6  ;;  %v8572_v0 = vld [vmem:[%s11985_s2 + $0x108] sm:$0xff]  ;;  %v8579_v2 = vld [vmem:[%s11985_s2 + $0x140] sm:$0xff]  ;;  %v8574_v6 = vld [vmem:[%s11985_s2 + $0x118] sm:$0xff] }
 0x3fb   :  { %9502 = vmatprep.mubr.msk.f32.mxu1 %vm10401_vm0, %v10402_v11  ;;  %10102 = vmatprep.subr.bf16.mxu1 %v10101_v4  ;;  %v8581_v7 = vld [vmem:[%s11985_s2 + $0x150] sm:$0xff] }
 0x3ff   :  { %v3314_v9 = vpop.f32.mrb[40].mxu0 }
 0x400   :  { %v3387_v10 = vpop.f32.mrb[36].mxu1  ;;  %v9459_v12 = vpop.f32.mrb[41].mxu0  ;;  %9498 = vmatmul.mubr.msk.f32.vlgmr.msra.gmra.mrb[48].mxu0 %vm2102_vm2, %v3314_v9 }
 0x401   :  { %v9464_v53 = vpop.f32.mrb[37].mxu1  ;;  %9503 = vmatmul.mubr.msk.f32.vlgmr.msra.gmra.mrb[44].mxu1 %vm2102_vm2, %v3387_v10 }
 0x402   :  { %10104 = vmatpush3.bf16.msra.mxu1 %v10101_v4  ;;  %v8580_v4 = vld [vmem:[%s11985_s2 + $0x148] sm:$0xff] }
 0x403   :  { %10106 = vmatprep.subr.bf16.mxu1 %v10105_v5  ;;  %v10130_v46 = vpack.c.bf16 %v8580_v4, %v8579_v2  ;;  %v8593_v4 = vld [vmem:[%s11985_s2 + $0x1b0] sm:$0xff] }
 0x406   :  { %10108 = vmatpush3.bf16.msra.mxu1 %v10105_v5  ;;  %v8573_v5 = vld [vmem:[%s11985_s2 + $0x110] sm:$0xff] }
 0x407   :  { %10110 = vmatprep.subr.bf16.mxu1 %v10109_v8 }
 0x40a   :  { %10112 = vmatpush3.bf16.msra.mxu1 %v10109_v8  ;;  %v10121_v8 = vpack.c.bf16 %v8574_v6, %v8573_v5  ;;  %v8605_v5 = vld [vmem:[%s11986_s3 + $0x110] sm:$0xff]  ;;  %v8606_v6 = vld [vmem:[%s11986_s3 + $0x118] sm:$0xff] }
 0x4bb   :  { %v3468_v13 = vpop.f32.mrb[42].mxu0 }
 0x4bc   :  { %v9469_v55 = vpop.f32.mrb[43].mxu0 }
 0x4bf   :  { %v3541_v14 = vpop.f32.mrb[38].mxu1 }
 0x4c0   :  { %v9474_v15 = vpop.f32.mrb[39].mxu1 }
 0x4c1   :  { %v4033_v15 = vsub.s32 2, %v10920_v43 }
 0x4c3   :  { %v3614_v16 = vpop.f32.mrb[44].mxu0 }
 0x4c4   :  { %v3983_v17 = vadd.f32 %v3614_v16, %v3468_v13  ;;  %v9479_v18 = vpop.f32.mrb[45].mxu0 }
 0x4c7   :  { %v3687_v19 = vpop.f32.mrb[40].mxu1 }
 0x4c8   :  { %v3984_v20 = vadd.f32 %v3687_v19, %v3541_v14  ;;  %v9484_v23 = vpop.f32.mrb[41].mxu1  ;;  %v4027_v14 = vsub.s32 1, %v10920_v43 }
 0x4ca   :  { %v4028_v16 = vrot.slane %v11152_v30, %v4027_v14 }
 0x4cb   :  { %v3760_v24 = vpop.f32.mrb[46].mxu0 }
 0x4cc   :  { %v3985_v25 = vadd.f32 %v3983_v17, %v3760_v24  ;;  %v3833_v26 = vpop.f32.mrb[42].mxu1  ;;  %v9489_v27 = vpop.f32.mrb[47].mxu0 }
 0x4cd   :  { %v3986_v28 = vadd.f32 %v3984_v20, %v3833_v26  ;;  %v9494_v29 = vpop.f32.mrb[43].mxu1  ;;  %v4034_v20 = vrot.slane %v11152_v30, %v4033_v15 }
 0x4ce   :  { %v4138_v29 = vld [vmem:[%s11991_s8 + $0x38] sm:$0xff] }
 0x4d3   :  { %v3906_v34 = vpop.f32.mrb[48].mxu0 }
 0x4d4   :  { %v3987_v36 = vadd.f32 %v3985_v25, %v3906_v34  ;;  %v3979_v38 = vpop.f32.mrb[44].mxu1  ;;  %v9499_v32 = vpop.f32.mrb[49].mxu0  ;;  %v8566_v34 = vld [vmem:[%s11992_s9] ss:$0 sm:$0xff] }
 0x4d5   :  { %v3988_v39 = vadd.f32 %v3986_v28, %v3979_v38  ;;  %v9504_v40 = vpop.f32.mrb[45].mxu1  ;;  %v4137_v28 = vld [vmem:[%s11991_s8 + $0x30] sm:$0xff] }
 0x4d6   :  { %v3994_v33 = vadd.f32 %v3993_v31, %v3987_v36 }
 0x4d7   :  { %v3995_v42 = vadd.f32 %v3993_v31, %v3988_v39  ;;  %v10113_v31 = vpack.c.bf16 %v4138_v29, %v4137_v28  ;;  %v8587_v28 = vld [vmem:[%s11985_s2 + $0x180] sm:$0xff]  ;;  %v8588_v29 = vld [vmem:[%s11985_s2 + $0x188] sm:$0xff] }
 0x4d8   :  { %v3996_v41 = vadd.f32 %v3994_v33, %v10518_v21 }
 0x4d9   :  { %v3997_v48 = vadd.f32 %v3995_v42, %v10520_v22  ;;  %v4037_v22 = vld [vmem:[%s11990_s7] sm:$0xff]  ;;  %10114 = vmatprep.subr.bf16.mxu1 %v10113_v31  ;;  %v4141_v42 = vsub.s32 5, %v10920_v43 }
 0x4da   :  { %v3998_v45 = vsel %vm335_vm1, %v3996_v41, 0.0  ;;  %v10093_v60 = vpack.c.bf16 %v4038_v57, %v4037_v22  ;;  %10116 = vmatpush3.bf16.msra.mxu1 %v10113_v31 }
 0x4db   :  { %v4001_v56 = vsel %vm335_vm1, %v3997_v48, 0.0  ;;  %3999 = vadd.xlane.f32.xlu0 %v3998_v45  ;;  %10129 = vmatprep.subr.bf16.mxu1 %v10400_v3 }
 0x4dc   :  { %4002 = vadd.xlane.f32.xlu1 %v4001_v56  ;;  %10094 = vmatprep.subr.bf16.mxu0 %v10093_v60 }
 0x4dd   :  { %10096 = vmatpush3.bf16.msra.mxu0 %v10093_v60 }
 0x4de   :  { %10098 = vmatprep.subr.bf16.mxu0 %v10097_v63 }
 0x4e1   :  { %10100 = vmatpush3.bf16.msra.mxu0 %v10097_v63  ;;  %v8571_v63 = vld [vmem:[%s11985_s2 + $0x100] sm:$0xff] }
 0x4e2   :  { %10117 = vmatprep.subr.bf16.mxu0 %v10400_v3  ;;  %v10118_v44 = vpack.c.bf16 %v8572_v0, %v8571_v63  ;;  %v8603_v63 = vld [vmem:[%s11986_s3 + $0x100] sm:$0xff]  ;;  %v8604_v0 = vld [vmem:[%s11986_s3 + $0x108] sm:$0xff] }
 0x568   :  { %v4000_v47 = vpop.xlane.xlu0 %3999 }
 0x569   :  { %v4003_v35 = vpop.xlane.xlu1 %4002  ;;  %v4005_v50 = vmul.f32 0.03125, %v4000_v47 }
 0x56a   :  { %v4006_v58 = vmul.f32 0.03125, %v4003_v35 }
 0x56b   :  { %v4007_v1 = vsub.f32 %v3996_v41, %v4005_v50  ;;  %v4142_v41 = vrot.slane %v11152_v30, %v4141_v42 }
 0x56c   :  { %v4008_v37 = vsub.f32 %v3997_v48, %v4006_v58 }
 0x56d   :  { %v4009_v51 = vmul.f32 %v4007_v1, %v4007_v1 }
 0x56e   :  { %v4010_v52 = vmul.f32 %v4008_v37, %v4008_v37 }
 0x56f   :  { %v4011_v54 = vsel %vm335_vm1, %v4009_v51, 0.0 }
 0x570   :  { %v4014_v21 = vsel %vm335_vm1, %v4010_v52, 0.0  ;;  %4012 = vadd.xlane.f32.xlu0 %v4011_v54 }
 0x571   :  { %4015 = vadd.xlane.f32.xlu1 %v4014_v21 }
 0x5fd   :  { %v4013_v9 = vpop.xlane.xlu0 %4012 }
 0x5fe   :  { %v4016_v10 = vpop.xlane.xlu1 %4015  ;;  %v4017_v12 = vmul.f32 0.03125, %v4013_v9  ;;  %v8582_v9 = vld [vmem:[%s11985_s2 + $0x158] sm:$0xff] }
 0x5ff   :  { %v4018_v53 = vmul.f32 0.03125, %v4016_v10  ;;  %v10133_v10 = vpack.c.bf16 %v8582_v9, %v8581_v7  ;;  %v8599_v9 = vld [vmem:[%s11985_s2 + $0x1e0] sm:$0xff] }
 0x600   :  { %v4019_v13 = vadd.f32 1e-05, %v4017_v12 }
 0x601   :  { %v4020_v55 = vadd.f32 1e-05, %v4018_v53 }
 0x602   :  { %10328 = vrsqrt.f32 %v4019_v13 }
 0x603   :  { %10330 = vrsqrt.f32 %v4020_v55 }
 0x60c   :  { %v10329_v17 = vpop.eup %10328 }
 0x60d   :  { %v10331_v18 = vpop.eup %10330  ;;  %v4023_v19 = vmul.f32 %v10329_v17, %v4007_v1 }
 0x60e   :  { %v4024_v23 = vmul.f32 %v10331_v18, %v4008_v37  ;;  %v4255_v18 = vsub.s32 3, %v10920_v43 }
 0x60f   :  { %v4029_v24 = vmul.f32 %v4028_v16, %v4023_v19  ;;  %v4261_v19 = vsub.s32 4, %v10920_v43 }
 0x610   :  { %v4030_v25 = vmul.f32 %v4028_v16, %v4024_v23 }
 0x611   :  { %v4035_v26 = vadd.f32 %v4034_v20, %v4029_v24  ;;  %v8575_v24 = vld [vmem:[%s11985_s2 + $0x120] sm:$0xff] }
 0x612   :  { %v4036_v27 = vadd.f32 %v4034_v20, %v4030_v25  ;;  %v4256_v20 = vrot.slane %v11152_v30, %v4255_v18  ;;  %v4262_v25 = vrot.slane %v11152_v30, %v4261_v19  ;;  %v8577_v30 = vld [vmem:[%s11985_s2 + $0x130] sm:$0xff] }
 0x613   :  { %9513 = vmatprep.mubr.msk.f32.mxu0 %vm335_vm1, %v4035_v26 }
 0x614   :  { %9514 = vmatmul.mubr.msk.f32.vlgmr.msra.gmra.mrb[50].mxu0 %vm335_vm1, %v4036_v27 }
 0x615   :  { %9543 = vmatprep.mubr.msk.f32.mxu0 %vm10401_vm0, %v10402_v11  ;;  %10119 = vmatpush3.bf16.msra.mxu0 %v10118_v44  ;;  %v10166_v44 = vpack.c.bf16 %v8604_v0, %v8603_v63  ;;  %v8625_v63 = vld [vmem:[%s11986_s3 + $0x1b0] sm:$0xff]  ;;  %v8626_v0 = vld [vmem:[%s11986_s3 + $0x1b8] sm:$0xff] }
 0x616   :  { %10120 = vmatprep.subr.bf16.mxu0 %v10400_v3 }
 0x619   :  { %10122 = vmatpush3.bf16.msra.mxu0 %v10121_v8  ;;  %v10169_v8 = vpack.c.bf16 %v8606_v6, %v8605_v5  ;;  %v8631_v5 = vld [vmem:[%s11986_s3 + $0x1e0] sm:$0xff]  ;;  %v8632_v6 = vld [vmem:[%s11986_s3 + $0x1e8] sm:$0xff] }
 0x61a   :  { %10123 = vmatprep.subr.bf16.mxu0 %v10400_v3 }
 0x6e7   :  { %v9515_v36 = vpop.f32.mrb[50].mxu0 }
 0x6e8   :  { %v4126_v38 = vadd.f32 %v9515_v36, %v8566_v34  ;;  %v4120_v32 = vpop.f32.mrb[51].mxu0 }
 0x6e9   :  { %v4121_v39 = vadd.f32 %v8566_v34, %v4120_v32 }
 0x6ea   :  { %v4130_v33 = vmax.f32 %v4126_v38, 0.0  ;;  %v10142_v38 = vpack.c.bf16 %v8588_v29, %v8587_v28  ;;  %v8619_v28 = vld [vmem:[%s11986_s3 + $0x180] sm:$0xff]  ;;  %v8620_v29 = vld [vmem:[%s11986_s3 + $0x188] sm:$0xff] }
 0x6eb   :  { %v4129_v40 = vmax.f32 %v4121_v39, 0.0 }
 0x6ed   :  { %9532 = vmatprep.mubr.msk.f32.mxu1 %vm4143_vm3, %v4129_v40  ;;  %v8578_v40 = vld [vmem:[%s11985_s2 + $0x138] sm:$0xff] }
 0x6ee   :  { %9533 = vmatmul.mubr.msk.f32.vlgmr.msra.gmra.mrb[46].mxu1 %vm4143_vm3, %v4130_v33  ;;  %v8589_v33 = vld [vmem:[%s11985_s2 + $0x190] sm:$0xff] }
 0x6ef   :  { %9565 = vmatprep.mubr.msk.f32.mxu1 %vm10401_vm0, %v10402_v11  ;;  %10131 = vmatpush3.bf16.msra.mxu1 %v10130_v46  ;;  %v8594_v46 = vld [vmem:[%s11985_s2 + $0x1b8] sm:$0xff] }
 0x6f0   :  { %10132 = vmatprep.subr.bf16.mxu1 %v10400_v3  ;;  %v10151_v7 = vpack.c.bf16 %v8594_v46, %v8593_v4  ;;  %v10199_v4 = vpack.c.bf16 %v8626_v0, %v8625_v63  ;;  %v8666_v63 = vld [vmem:[%s11987_s4 + $0x1f8] sm:$0xff] }
 0x6f3   :  { %10134 = vmatpush3.bf16.msra.mxu1 %v10133_v10  ;;  %v8600_v10 = vld [vmem:[%s11985_s2 + $0x1e8] sm:$0xff] }
 0x6f4   :  { %10141 = vmatprep.subr.bf16.mxu1 %v10400_v3 }
 0x7c1   :  { %v9534_v48 = vpop.f32.mrb[46].mxu1 }
 0x7c2   :  { %v4222_v45 = vadd.f32 %v9534_v48, %v4142_v41  ;;  %v4216_v56 = vpop.f32.mrb[47].mxu1  ;;  %v10127_v48 = vpack.c.bf16 %v8578_v40, %v8577_v30  ;;  %v8621_v30 = vld [vmem:[%s11986_s3 + $0x190] sm:$0xff] }
 0x7c3   :  { %v4217_v47 = vadd.f32 %v4216_v56, %v4142_v41  ;;  %v8590_v41 = vld [vmem:[%s11985_s2 + $0x198] sm:$0xff]  ;;  %v8583_v56 = vld [vmem:[%s11985_s2 + $0x160] sm:$0xff] }
 0x7c4   :  { %v4226_v35 = vadd.f32 %v4222_v45, %v4036_v27  ;;  %v8576_v27 = vld [vmem:[%s11985_s2 + $0x128] sm:$0xff]  ;;  %v10145_v45 = vpack.c.bf16 %v8590_v41, %v8589_v33  ;;  %v8615_v41 = vld [vmem:[%s11986_s3 + $0x160] sm:$0xff] }
 0x7c5   :  { %v4225_v50 = vadd.f32 %v4217_v47, %v4035_v26  ;;  %v10124_v36 = vpack.c.bf16 %v8576_v27, %v8575_v24  ;;  %v8608_v27 = vld [vmem:[%s11986_s3 + $0x128] sm:$0xff] }
 0x7c6   :  { %v4230_v58 = vsel %vm335_vm1, %v4226_v35, 0.0 }
 0x7c7   :  { %4231 = vadd.xlane.f32.xlu1 %v4230_v58  ;;  %v4227_v1 = vsel %vm335_vm1, %v4225_v50, 0.0  ;;  %v8596_v58 = vld [vmem:[%s11985_s2 + $0x1c8] sm:$0xff] }
 0x7c8   :  { %4228 = vadd.xlane.f32.xlu0 %v4227_v1 }
 0x854   :  { %v4232_v37 = vpop.xlane.xlu1 %4231 }
 0x855   :  { %v4234_v51 = vmul.f32 0.03125, %v4232_v37  ;;  %v4229_v52 = vpop.xlane.xlu0 %4228 }
 0x856   :  { %v4233_v54 = vmul.f32 0.03125, %v4229_v52 }
 0x857   :  { %v4236_v21 = vsub.f32 %v4226_v35, %v4234_v51  ;;  %v8584_v35 = vld [vmem:[%s11985_s2 + $0x168] sm:$0xff]  ;;  %v8585_v51 = vld [vmem:[%s11985_s2 + $0x170] sm:$0xff] }
 0x858   :  { %v4235_v22 = vsub.f32 %v4225_v50, %v4233_v54  ;;  %v8595_v50 = vld [vmem:[%s11985_s2 + $0x1c0] sm:$0xff]  ;;  %v10136_v1 = vpack.c.bf16 %v8584_v35, %v8583_v56  ;;  %v8586_v54 = vld [vmem:[%s11985_s2 + $0x178] sm:$0xff]  ;;  %v8628_v56 = vld [vmem:[%s11986_s3 + $0x1c8] sm:$0xff] }
 0x859   :  { %v4238_v57 = vmul.f32 %v4236_v21, %v4236_v21  ;;  %v10154_v37 = vpack.c.bf16 %v8596_v58, %v8595_v50  ;;  %v8617_v50 = vld [vmem:[%s11986_s3 + $0x170] sm:$0xff]  ;;  %v8618_v58 = vld [vmem:[%s11986_s3 + $0x178] sm:$0xff] }
 0x85a   :  { %v4237_v60 = vmul.f32 %v4235_v22, %v4235_v22 }
 0x85b   :  { %v4242_v61 = vsel %vm335_vm1, %v4238_v57, 0.0  ;;  %v10139_v57 = vpack.c.bf16 %v8586_v54, %v8585_v51  ;;  %v10187_v51 = vpack.c.bf16 %v8618_v58, %v8617_v50 }
 0x85c   :  { %4243 = vadd.xlane.f32.xlu1 %v4242_v61  ;;  %v4239_v62 = vsel %vm335_vm1, %v4237_v60, 0.0  ;;  %v8591_v61 = vld [vmem:[%s11985_s2 + $0x1a0] sm:$0xff] }
 0x85d   :  { %4240 = vadd.xlane.f32.xlu0 %v4239_v62  ;;  %v8592_v62 = vld [vmem:[%s11985_s2 + $0x1a8] sm:$0xff] }
 0x85e   :  { %v10148_v2 = vpack.c.bf16 %v8592_v62, %v8591_v61 }
 0x8e9   :  { %v4244_v12 = vpop.xlane.xlu1 %4243 }
 0x8ea   :  { %v4246_v53 = vmul.f32 0.03125, %v4244_v12  ;;  %v4241_v13 = vpop.xlane.xlu0 %4240  ;;  %v8611_v12 = vld [vmem:[%s11986_s3 + $0x140] sm:$0xff] }
 0x8eb   :  { %v4245_v55 = vmul.f32 0.03125, %v4241_v13  ;;  %v10160_v13 = vpack.c.bf16 %v8600_v10, %v8599_v9  ;;  %v10208_v9 = vpack.c.bf16 %v8632_v6, %v8631_v5 }
 0x8ec   :  { %v4248_v16 = vadd.f32 1e-05, %v4246_v53  ;;  %v8612_v53 = vld [vmem:[%s11986_s3 + $0x148] sm:$0xff] }
 0x8ed   :  { %v4247_v17 = vadd.f32 1e-05, %v4245_v55  ;;  %v10178_v55 = vpack.c.bf16 %v8612_v53, %v8611_v12  ;;  %v8633_v12 = vld [vmem:[%s11986_s3 + $0x1f0] sm:$0xff]  ;;  %v8634_v53 = vld [vmem:[%s11986_s3 + $0x1f8] sm:$0xff] }
 0x8ef   :  { %10332 = vrsqrt.f32 %v4247_v17  ;;  %v8602_v17 = vld [vmem:[%s11985_s2 + $0x1f8] sm:$0xff] }
 0x8f0   :  { %10334 = vrsqrt.f32 %v4248_v16  ;;  %v8601_v16 = vld [vmem:[%s11985_s2 + $0x1f0] sm:$0xff] }
 0x8f1   :  { %v10163_v24 = vpack.c.bf16 %v8602_v17, %v8601_v16  ;;  %v10211_v16 = vpack.c.bf16 %v8634_v53, %v8633_v12 }
 0x8f9   :  { %v10333_v23 = vpop.eup %10332 }
 0x8fa   :  { %v4251_v26 = vmul.f32 %v10333_v23, %v4235_v22  ;;  %v10335_v31 = vpop.eup %10334  ;;  %v8598_v22 = vld [vmem:[%s11985_s2 + $0x1d8] sm:$0xff] }
 0x8fb   :  { %v4252_v32 = vmul.f32 %v10335_v31, %v4236_v21  ;;  %v8597_v21 = vld [vmem:[%s11985_s2 + $0x1d0] sm:$0xff]  ;;  %v8614_v23 = vld [vmem:[%s11986_s3 + $0x158] sm:$0xff] }
 0x8fc   :  { %v4257_v34 = vmul.f32 %v4256_v20, %v4251_v26  ;;  %v10157_v60 = vpack.c.bf16 %v8598_v22, %v8597_v21  ;;  %v8607_v26 = vld [vmem:[%s11986_s3 + $0x120] sm:$0xff]  ;;  %v8624_v22 = vld [vmem:[%s11986_s3 + $0x1a8] sm:$0xff] }
 0x8fd   :  { %v4258_v47 = vmul.f32 %v4256_v20, %v4252_v32  ;;  %v8613_v20 = vld [vmem:[%s11986_s3 + $0x150] sm:$0xff]  ;;  %v10172_v31 = vpack.c.bf16 %v8608_v27, %v8607_v26  ;;  %v8622_v32 = vld [vmem:[%s11986_s3 + $0x198] sm:$0xff]  ;;  %v8623_v21 = vld [vmem:[%s11986_s3 + $0x1a0] sm:$0xff] }
 0x8fe   :  { %v11278_v39 = vadd.f32 %v4262_v25, %v4257_v34  ;;  %v10190_v34 = vpack.c.bf16 %v8620_v29, %v8619_v28  ;;  %v10193_v33 = vpack.c.bf16 %v8622_v32, %v8621_v30  ;;  %v10196_v61 = vpack.c.bf16 %v8624_v22, %v8623_v21  ;;  %v8641_v28 = vld [vmem:[%s11987_s4 + $0x130] sm:$0xff]  ;;  %v8642_v29 = vld [vmem:[%s11987_s4 + $0x138] sm:$0xff]  ;;  %v8647_v30 = vld [vmem:[%s11987_s4 + $0x160] sm:$0xff] }
 0x8ff   :  { %v11314_v52 = vadd.f32 %v4262_v25, %v4258_v47  ;;  %v10181_v25 = vpack.c.bf16 %v8614_v23, %v8613_v20  ;;  %v8639_v20 = vld [vmem:[%s11987_s4 + $0x120] sm:$0xff]  ;;  %v8640_v23 = vld [vmem:[%s11987_s4 + $0x128] sm:$0xff]  ;;  %v8658_v21 = vld [vmem:[%s11987_s4 + $0x1b8] sm:$0xff] }
 0x900   :  { %9544 = vmatmul.mubr.msk.f32.vlgmr.msra.gmra.mrb[52].mxu0 %vm335_vm1, %v11278_v39  ;;  %9566 = vmatmul.mubr.msk.f32.vlgmr.msra.gmra.mrb[48].mxu1 %vm335_vm1, %v11278_v39  ;;  %v10220_v26 = vpack.c.bf16 %v8640_v23, %v8639_v20  ;;  %v8648_v32 = vld [vmem:[%s11987_s4 + $0x168] sm:$0xff] }
 0x901   :  { %10125 = vmatpush3.bf16.msra.mxu0 %v10124_v36  ;;  %10143 = vmatpush3.bf16.msra.mxu1 %v10142_v38  ;;  %v8609_v36 = vld [vmem:[%s11986_s3 + $0x130] sm:$0xff]  ;;  %v8610_v38 = vld [vmem:[%s11986_s3 + $0x138] sm:$0xff] }
 0x902   :  { %10126 = vmatprep.subr.bf16.mxu0 %v10400_v3  ;;  %10144 = vmatprep.subr.bf16.mxu1 %v10400_v3  ;;  %v10175_v40 = vpack.c.bf16 %v8610_v38, %v8609_v36  ;;  %v10223_v36 = vpack.c.bf16 %v8642_v29, %v8641_v28 }
 0x903   :  { %9554 = vmatprep.mubr.msk.f32.mxu0 %vm10401_vm0, %v10402_v11  ;;  %9587 = vmatprep.mubr.msk.f32.mxu1 %vm10401_vm0, %v10402_v11 }
 0x905   :  { %10128 = vmatpush3.bf16.msra.mxu0 %v10127_v48  ;;  %10146 = vmatpush3.bf16.msra.mxu1 %v10145_v45  ;;  %v8616_v48 = vld [vmem:[%s11986_s3 + $0x168] sm:$0xff]  ;;  %v8627_v45 = vld [vmem:[%s11986_s3 + $0x1c0] sm:$0xff] }
 0x906   :  { %10135 = vmatprep.subr.bf16.mxu0 %v10400_v3  ;;  %10153 = vmatprep.subr.bf16.mxu1 %v10400_v3  ;;  %v10184_v47 = vpack.c.bf16 %v8616_v48, %v8615_v41  ;;  %v10202_v35 = vpack.c.bf16 %v8628_v56, %v8627_v45  ;;  %v10232_v41 = vpack.c.bf16 %v8648_v32, %v8647_v30  ;;  %v8649_v45 = vld [vmem:[%s11987_s4 + $0x170] sm:$0xff]  ;;  %v8650_v56 = vld [vmem:[%s11987_s4 + $0x178] sm:$0xff] }
 0x907   :  { %v10235_v50 = vpack.c.bf16 %v8650_v56, %v8649_v45 }
 0x908   :  { %9555 = vmatmul.mubr.msk.f32.vlgmr.msra.gmra.mrb[54].mxu0 %vm335_vm1, %v11314_v52  ;;  %9588 = vmatmul.mubr.msk.f32.vlgmr.msra.gmra.mrb[50].mxu1 %vm335_vm1, %v11278_v39 }
 0x909   :  { %10137 = vmatpush3.bf16.msra.mxu0 %v10136_v1  ;;  %10155 = vmatpush3.bf16.msra.mxu1 %v10154_v37  ;;  %v8629_v1 = vld [vmem:[%s11986_s3 + $0x1d0] sm:$0xff]  ;;  %v8630_v37 = vld [vmem:[%s11986_s3 + $0x1d8] sm:$0xff] }
 0x90a   :  { %10138 = vmatprep.subr.bf16.mxu0 %v10400_v3  ;;  %10156 = vmatprep.subr.bf16.mxu1 %v10400_v3  ;;  %v10205_v54 = vpack.c.bf16 %v8630_v37, %v8629_v1  ;;  %v8655_v1 = vld [vmem:[%s11987_s4 + $0x1a0] sm:$0xff]  ;;  %v8656_v37 = vld [vmem:[%s11987_s4 + $0x1a8] sm:$0xff] }
 0x90b   :  { %9576 = vmatprep.mubr.msk.f32.mxu0 %vm10401_vm0, %v10402_v11  ;;  %9609 = vmatprep.mubr.msk.f32.mxu1 %vm10401_vm0, %v10402_v11 }
 0x90d   :  { %10140 = vmatpush3.bf16.msra.mxu0 %v10139_v57  ;;  %10158 = vmatpush3.bf16.msra.mxu1 %v10157_v60  ;;  %v8635_v57 = vld [vmem:[%s11987_s4 + $0x100] sm:$0xff]  ;;  %v8636_v60 = vld [vmem:[%s11987_s4 + $0x108] sm:$0xff] }
 0x90e   :  { %10147 = vmatprep.subr.bf16.mxu0 %v10400_v3  ;;  %10165 = vmatprep.subr.bf16.mxu1 %v10400_v3  ;;  %v10214_v62 = vpack.c.bf16 %v8636_v60, %v8635_v57  ;;  %v8663_v57 = vld [vmem:[%s11987_s4 + $0x1e0] sm:$0xff]  ;;  %v8664_v60 = vld [vmem:[%s11987_s4 + $0x1e8] sm:$0xff] }
 0x910   :  { %9577 = vmatmul.mubr.msk.f32.vlgmr.msra.gmra.mrb[56].mxu0 %vm335_vm1, %v11314_v52  ;;  %9610 = vmatmul.mubr.msk.f32.vlgmr.msra.gmra.mrb[52].mxu1 %vm335_vm1, %v11278_v39 }
 0x911   :  { %10149 = vmatpush3.bf16.msra.mxu0 %v10148_v2  ;;  %10167 = vmatpush3.bf16.msra.mxu1 %v10166_v44  ;;  %v8637_v2 = vld [vmem:[%s11987_s4 + $0x110] sm:$0xff]  ;;  %v8638_v44 = vld [vmem:[%s11987_s4 + $0x118] sm:$0xff] }
 0x912   :  { %10150 = vmatprep.subr.bf16.mxu0 %v10400_v3  ;;  %10168 = vmatprep.subr.bf16.mxu1 %v10400_v3  ;;  %v10217_v46 = vpack.c.bf16 %v8638_v44, %v8637_v2 }
 0x913   :  { %9598 = vmatprep.mubr.msk.f32.mxu0 %vm10401_vm0, %v10402_v11  ;;  %9631 = vmatprep.mubr.msk.f32.mxu1 %vm10401_vm0, %v10402_v11 }
 0x915   :  { %10152 = vmatpush3.bf16.msra.mxu0 %v10151_v7  ;;  %10170 = vmatpush3.bf16.msra.mxu1 %v10169_v8  ;;  %v8643_v7 = vld [vmem:[%s11987_s4 + $0x140] sm:$0xff]  ;;  %v8644_v8 = vld [vmem:[%s11987_s4 + $0x148] sm:$0xff] }
 0x916   :  { %10159 = vmatprep.subr.bf16.mxu0 %v10400_v3  ;;  %10177 = vmatprep.subr.bf16.mxu1 %v10400_v3  ;;  %v10226_v10 = vpack.c.bf16 %v8644_v8, %v8643_v7 }
 0x918   :  { %9599 = vmatmul.mubr.msk.f32.vlgmr.msra.gmra.mrb[58].mxu0 %vm335_vm1, %v11314_v52  ;;  %9632 = vmatmul.mubr.msk.f32.vlgmr.msra.gmra.mrb[54].mxu1 %vm335_vm1, %v11278_v39 }
 0x919   :  { %10161 = vmatpush3.bf16.msra.mxu0 %v10160_v13  ;;  %10179 = vmatpush3.bf16.msra.mxu1 %v10178_v55  ;;  %v8645_v13 = vld [vmem:[%s11987_s4 + $0x150] sm:$0xff]  ;;  %v8646_v55 = vld [vmem:[%s11987_s4 + $0x158] sm:$0xff] }
 0x91a   :  { %10162 = vmatprep.subr.bf16.mxu0 %v10400_v3  ;;  %10180 = vmatprep.subr.bf16.mxu1 %v10400_v3  ;;  %v10229_v17 = vpack.c.bf16 %v8646_v55, %v8645_v13 }
 0x91b   :  { %9620 = vmatprep.mubr.msk.f32.mxu0 %vm10401_vm0, %v10402_v11  ;;  %9653 = vmatprep.mubr.msk.f32.mxu1 %vm10401_vm0, %v10402_v11 }
 0x91d   :  { %10164 = vmatpush3.bf16.msra.mxu0 %v10163_v24  ;;  %10182 = vmatpush3.bf16.msra.mxu1 %v10181_v25  ;;  %v8651_v24 = vld [vmem:[%s11987_s4 + $0x180] sm:$0xff]  ;;  %v8652_v25 = vld [vmem:[%s11987_s4 + $0x188] sm:$0xff] }
 0x91e   :  { %10171 = vmatprep.subr.bf16.mxu0 %v10400_v3  ;;  %10189 = vmatprep.subr.bf16.mxu1 %v10400_v3  ;;  %v10238_v27 = vpack.c.bf16 %v8652_v25, %v8651_v24 }
 0x920   :  { %9621 = vmatmul.mubr.msk.f32.vlgmr.msra.gmra.mrb[60].mxu0 %vm335_vm1, %v11314_v52  ;;  %9654 = vmatmul.mubr.msk.f32.vlgmr.msra.gmra.mrb[56].mxu1 %vm335_vm1, %v11278_v39 }
 0x921   :  { %10173 = vmatpush3.bf16.msra.mxu0 %v10172_v31  ;;  %10191 = vmatpush3.bf16.msra.mxu1 %v10190_v34  ;;  %v8653_v31 = vld [vmem:[%s11987_s4 + $0x190] sm:$0xff]  ;;  %v8654_v34 = vld [vmem:[%s11987_s4 + $0x198] sm:$0xff] }
 0x922   :  { %10174 = vmatprep.subr.bf16.mxu0 %v10400_v3  ;;  %10192 = vmatprep.subr.bf16.mxu1 %v10400_v3  ;;  %v10241_v38 = vpack.c.bf16 %v8654_v34, %v8653_v31 }
 0x923   :  { %9642 = vmatprep.mubr.msk.f32.mxu0 %vm10401_vm0, %v10402_v11  ;;  %9675 = vmatprep.mubr.msk.f32.mxu1 %vm10401_vm0, %v10402_v11 }
 0x925   :  { %10176 = vmatpush3.bf16.msra.mxu0 %v10175_v40  ;;  %10194 = vmatpush3.bf16.msra.mxu1 %v10193_v33  ;;  %v8659_v40 = vld [vmem:[%s11987_s4 + $0x1c0] sm:$0xff]  ;;  %v8660_v33 = vld [vmem:[%s11987_s4 + $0x1c8] sm:$0xff] }
 0x926   :  { %10183 = vmatprep.subr.bf16.mxu0 %v10400_v3  ;;  %10201 = vmatprep.subr.bf16.mxu1 %v10400_v3  ;;  %v10250_v48 = vpack.c.bf16 %v8660_v33, %v8659_v40 }
 0x928   :  { %9643 = vmatmul.mubr.msk.f32.vlgmr.msra.gmra.mrb[62].mxu0 %vm335_vm1, %v11314_v52  ;;  %9676 = vmatmul.mubr.msk.f32.vlgmr.msra.gmra.mrb[58].mxu1 %vm335_vm1, %v11278_v39 }
 0x929   :  { %10185 = vmatpush3.bf16.msra.mxu0 %v10184_v47  ;;  %10203 = vmatpush3.bf16.msra.mxu1 %v10202_v35  ;;  %v8661_v47 = vld [vmem:[%s11987_s4 + $0x1d0] sm:$0xff]  ;;  %v8662_v35 = vld [vmem:[%s11987_s4 + $0x1d8] sm:$0xff] }
 0x92a   :  { %10186 = vmatprep.subr.bf16.mxu0 %v10400_v3  ;;  %10204 = vmatprep.subr.bf16.mxu1 %v10400_v3  ;;  %v10253_v58 = vpack.c.bf16 %v8662_v35, %v8661_v47 }
 0x92b   :  { %9664 = vmatprep.mubr.msk.f32.mxu0 %vm10401_vm0, %v10402_v11  ;;  %9697 = vmatprep.mubr.msk.f32.mxu1 %vm10401_vm0, %v10402_v11 }
 0x92d   :  { %10188 = vmatpush3.bf16.msra.mxu0 %v10187_v51  ;;  %10206 = vmatpush3.bf16.msra.mxu1 %v10205_v54  ;;  %v10244_v51 = vpack.c.bf16 %v8656_v37, %v8655_v1  ;;  %v8657_v54 = vld [vmem:[%s11987_s4 + $0x1b0] sm:$0xff] }
 0x92e   :  { %10195 = vmatprep.subr.bf16.mxu0 %v10400_v3  ;;  %10213 = vmatprep.subr.bf16.mxu1 %v10400_v3  ;;  %v10247_v22 = vpack.c.bf16 %v8658_v21, %v8657_v54 }
 0x930   :  { %9665 = vmatmul.mubr.msk.f32.vlgmr.msra.gmra.mrb[64].mxu0 %vm335_vm1, %v11314_v52  ;;  %9698 = vmatmul.mubr.msk.f32.vlgmr.msra.gmra.mrb[60].mxu1 %vm335_vm1, %v11278_v39 }
 0x931   :  { %10197 = vmatpush3.bf16.msra.mxu0 %v10196_v61  ;;  %10215 = vmatpush3.bf16.msra.mxu1 %v10214_v62  ;;  %v10256_v61 = vpack.c.bf16 %v8664_v60, %v8663_v57  ;;  %v8665_v62 = vld [vmem:[%s11987_s4 + $0x1f0] sm:$0xff] }
 0x932   :  { %10198 = vmatprep.subr.bf16.mxu0 %v10400_v3  ;;  %10216 = vmatprep.subr.bf16.mxu1 %v10400_v3  ;;  %v10259_v0 = vpack.c.bf16 %v8666_v63, %v8665_v62 }
 0x933   :  { %9686 = vmatprep.mubr.msk.f32.mxu0 %vm10401_vm0, %v10402_v11  ;;  %9719 = vmatprep.mubr.msk.f32.mxu1 %vm10401_vm0, %v10402_v11 }
 0x935   :  { %10200 = vmatpush3.bf16.msra.mxu0 %v10199_v4  ;;  %10218 = vmatpush3.bf16.msra.mxu1 %v10217_v46 }
 0x936   :  { %10207 = vmatprep.subr.bf16.mxu0 %v10400_v3  ;;  %10225 = vmatprep.subr.bf16.mxu1 %v10400_v3 }
 0x938   :  { %9687 = vmatmul.mubr.msk.f32.vlgmr.msra.gmra.mrb[66].mxu0 %vm335_vm1, %v11314_v52  ;;  %9720 = vmatmul.mubr.msk.f32.vlgmr.msra.gmra.mrb[62].mxu1 %vm335_vm1, %v11278_v39 }
 0x939   :  { %10209 = vmatpush3.bf16.msra.mxu0 %v10208_v9  ;;  %10227 = vmatpush3.bf16.msra.mxu1 %v10226_v10  ;;  %v8667_v10 = vld [vmem:[%s11988_s5 + $0x18] sm:$0xff] }
 0x93a   :  { %10210 = vmatprep.subr.bf16.mxu0 %v10400_v3  ;;  %10228 = vmatprep.subr.bf16.mxu1 %v10400_v3  ;;  %v4367_v30 = vcombine.high %v8667_v10, %v8667_v10 }
 0x93b   :  { %9708 = vmatprep.mubr.msk.f32.mxu0 %vm10401_vm0, %v10402_v11  ;;  %9741 = vmatprep.mubr.msk.f32.mxu1 %vm10401_vm0, %v10402_v11 }
 0x93c   :  { %v4381_v45 = vrot.slane %v4367_v30, %v10930_v49 }
 0x93d   :  { %10212 = vmatpush3.bf16.msra.mxu0 %v10211_v16  ;;  %10230 = vmatpush3.bf16.msra.mxu1 %v10229_v17  ;;  %v4374_v17 = vrot.slane %v8667_v10, %v10930_v49 }
 0x93e   :  { %10219 = vmatprep.subr.bf16.mxu0 %v10400_v3  ;;  %10237 = vmatprep.subr.bf16.mxu1 %v10400_v3  ;;  %v4397_v21 = vrot.slane %v4381_v45, %v10930_v49 }
 0x93f   :  { %v4390_v23 = vrot.slane %v4374_v17, %v10930_v49 }
 0x940   :  { %9709 = vmatmul.mubr.msk.f32.vlgmr.msra.gmra.mrb[68].mxu0 %vm335_vm1, %v11314_v52  ;;  %9742 = vmatmul.mubr.msk.f32.vlgmr.msra.gmra.mrb[64].mxu1 %vm335_vm1, %v11278_v39 }
 0x941   :  { %10221 = vmatpush3.bf16.msra.mxu0 %v10220_v26  ;;  %10239 = vmatpush3.bf16.msra.mxu1 %v10238_v27  ;;  %v4523_v24 = vrot.slane %v4390_v23, %v10943_v59 }
 0x942   :  { %10222 = vmatprep.subr.bf16.mxu0 %v10400_v3  ;;  %10240 = vmatprep.subr.bf16.mxu1 %v10400_v3 }
 0x943   :  { %9730 = vmatprep.mubr.msk.f32.mxu0 %vm10401_vm0, %v10402_v11  ;;  %9763 = vmatprep.mubr.msk.f32.mxu1 %vm10401_vm0, %v10402_v11 }
 0x945   :  { %10224 = vmatpush3.bf16.msra.mxu0 %v10223_v36  ;;  %10242 = vmatpush3.bf16.msra.mxu1 %v10241_v38  ;;  %v4412_v38 = vcombine.high %v4390_v23, %v4390_v23  ;;  %v4383_v23 = vcombine.high %v4381_v45, %v4381_v45 }
 0x946   :  { %10231 = vmatprep.subr.bf16.mxu0 %v10400_v3  ;;  %10249 = vmatprep.subr.bf16.mxu1 %v10400_v3 }
 0x948   :  { %9731 = vmatmul.mubr.msk.f32.vlgmr.msra.gmra.mrb[70].mxu0 %vm335_vm1, %v11314_v52  ;;  %9764 = vmatmul.mubr.msk.f32.vlgmr.msra.gmra.mrb[66].mxu1 %vm335_vm1, %v11278_v39 }
 0x949   :  { %10233 = vmatpush3.bf16.msra.mxu0 %v10232_v41  ;;  %10251 = vmatpush3.bf16.msra.mxu1 %v10250_v48  ;;  %v4531_v41 = vrot.slane %v4412_v38, %v10943_v59  ;;  %v4382_v48 = vcombine.high %v4374_v17, %v4374_v17 }
 0x94a   :  { %10234 = vmatprep.subr.bf16.mxu0 %v10400_v3  ;;  %10252 = vmatprep.subr.bf16.mxu1 %v10400_v3 }
 0x94b   :  { %9752 = vmatprep.mubr.msk.f32.mxu0 %vm10401_vm0, %v10402_v11  ;;  %9785 = vmatprep.mubr.msk.f32.mxu1 %vm10401_vm0, %v10402_v11  ;;  %v4404_v54 = vrot.slane %v4382_v48, %v10930_v49 }
 0x94d   :  { %10236 = vmatpush3.bf16.msra.mxu0 %v10235_v50  ;;  %10254 = vmatpush3.bf16.msra.mxu1 %v10253_v58  ;;  %v4527_v60 = vrot.slane %v4404_v54, %v10943_v59 }
 0x94e   :  { %10243 = vmatprep.subr.bf16.mxu0 %v10400_v3  ;;  %9799 = vmatprep.subr.mxu1 %v10402_v11 }
 0x950   :  { %9753 = vmatmul.mubr.msk.f32.vlgmr.msra.gmra.mrb[72].mxu0 %vm335_vm1, %v11314_v52  ;;  %9786 = vmatmul.mubr.msk.f32.vlgmr.msra.gmra.mrb[68].mxu1 %vm335_vm1, %v11278_v39 }
 0x951   :  { %10245 = vmatpush3.bf16.msra.mxu0 %v10244_v51  ;;  %9774 = vmatprep.mubr.msk.f32.mxu0 %vm10401_vm0, %v10402_v11 }
 0x952   :  { %10246 = vmatprep.subr.bf16.mxu0 %v10400_v3  ;;  %9801 = vmatprep.mubr.msk.f32.mxu1 %vm10401_vm0, %v10402_v11 }
 0x955   :  { %10248 = vmatpush3.bf16.msra.mxu0 %v10247_v22 }
 0x956   :  { %10255 = vmatprep.subr.bf16.mxu0 %v10400_v3 }
 0x958   :  { %9775 = vmatmul.mubr.msk.f32.vlgmr.msra.gmra.mrb[74].mxu0 %vm335_vm1, %v11314_v52 }
 0x959   :  { %10257 = vmatpush3.bf16.msra.mxu0 %v10256_v61  ;;  %9796 = vmatprep.mubr.msk.f32.mxu0 %vm10401_vm0, %v10402_v11  ;;  %v4539_v61 = vrot.slane %v4397_v21, %v10943_v59 }
 0x95a   :  { %10258 = vmatprep.subr.bf16.mxu0 %v10400_v3  ;;  %v8668_v3 = vld [vmem:[%s11988_s5 + $0x20] sm:$0xff] }
 0x95b   :  { %v4426_v9 = vrot.slane %v8668_v3, %v10930_v49  ;;  %v4419_v34 = vcombine.high %v8668_v3, %v8668_v3  ;;  %v4414_v3 = vcombine.high %v4404_v54, %v4404_v54 }
 0x95d   :  { %10260 = vmatpush3.bf16.msra.mxu0 %v10259_v0  ;;  %v4442_v16 = vrot.slane %v4426_v9, %v10930_v49  ;;  %v4434_v40 = vcombine.high %v4426_v9, %v4426_v9  ;;  %v4433_v33 = vrot.slane %v4419_v34, %v10930_v49 }
 0x95e   :  { %9809 = vmatprep.subr.mxu0 %v10402_v11 }
 0x95f   :  { %v5129_v20 = vrot.slane %v4442_v16, %v10943_v59  ;;  %v4464_v31 = vcombine.high %v4442_v16, %v4442_v16  ;;  %v4456_v1 = vrot.slane %v4434_v40, %v10930_v49  ;;  %v4449_v37 = vrot.slane %v4433_v33, %v10930_v49 }
 0x960   :  { %9797 = vmatmul.mubr.msk.f32.vlgmr.msra.gmra.mrb[76].mxu0 %vm335_vm1, %v11314_v52  ;;  %v4435_v17 = vcombine.high %v4433_v33, %v4433_v33 }
 0x961   :  { %9811 = vmatprep.mubr.msk.f32.mxu0 %vm10401_vm0, %v10402_v11  ;;  %v5137_v32 = vrot.slane %v4464_v31, %v10943_v59  ;;  %v5133_v22 = vrot.slane %v4456_v1, %v10943_v59  ;;  %v5145_v57 = vrot.slane %v4449_v37, %v10943_v59 }
 0x962   :  { %v4463_v34 = vrot.slane %v4435_v17, %v10930_v49 }
 0x964   :  { %v5149_v40 = vrot.slane %v4463_v34, %v10943_v59  ;;  %v4467_v48 = vcombine.high %v4463_v34, %v4463_v34 }
 0x966   :  { %v5157_v54 = vrot.slane %v4467_v48, %v10943_v59 }
 0x9d3   :  { %v4629_v2 = vpop.f32.mrb[52].mxu0  ;;  %v4772_v44 = vpop.f32.mrb[48].mxu1 }
 0x9d4   :  { %v9545_v4 = vpop.f32.mrb[53].mxu0  ;;  %v9567_v46 = vpop.f32.mrb[49].mxu1  ;;  %v4630_v36 = vadd.f32 %v4629_v2, %v4523_v24  ;;  %v4773_v51 = vadd.f32 %v4772_v44, %v4531_v41 }
 0x9d5   :  { %v4466_v46 = vcombine.high %v4456_v1, %v4456_v1 }
 0x9db   :  { %v11671_v5 = vpop.f32.mrb[54].mxu0  ;;  %v11673_v6 = vpop.f32.mrb[50].mxu1 }
 0x9dc   :  { %v9556_v7 = vpop.f32.mrb[55].mxu0  ;;  %v9589_v8 = vpop.f32.mrb[51].mxu1  ;;  %v4703_v9 = vadd.f32 %v11671_v5, %v4527_v60  ;;  %v4913_v10 = vadd.f32 %v11673_v6, %v4539_v61  ;;  %v4535_v5 = vrot.slane %v4414_v3, %v10943_v59 }
 0x9dd   :  { %v4465_v7 = vcombine.high %v4449_v37, %v4449_v37  ;;  %v8669_v8 = vld [vmem:[%s11988_s5 + $0x28] sm:$0xff] }
 0x9de   :  { %v4471_v1 = vcombine.high %v8669_v8, %v8669_v8 }
 0x9df   :  { %v5153_v16 = vrot.slane %v4465_v7, %v10943_v59 }
 0x9e3   :  { %v11682_v12 = vpop.f32.mrb[56].mxu0  ;;  %v11684_v53 = vpop.f32.mrb[52].mxu1 }
 0x9e4   :  { %v9578_v13 = vpop.f32.mrb[57].mxu0  ;;  %v9611_v55 = vpop.f32.mrb[53].mxu1  ;;  %v4843_v38 = vadd.f32 %v11682_v12, %v4535_v5 }
 0x9e5   :  { %v4413_v13 = vcombine.high %v4397_v21, %v4397_v21  ;;  %v5141_v55 = vrot.slane %v4466_v46, %v10943_v59 }
 0x9e7   :  { %v4547_v6 = vrot.slane %v4413_v13, %v10943_v59 }
 0x9e9   :  { %v5053_v30 = vadd.f32 %v11684_v53, %v4547_v6 }
 0x9eb   :  { %v11691_v25 = vpop.f32.mrb[58].mxu0  ;;  %v5232_v26 = vpop.f32.mrb[54].mxu1 }
 0x9ec   :  { %v5233_v27 = vadd.f32 %v5232_v26, %v5129_v20  ;;  %v9600_v28 = vpop.f32.mrb[59].mxu0  ;;  %v9633_v29 = vpop.f32.mrb[55].mxu1  ;;  %v4478_v20 = vrot.slane %v8669_v8, %v10930_v49 }
 0x9ee   :  { %9800 = vmatpush3.xpose.msk.msra.mxu1 %vm2102_vm2, %v5233_v27 }
 0x9ef   :  { %9804 = vmatprep.subr.mxu1 %v10402_v11 }
 0x9f1   :  { %9802 = vmatmul.mubr.msk.f32.vlgmr.msra.gmra.mrb[70].mxu1 %vm2102_vm2, %v4630_v36  ;;  %v4494_v36 = vrot.slane %v4478_v20, %v10930_v49 }
 0x9f2   :  { %9806 = vmatprep.mubr.msk.f32.mxu1 %vm10401_vm0, %v10402_v11 }
 0x9f3   :  { %v11702_v56 = vpop.f32.mrb[60].mxu0  ;;  %v5372_v47 = vpop.f32.mrb[56].mxu1  ;;  %v5729_v33 = vrot.slane %v4494_v36, %v10943_v59 }
 0x9f4   :  { %v5373_v35 = vadd.f32 %v5372_v47, %v5137_v32  ;;  %v9622_v50 = vpop.f32.mrb[61].mxu0  ;;  %v9655_v58 = vpop.f32.mrb[57].mxu1  ;;  %v4411_v32 = vrot.slane %v4383_v23, %v10930_v49 }
 0x9f5   :  { %v4516_v58 = vcombine.high %v4494_v36, %v4494_v36 }
 0x9f6   :  { %9810 = vmatpush3.xpose.msk.msra.mxu0 %vm2102_vm2, %v5373_v35  ;;  %v4543_v12 = vrot.slane %v4411_v32, %v10943_v59 }
 0x9f7   :  { %9819 = vmatprep.subr.mxu0 %v10402_v11  ;;  %v5737_v21 = vrot.slane %v4516_v58, %v10943_v59 }
 0x9f8   :  { %v4983_v37 = vadd.f32 %v11691_v25, %v4543_v12 }
 0x9f9   :  { %9812 = vmatmul.mubr.msk.f32.vlgmr.msra.gmra.mrb[78].mxu0 %vm2102_vm2, %v4773_v51  ;;  %v4415_v51 = vcombine.high %v4411_v32, %v4411_v32 }
 0x9fa   :  { %9821 = vmatprep.mubr.msk.f32.mxu0 %vm10401_vm0, %v10402_v11 }
 0x9fb   :  { %v5302_v62 = vpop.f32.mrb[62].mxu0  ;;  %v5512_v63 = vpop.f32.mrb[58].mxu1  ;;  %v4551_v60 = vrot.slane %v4415_v51, %v10943_v59 }
 0x9fc   :  { %v5303_v0 = vadd.f32 %v5302_v62, %v5133_v22  ;;  %v5513_v2 = vadd.f32 %v5512_v63, %v5145_v57  ;;  %v9644_v44 = vpop.f32.mrb[63].mxu0  ;;  %v9677_v4 = vpop.f32.mrb[59].mxu1  ;;  %v4486_v22 = vcombine.high %v4478_v20, %v4478_v20  ;;  %v4485_v57 = vrot.slane %v4471_v1, %v10930_v49 }
 0x9fd   :  { %v5123_v46 = vadd.f32 %v11702_v56, %v4551_v60 }
 0x9fe   :  { %9805 = vmatpush3.xpose.msk.msra.mxu1 %vm2102_vm2, %v5303_v0  ;;  %9820 = vmatpush3.xpose.msk.msra.mxu0 %vm2102_vm2, %v5513_v2  ;;  %v4508_v44 = vrot.slane %v4486_v22, %v10930_v49  ;;  %v4501_v4 = vrot.slane %v4485_v57, %v10930_v49  ;;  %v4487_v6 = vcombine.high %v4485_v57, %v4485_v57 }
 0x9ff   :  { %9814 = vmatprep.subr.mxu1 %v10402_v11  ;;  %9829 = vmatprep.subr.mxu0 %v10402_v11 }
 0xa00   :  { %v5733_v7 = vrot.slane %v4508_v44, %v10943_v59  ;;  %v5745_v8 = vrot.slane %v4501_v4, %v10943_v59  ;;  %v4518_v17 = vcombine.high %v4508_v44, %v4508_v44  ;;  %v4517_v56 = vcombine.high %v4501_v4, %v4501_v4 }
 0xa01   :  { %9807 = vmatmul.mubr.msk.f32.vlgmr.msra.gmra.mrb[72].mxu1 %vm2102_vm2, %v4703_v9  ;;  %9822 = vmatmul.mubr.msk.f32.vlgmr.msra.gmra.mrb[80].mxu0 %vm2102_vm2, %v4913_v10 }
 0xa02   :  { %9816 = vmatprep.mubr.msk.f32.mxu1 %vm10401_vm0, %v10402_v11  ;;  %9831 = vmatprep.mubr.msk.f32.mxu0 %vm10401_vm0, %v10402_v11  ;;  %v5741_v20 = vrot.slane %v4518_v17, %v10943_v59  ;;  %v5753_v5 = vrot.slane %v4517_v56, %v10943_v59 }
 0xa03   :  { %v5442_v24 = vpop.f32.mrb[64].mxu0  ;;  %v5652_v26 = vpop.f32.mrb[60].mxu1 }
 0xa04   :  { %v5443_v27 = vadd.f32 %v5442_v24, %v5141_v55  ;;  %v5653_v28 = vadd.f32 %v5652_v26, %v5153_v16  ;;  %v9666_v29 = vpop.f32.mrb[65].mxu0  ;;  %v9699_v31 = vpop.f32.mrb[61].mxu1 }
 0xa05   :  { %v4515_v31 = vrot.slane %v4487_v6, %v10930_v49 }
 0xa06   :  { %9815 = vmatpush3.xpose.msk.msra.mxu1 %vm2102_vm2, %v5443_v27  ;;  %9830 = vmatpush3.xpose.msk.msra.mxu0 %vm2102_vm2, %v5653_v28 }
 0xa07   :  { %9824 = vmatprep.subr.mxu1 %v10402_v11  ;;  %9839 = vmatprep.subr.mxu0 %v10402_v11  ;;  %v5749_v34 = vrot.slane %v4515_v31, %v10943_v59  ;;  %v4519_v32 = vcombine.high %v4515_v31, %v4515_v31 }
 0xa09   :  { %9817 = vmatmul.mubr.msk.f32.vlgmr.msra.gmra.mrb[74].mxu1 %vm2102_vm2, %v4843_v38  ;;  %9832 = vmatmul.mubr.msk.f32.vlgmr.msra.gmra.mrb[82].mxu0 %vm2102_vm2, %v5053_v30 }
 0xa0a   :  { %9826 = vmatprep.mubr.msk.f32.mxu1 %vm10401_vm0, %v10402_v11  ;;  %9841 = vmatprep.mubr.msk.f32.mxu0 %vm10401_vm0, %v10402_v11 }
 0xa0b   :  { %v5582_v53 = vpop.f32.mrb[66].mxu0  ;;  %v5832_v41 = vpop.f32.mrb[62].mxu1 }
 0xa0c   :  { %v5583_v45 = vadd.f32 %v5582_v53, %v5149_v40  ;;  %v5833_v47 = vadd.f32 %v5832_v41, %v5729_v33  ;;  %v9688_v35 = vpop.f32.mrb[67].mxu0  ;;  %v9721_v50 = vpop.f32.mrb[63].mxu1  ;;  %v5757_v40 = vrot.slane %v4519_v32, %v10943_v59 }
 0xa0e   :  { %9825 = vmatpush3.xpose.msk.msra.mxu1 %vm2102_vm2, %v5583_v45  ;;  %9840 = vmatpush3.msra.mxu0 %v5833_v47 }
 0xa0f   :  { %9834 = vmatprep.subr.mxu1 %v10402_v11  ;;  %9849 = vmatprep.subr.mxu0 %v10402_v11 }
 0xa11   :  { %9827 = vmatmul.mubr.msk.f32.vlgmr.msra.gmra.mrb[76].mxu1 %vm2102_vm2, %v4983_v37 }
 0xa12   :  { %9836 = vmatprep.mubr.msk.f32.mxu1 %vm10401_vm0, %v10402_v11 }
 0xa13   :  { %v5722_v25 = vpop.f32.mrb[68].mxu0  ;;  %v5972_v61 = vpop.f32.mrb[64].mxu1 }
 0xa14   :  { %v5723_v62 = vadd.f32 %v5722_v25, %v5157_v54  ;;  %v11766_v63 = vadd.f32 %v5972_v61, %v5737_v21  ;;  %v9710_v0 = vpop.f32.mrb[69].mxu0  ;;  %v9743_v2 = vpop.f32.mrb[65].mxu1 }
 0xa16   :  { %9835 = vmatpush3.xpose.msk.msra.mxu1 %vm2102_vm2, %v5723_v62 }
 0xa17   :  { %9844 = vmatprep.subr.mxu1 %v10402_v11 }
 0xa19   :  { %9837 = vmatmul.mubr.msk.f32.vlgmr.msra.gmra.mrb[78].mxu1 %vm2102_vm2, %v5123_v46 }
 0xa1a   :  { %9846 = vmatprep.mubr.msk.f32.mxu1 %vm10401_vm0, %v10402_v11 }
 0xa1b   :  { %v5902_v3 = vpop.f32.mrb[70].mxu0  ;;  %v6112_v9 = vpop.f32.mrb[66].mxu1 }
 0xa1c   :  { %v5903_v10 = vadd.f32 %v5902_v3, %v5733_v7  ;;  %v11778_v13 = vadd.f32 %v6112_v9, %v5745_v8  ;;  %v9732_v55 = vpop.f32.mrb[71].mxu0  ;;  %v9765_v16 = vpop.f32.mrb[67].mxu1 }
 0xa1e   :  { %9845 = vmatpush3.msra.mxu1 %v5903_v10 }
 0xa1f   :  { %9854 = vmatprep.subr.mxu1 %v10402_v11 }
 0xa23   :  { %v6042_v23 = vpop.f32.mrb[72].mxu0  ;;  %v6252_v24 = vpop.f32.mrb[68].mxu1 }
 0xa24   :  { %v11783_v26 = vadd.f32 %v6042_v23, %v5741_v20  ;;  %v11785_v27 = vadd.f32 %v6252_v24, %v5753_v5  ;;  %v9754_v28 = vpop.f32.mrb[73].mxu0  ;;  %v9787_v29 = vpop.f32.mrb[69].mxu1 }
 0xa2b   :  { %v6182_v36 = vpop.f32.mrb[74].mxu0 }
 0xa2c   :  { %v11789_v38 = vadd.f32 %v6182_v36, %v5749_v34  ;;  %v9776_v30 = vpop.f32.mrb[75].mxu0 }
 0xa33   :  { %v6322_v33 = vpop.f32.mrb[76].mxu0 }
 0xa34   :  { %v11792_v12 = vadd.f32 %v6322_v33, %v5757_v40  ;;  %v9798_v53 = vpop.f32.mrb[77].mxu0 }
 0xac4   :  { %v6398_v41 = vpop.f32.mrb[70].mxu1 }
 0xac5   :  { %v6934_v48 = vmul.f32 0.35355338, %v6398_v41  ;;  %v9803_v45 = vpop.f32.mrb[71].mxu1 }
 0xac7   :  { %v6942_v47 = vsel %vm2102_vm2, %v6934_v48, -inf }
 0xac8   :  { %6943 = vmax.xlane.f32.xlu0 %v6942_v47 }
 0xacc   :  { %v6550_v49 = vpop.f32.mrb[78].mxu0 }
 0xacd   :  { %v6936_v35 = vmul.f32 0.35355338, %v6550_v49  ;;  %v9813_v50 = vpop.f32.mrb[79].mxu0 }
 0xacf   :  { %v6948_v58 = vsel %vm2102_vm2, %v6936_v35, -inf }
 0xad0   :  { %6949 = vmax.xlane.f32.xlu0 %v6948_v58 }
 0xad4   :  { %v6474_v1 = vpop.f32.mrb[72].mxu1  ;;  %v6702_v37 = vpop.f32.mrb[80].mxu0 }
 0xad5   :  { %v6935_v51 = vmul.f32 0.35355338, %v6474_v1  ;;  %v6938_v54 = vmul.f32 0.35355338, %v6702_v37  ;;  %v9808_v21 = vpop.f32.mrb[73].mxu1  ;;  %v9823_v22 = vpop.f32.mrb[81].mxu0 }
 0xad7   :  { %v6945_v57 = vsel %vm2102_vm2, %v6935_v51, -inf  ;;  %v6954_v60 = vsel %vm2102_vm2, %v6938_v54, -inf }
 0xad8   :  { %6946 = vmax.xlane.f32.xlu1 %v6945_v57  ;;  %6955 = vmax.xlane.f32.xlu0 %v6954_v60 }
 0xadc   :  { %v6626_v25 = vpop.f32.mrb[74].mxu1  ;;  %v6854_v61 = vpop.f32.mrb[82].mxu0 }
 0xadd   :  { %v6937_v62 = vmul.f32 0.35355338, %v6626_v25  ;;  %v6940_v0 = vmul.f32 0.35355338, %v6854_v61  ;;  %v9818_v2 = vpop.f32.mrb[75].mxu1  ;;  %v9833_v44 = vpop.f32.mrb[83].mxu0 }
 0xadf   :  { %v6951_v4 = vsel %vm2102_vm2, %v6937_v62, -inf  ;;  %v6960_v46 = vsel %vm2102_vm2, %v6940_v0, -inf }
 0xae0   :  { %6952 = vmax.xlane.f32.xlu1 %v6951_v4  ;;  %6961 = vmax.xlane.f32.xlu0 %v6960_v46 }
 0xae4   :  { %v6778_v7 = vpop.f32.mrb[76].mxu1 }
 0xae5   :  { %v6939_v8 = vmul.f32 0.35355338, %v6778_v7  ;;  %v9828_v3 = vpop.f32.mrb[77].mxu1 }
 0xae7   :  { %v6957_v9 = vsel %vm2102_vm2, %v6939_v8, -inf }
 0xae8   :  { %6958 = vmax.xlane.f32.xlu1 %v6957_v9 }
 0xaec   :  { %v6930_v10 = vpop.f32.mrb[78].mxu1 }
 0xaed   :  { %v6941_v55 = vmul.f32 0.35355338, %v6930_v10  ;;  %v9838_v16 = vpop.f32.mrb[79].mxu1 }
 0xaef   :  { %v6963_v17 = vsel %vm2102_vm2, %v6941_v55, -inf }
 0xaf0   :  { %6964 = vmax.xlane.f32.xlu1 %v6963_v17 }
 0xb55   :  { %v6944_v56 = vpop.xlane.xlu0 %6943 }
 0xb56   :  { %v6966_v20 = vsub.f32 %v6934_v48, %v6944_v56 }
 0xb58   :  { %v6974_v5 = vmul.f32 1.442695, %v6966_v20 }
 0xb5a   :  { %10336 = vpow2.f32 %v6974_v5 }
 0xb5d   :  { %v6950_v6 = vpop.xlane.xlu0 %6949 }
 0xb5e   :  { %v6968_v23 = vsub.f32 %v6936_v35, %v6950_v6 }
 0xb60   :  { %v6978_v24 = vmul.f32 1.442695, %v6968_v23 }
 0xb62   :  { %10338 = vpow2.f32 %v6978_v24 }
 0xb64   :  { %v10337_v28 = vpop.eup %10336 }
 0xb65   :  { %v6947_v29 = vpop.xlane.xlu1 %6946  ;;  %v6956_v31 = vpop.xlane.xlu0 %6955  ;;  %v6990_v34 = vsel %vm2102_vm2, %v10337_v28, 0.0 }
 0xb66   :  { %v6967_v36 = vsub.f32 %v6935_v51, %v6947_v29  ;;  %v6970_v30 = vsub.f32 %v6938_v54, %v6956_v31  ;;  %6991 = vadd.xlane.f32.xlu0 %v6990_v34 }
 0xb68   :  { %v6976_v32 = vmul.f32 1.442695, %v6967_v36  ;;  %v6982_v40 = vmul.f32 1.442695, %v6970_v30  ;;  %v8718_v30 = vld [vmem:[%s11989_s6 + $0x40] sm:$0xff] }
 0xb6a   :  { %10340 = vpow2.f32 %v6976_v32  ;;  %v8720_v32 = vld [vmem:[%s11989_s6 + $0x50] sm:$0xff] }
 0xb6b   :  { %10342 = vpow2.f32 %v6982_v40 }
 0xb6c   :  { %v10339_v33 = vpop.eup %10338 }
 0xb6d   :  { %v6953_v53 = vpop.xlane.xlu1 %6952  ;;  %v6962_v41 = vpop.xlane.xlu0 %6961  ;;  %v6996_v48 = vsel %vm2102_vm2, %v10339_v33, 0.0 }
 0xb6e   :  { %v6969_v45 = vsub.f32 %v6937_v62, %v6953_v53  ;;  %v6972_v47 = vsub.f32 %v6940_v0, %v6962_v41  ;;  %6997 = vadd.xlane.f32.xlu0 %v6996_v48  ;;  %v8722_v53 = vld [vmem:[%s11989_s6 + $0x60] sm:$0xff] }
 0xb70   :  { %v6980_v49 = vmul.f32 1.442695, %v6969_v45  ;;  %v6986_v35 = vmul.f32 1.442695, %v6972_v47  ;;  %v8721_v45 = vld [vmem:[%s11989_s6 + $0x58] sm:$0xff] }
 0xb72   :  { %10344 = vpow2.f32 %v6980_v49  ;;  %v8724_v49 = vld [vmem:[%s11989_s6 + $0x70] sm:$0xff] }
 0xb73   :  { %10346 = vpow2.f32 %v6986_v35 }
 0xb74   :  { %v10341_v50 = vpop.eup %10340 }
 0xb75   :  { %v10343_v58 = vpop.eup %10342  ;;  %v6959_v1 = vpop.xlane.xlu1 %6958  ;;  %v6993_v37 = vsel %vm2102_vm2, %v10341_v50, 0.0 }
 0xb76   :  { %v6971_v51 = vsub.f32 %v6939_v8, %v6959_v1  ;;  %6994 = vadd.xlane.f32.xlu1 %v6993_v37  ;;  %v7002_v54 = vsel %vm2102_vm2, %v10343_v58, 0.0  ;;  %v8723_v1 = vld [vmem:[%s11989_s6 + $0x68] sm:$0xff] }
 0xb77   :  { %7003 = vadd.xlane.f32.xlu0 %v7002_v54 }
 0xb78   :  { %v6984_v21 = vmul.f32 1.442695, %v6971_v51 }
 0xb7a   :  { %10348 = vpow2.f32 %v6984_v21 }
 0xb7c   :  { %v10345_v22 = vpop.eup %10344 }
 0xb7d   :  { %v10347_v57 = vpop.eup %10346  ;;  %v6965_v60 = vpop.xlane.xlu1 %6964  ;;  %v6999_v25 = vsel %vm2102_vm2, %v10345_v22, 0.0 }
 0xb7e   :  { %v6973_v61 = vsub.f32 %v6941_v55, %v6965_v60  ;;  %7000 = vadd.xlane.f32.xlu1 %v6999_v25  ;;  %v7008_v62 = vsel %vm2102_vm2, %v10347_v57, 0.0 }
 0xb7f   :  { %7009 = vadd.xlane.f32.xlu0 %v7008_v62 }
 0xb80   :  { %v6988_v0 = vmul.f32 1.442695, %v6973_v61 }
 0xb82   :  { %10350 = vpow2.f32 %v6988_v0 }
 0xb84   :  { %v10349_v2 = vpop.eup %10348 }
 0xb85   :  { %v7005_v44 = vsel %vm2102_vm2, %v10349_v2, 0.0 }
 0xb86   :  { %7006 = vadd.xlane.f32.xlu1 %v7005_v44 }
 0xb8c   :  { %v10351_v4 = vpop.eup %10350 }
 0xb8d   :  { %v7011_v46 = vsel %vm2102_vm2, %v10351_v4, 0.0 }
 0xb8e   :  { %7012 = vadd.xlane.f32.xlu1 %v7011_v46 }
 0xbf3   :  { %v6992_v7 = vpop.xlane.xlu0 %6991 }
 0xbf4   :  { %10352 = vrcp.f32 %v6992_v7 }
 0xbfb   :  { %v6998_v8 = vpop.xlane.xlu0 %6997 }
 0xbfc   :  { %10354 = vrcp.f32 %v6998_v8 }
 0xbfe   :  { %v10353_v3 = vpop.eup %10352 }
 0xbff   :  { %v7022_v9 = vmul.f32 %v10353_v3, %v10337_v28 }
 0xc01   :  { %9842 = vmatmul.mubr.msk.f32.vlgmr.msra.gmra.mrb[84].mxu0 %vm2102_vm2, %v7022_v9 }
 0xc02   :  { %9850 = vmatpush3.msra.mxu0 %v11766_v63  ;;  %9851 = vmatprep.mubr.msk.f32.mxu0 %vm10401_vm0, %v10402_v11 }
 0xc03   :  { %v6995_v10 = vpop.xlane.xlu1 %6994  ;;  %9859 = vmatprep.subr.mxu0 %v10402_v11 }
 0xc04   :  { %10356 = vrcp.f32 %v6995_v10  ;;  %v7004_v55 = vpop.xlane.xlu0 %7003  ;;  %v11899_v10 = vld [vmem:[%s11993_s10 + $0x8] sm:$0x3f] }
 0xc05   :  { %10358 = vrcp.f32 %v7004_v55  ;;  %v8218_v55 = vrot.slane %v11899_v10, %v10943_v59 }
 0xc06   :  { %v10355_v16 = vpop.eup %10354 }
 0xc07   :  { %v7024_v17 = vmul.f32 %v10355_v16, %v10339_v33 }
 0xc09   :  { %9852 = vmatmul.mubr.msk.f32.vlgmr.msra.gmra.mrb[86].mxu0 %vm2102_vm2, %v7024_v17 }
 0xc0a   :  { %9860 = vmatpush3.msra.mxu0 %v11778_v13  ;;  %9861 = vmatprep.mubr.msk.f32.mxu0 %vm10401_vm0, %v10402_v11 }
 0xc0b   :  { %v7001_v56 = vpop.xlane.xlu1 %7000  ;;  %9869 = vmatprep.subr.mxu0 %v10402_v11 }
 0xc0c   :  { %10360 = vrcp.f32 %v7001_v56  ;;  %v7010_v63 = vpop.xlane.xlu0 %7009 }
 0xc0d   :  { %10362 = vrcp.f32 %v7010_v63 }
 0xc0e   :  { %v10357_v20 = vpop.eup %10356 }
 0xc0f   :  { %v10359_v5 = vpop.eup %10358  ;;  %v7023_v6 = vmul.f32 %v10357_v20, %v10341_v50 }
 0xc10   :  { %v7026_v23 = vmul.f32 %v10359_v5, %v10343_v58 }
 0xc11   :  { %9847 = vmatmul.mubr.msk.f32.vlgmr.msra.gmra.mrb[80].mxu1 %vm2102_vm2, %v7023_v6 }
 0xc12   :  { %9855 = vmatpush3.msra.mxu1 %v11783_v26  ;;  %9862 = vmatmul.mubr.msk.f32.vlgmr.msra.gmra.mrb[88].mxu0 %vm2102_vm2, %v7026_v23 }
 0xc13   :  { %9870 = vmatpush3.msra.mxu0 %v11785_v27  ;;  %v7007_v13 = vpop.xlane.xlu1 %7006  ;;  %9856 = vmatprep.mubr.msk.f32.mxu1 %vm10401_vm0, %v10402_v11 }
 0xc14   :  { %10364 = vrcp.f32 %v7007_v13  ;;  %9864 = vmatprep.subr.mxu1 %v10402_v11  ;;  %9871 = vmatprep.mubr.msk.f32.mxu0 %vm10401_vm0, %v10402_v11 }
 0xc15   :  { %9879 = vmatprep.subr.mxu0 %v10402_v11 }
 0xc16   :  { %v10361_v24 = vpop.eup %10360 }
 0xc17   :  { %v10363_v28 = vpop.eup %10362  ;;  %v7025_v29 = vmul.f32 %v10361_v24, %v10345_v22  ;;  %v8725_v22 = vld [vmem:[%s11989_s6 + $0x78] sm:$0xff] }
 0xc18   :  { %v7028_v26 = vmul.f32 %v10363_v28, %v10347_v57 }
 0xc19   :  { %9857 = vmatmul.mubr.msk.f32.vlgmr.msra.gmra.mrb[82].mxu1 %vm2102_vm2, %v7025_v29 }
 0xc1a   :  { %9865 = vmatpush3.msra.mxu1 %v11789_v38  ;;  %9872 = vmatmul.mubr.msk.f32.vlgmr.msra.gmra.mrb[90].mxu0 %vm2102_vm2, %v7028_v26 }
 0xc1b   :  { %v7013_v27 = vpop.xlane.xlu1 %7012  ;;  %9866 = vmatprep.mubr.msk.f32.mxu1 %vm10401_vm0, %v10402_v11  ;;  %9874 = vmatprep.subr.mxu1 %v10402_v11 }
 0xc1c   :  { %10366 = vrcp.f32 %v7013_v27  ;;  %9881 = vmatprep.mubr.msk.f32.mxu0 %vm10401_vm0, %v10402_v11  ;;  %9880 = vmatpush3.msra.mxu0 %v8718_v30 }
 0xc1d   :  { %9889 = vmatprep.subr.mxu0 %v10402_v11 }
 0xc1e   :  { %v10365_v31 = vpop.eup %10364 }
 0xc1f   :  { %v7027_v34 = vmul.f32 %v10365_v31, %v10349_v2 }
 0xc21   :  { %9867 = vmatmul.mubr.msk.f32.vlgmr.msra.gmra.mrb[84].mxu1 %vm2102_vm2, %v7027_v34 }
 0xc22   :  { %9875 = vmatpush3.msra.mxu1 %v11792_v12  ;;  %9876 = vmatprep.mubr.msk.f32.mxu1 %vm10401_vm0, %v10402_v11  ;;  %v8719_v12 = vld [vmem:[%s11989_s6 + $0x48] sm:$0xff] }
 0xc23   :  { %9884 = vmatprep.subr.mxu1 %v10402_v11 }
 0xc26   :  { %v10367_v38 = vpop.eup %10366 }
 0xc27   :  { %v7029_v36 = vmul.f32 %v10367_v38, %v10351_v4 }
 0xc29   :  { %9877 = vmatmul.mubr.msk.f32.vlgmr.msra.gmra.mrb[86].mxu1 %vm2102_vm2, %v7029_v36 }
 0xc2a   :  { %9886 = vmatprep.mubr.msk.f32.mxu1 %vm10401_vm0, %v10402_v11  ;;  %9885 = vmatpush3.msra.mxu1 %v8719_v12 }
 0xc2b   :  { %9894 = vmatprep.subr.mxu1 %v10402_v11 }
 0xcd4   :  { %v7099_v40 = vpop.f32.mrb[84].mxu0 }
 0xcd5   :  { %v9843_v33 = vpop.f32.mrb[85].mxu0  ;;  %9882 = vmatmul.mubr.msk.f32.vlgmr.msra.gmra.mrb[92].mxu0 %vm2102_vm2, %v7099_v40 }
 0xcd6   :  { %9890 = vmatpush3.msra.mxu0 %v8720_v32  ;;  %9891 = vmatprep.mubr.msk.f32.mxu0 %vm10401_vm0, %v10402_v11 }
 0xcd7   :  { %9899 = vmatprep.subr.mxu0 %v10402_v11 }
 0xcdc   :  { %v7245_v41 = vpop.f32.mrb[86].mxu0 }
 0xcdd   :  { %v9853_v48 = vpop.f32.mrb[87].mxu0  ;;  %9892 = vmatmul.mubr.msk.f32.vlgmr.msra.gmra.mrb[94].mxu0 %vm2102_vm2, %v7245_v41 }
 0xcde   :  { %9900 = vmatpush3.msra.mxu0 %v8722_v53  ;;  %9901 = vmatprep.mubr.msk.f32.mxu0 %vm10401_vm0, %v10402_v11  ;;  %v8736_v48 = vld [vmem:[%s11990_s7 + $0x28] sm:$0xff] }
 0xcdf   :  { %9909 = vmatprep.subr.mxu0 %v10402_v11 }
 0xce4   :  { %v7172_v47 = vpop.f32.mrb[80].mxu1 }
 0xce5   :  { %v7391_v35 = vpop.f32.mrb[88].mxu0  ;;  %v9848_v50 = vpop.f32.mrb[81].mxu1  ;;  %9887 = vmatmul.mubr.msk.f32.vlgmr.msra.gmra.mrb[88].mxu1 %vm2102_vm2, %v7172_v47  ;;  %v8737_v47 = vld [vmem:[%s11990_s7 + $0x30] sm:$0xff] }
 0xce6   :  { %v9863_v58 = vpop.f32.mrb[89].mxu0  ;;  %9902 = vmatmul.mubr.msk.f32.vlgmr.msra.gmra.mrb[96].mxu0 %vm2102_vm2, %v7391_v35  ;;  %9895 = vmatpush3.msra.mxu1 %v8721_v45  ;;  %v8743_v50 = vld [vmem:[%s11991_s8 + $0x40] sm:$0xff] }
 0xce7   :  { %9896 = vmatprep.mubr.msk.f32.mxu1 %vm10401_vm0, %v10402_v11  ;;  %9910 = vmatpush3.msra.mxu0 %v8724_v49  ;;  %v8738_v49 = vld [vmem:[%s11990_s7 + $0x38] sm:$0xff]  ;;  %v8744_v58 = vld [vmem:[%s11991_s8 + $0x48] sm:$0xff] }
 0xce8   :  { %9911 = vmatprep.mubr.msk.f32.mxu0 %vm10401_vm0, %v10402_v11  ;;  %9904 = vmatprep.subr.mxu1 %v10402_v11  ;;  %v10265_v35 = vpack.c.bf16 %v8738_v49, %v8737_v47 }
 0xcec   :  { %v7318_v37 = vpop.f32.mrb[82].mxu1 }
 0xced   :  { %v7537_v51 = vpop.f32.mrb[90].mxu0  ;;  %v9858_v54 = vpop.f32.mrb[83].mxu1  ;;  %9897 = vmatmul.mubr.msk.f32.vlgmr.msra.gmra.mrb[90].mxu1 %vm2102_vm2, %v7318_v37  ;;  %v10269_v37 = vpack.c.bf16 %v8744_v58, %v8743_v50  ;;  %v8482_v50 = vrot.slane %v11899_v10, %v4255_v18 }
 0xcee   :  { %v9873_v21 = vpop.f32.mrb[91].mxu0  ;;  %9912 = vmatmul.mubr.msk.f32.vlgmr.msra.gmra.mrb[98].mxu0 %vm2102_vm2, %v7537_v51  ;;  %9905 = vmatpush3.msra.mxu1 %v8723_v1  ;;  %v8745_v1 = vld [vmem:[%s11991_s8 + $0x50] sm:$0xff]  ;;  %v8746_v51 = vld [vmem:[%s11991_s8 + $0x58] sm:$0xff] }
 0xcef   :  { %9906 = vmatprep.mubr.msk.f32.mxu1 %vm10401_vm0, %v10402_v11  ;;  %9914 = vmatprep.subr.mxu1 %v10402_v11  ;;  %v10273_v54 = vpack.c.bf16 %v8746_v51, %v8745_v1  ;;  %v8747_v21 = vld [vmem:[%s11991_s8 + $0x60] sm:$0xff]  ;;  %v8488_v51 = vrot.slane %v11899_v10, %v4261_v19 }
 0xcf4   :  { %v7464_v57 = vpop.f32.mrb[84].mxu1 }
 0xcf5   :  { %v9868_v60 = vpop.f32.mrb[85].mxu1  ;;  %9907 = vmatmul.mubr.msk.f32.vlgmr.msra.gmra.mrb[92].mxu1 %vm2102_vm2, %v7464_v57 }
 0xcf6   :  { %9915 = vmatpush3.msra.mxu1 %v8725_v22  ;;  %9916 = vmatprep.mubr.msk.f32.mxu1 %vm10401_vm0, %v10402_v11  ;;  %v8748_v22 = vld [vmem:[%s11991_s8 + $0x68] sm:$0xff] }
 0xcf7   :  { %10270 = vmatprep.subr.bf16.mxu1 %v10269_v37  ;;  %v10277_v57 = vpack.c.bf16 %v8748_v22, %v8747_v21 }
 0xcfc   :  { %v7610_v25 = vpop.f32.mrb[86].mxu1 }
 0xcfd   :  { %v9878_v61 = vpop.f32.mrb[87].mxu1  ;;  %9917 = vmatmul.mubr.msk.f32.vlgmr.msra.gmra.mrb[94].mxu1 %vm2102_vm2, %v7610_v25 }
 0xcfe   :  { %10272 = vmatpush3.bf16.msra.mxu1 %v10269_v37 }
 0xcff   :  { %10274 = vmatprep.subr.bf16.mxu1 %v10273_v54 }
 0xd02   :  { %10276 = vmatpush3.bf16.msra.mxu1 %v10273_v54 }
 0xd03   :  { %10278 = vmatprep.subr.bf16.mxu1 %v10277_v57 }
 0xd06   :  { %10280 = vmatpush3.bf16.msra.mxu1 %v10277_v57 }
 0xda8   :  { %v7692_v62 = vpop.f32.mrb[92].mxu0 }
 0xda9   :  { %v9883_v0 = vpop.f32.mrb[93].mxu0 }
 0xdb0   :  { %v7838_v2 = vpop.f32.mrb[94].mxu0 }
 0xdb1   :  { %v8207_v44 = vadd.f32 %v7838_v2, %v7692_v62  ;;  %v9893_v4 = vpop.f32.mrb[95].mxu0  ;;  %v8252_v62 = vrot.slane %v11899_v10, %v4027_v14  ;;  %v8749_v14 = vld [vmem:[%s11991_s8 + $0x70] sm:$0xff] }
 0xdb8   :  { %v7765_v46 = vpop.f32.mrb[88].mxu1 }
 0xdb9   :  { %v7984_v7 = vpop.f32.mrb[96].mxu0  ;;  %v9888_v8 = vpop.f32.mrb[89].mxu1 }
 0xdba   :  { %v8209_v3 = vadd.f32 %v8207_v44, %v7984_v7  ;;  %v9903_v9 = vpop.f32.mrb[97].mxu0 }
 0xdc0   :  { %v7911_v11 = vpop.f32.mrb[90].mxu1 }
 0xdc1   :  { %v8208_v16 = vadd.f32 %v7911_v11, %v7765_v46  ;;  %v8130_v17 = vpop.f32.mrb[98].mxu0  ;;  %v9898_v56 = vpop.f32.mrb[91].mxu1  ;;  %v8258_v46 = vrot.slane %v11899_v10, %v4033_v15  ;;  %v8750_v15 = vld [vmem:[%s11991_s8 + $0x78] sm:$0xff]  ;;  %s10404_s8 = smov [#allocation2]  }
 0xdc2   :  { %v8211_v63 = vadd.f32 %v8209_v3, %v8130_v17  ;;  %v9913_v20 = vpop.f32.mrb[99].mxu0  ;;  %v10281_v17 = vpack.c.bf16 %v8750_v15, %v8749_v14  ;;  %v8740_v56 = vld [vmem:[%s11992_s9 + $0x1] ss:$0 sm:$0xff]  ;;  %s8500_s9 = sshll.u32 %s10404_s8, 4  ;;  %s8501_s9 = int_to_ptr.vmem [resolvable:$true] %s8500_s9 }
 0xdc3   :  { %s10376_s6 = scalar_lea.vmem %s8501_s9, 32  ;;  %p10381_p1 = scmp.lt.s32.totalorder %s8501_s9, %s8501_s9 }
 0xdc4   :  { %v8219_v5 = vadd.f32 %v8218_v55, %v8211_v63  ;;  %10282 = vmatprep.subr.bf16.mxu1 %v10281_v17  ;;  %p10377_p0 = scmp.ne.s32.totalorder %s8501_s9, %s10376_s6  ;;  %p10382_p2 = scmp.lt.s32.totalorder %s10376_s6, %s10376_s6 }
 0xdc5   :  { %10284 = vmatpush3.bf16.msra.mxu1 %v10281_v17 }
 0xdc6   :  { %v8221_v6 = vadd.f32 %v8219_v5, %v11278_v39  ;;  %p10383_p3 = por %p10382_p2, %p10381_p1 }
 0xdc8   :  { %v8057_v23 = vpop.f32.mrb[92].mxu1  ;;  %v8223_v13 = vsel %vm335_vm1, %v8221_v6, 0.0  ;;  %p10384_p4 = pnand %p10383_p3, %p10377_p0 }
 0xdc9   :  { %v8210_v24 = vadd.f32 %v8208_v16, %v8057_v23  ;;  %8224 = vadd.xlane.f32.xlu0 %v8223_v13  ;;  %v9908_v28 = vpop.f32.mrb[93].mxu1 }
 0xdd0   :  { %v8203_v29 = vpop.f32.mrb[94].mxu1 }
 0xdd1   :  { %v8212_v26 = vadd.f32 %v8210_v24, %v8203_v29  ;;  %v9918_v27 = vpop.f32.mrb[95].mxu1  ;;  %v8369_v24 = vrot.slane %v11899_v10, %v4141_v42 }
 0xdd3   :  { %v8220_v31 = vadd.f32 %v8218_v55, %v8212_v26 }
 0xdd5   :  { %v8222_v59 = vadd.f32 %v8220_v31, %v11314_v52  ;;  %v8735_v52 = vld [vmem:[%s11990_s7 + $0x20] sm:$0xff] }
 0xdd6   :  { %v10261_v45 = vpack.c.bf16 %v8736_v48, %v8735_v52 }
 0xdd7   :  { %v8226_v34 = vsel %vm335_vm1, %v8222_v59, 0.0 }
 0xdd8   :  { %8227 = vadd.xlane.f32.xlu1 %v8226_v34  ;;  %10262 = vmatprep.subr.bf16.mxu0 %v10261_v45 }
 0xdd9   :  { %10264 = vmatpush3.bf16.msra.mxu0 %v10261_v45 }
 0xdda   :  { %10266 = vmatprep.subr.bf16.mxu0 %v10265_v35 }
 0xddd   :  { %10268 = vmatpush3.bf16.msra.mxu0 %v10265_v35 }
 0xe56   :  { %v8225_v38 = vpop.xlane.xlu0 %8224 }
 0xe57   :  { %v8229_v36 = vmul.f32 0.03125, %v8225_v38 }
 0xe59   :  { %v8231_v30 = vsub.f32 %v8221_v6, %v8229_v36 }
 0xe5b   :  { %v8233_v12 = vmul.f32 %v8231_v30, %v8231_v30 }
 0xe5d   :  { %v8235_v39 = vsel %vm335_vm1, %v8233_v12, 0.0 }
 0xe5e   :  { %8236 = vadd.xlane.f32.xlu0 %v8235_v39 }
 0xe65   :  { %v8228_v32 = vpop.xlane.xlu1 %8227 }
 0xe66   :  { %v8230_v40 = vmul.f32 0.03125, %v8228_v32 }
 0xe68   :  { %v8232_v33 = vsub.f32 %v8222_v59, %v8230_v40 }
 0xe6a   :  { %v8234_v53 = vmul.f32 %v8232_v33, %v8232_v33 }
 0xe6c   :  { %v8238_v41 = vsel %vm335_vm1, %v8234_v53, 0.0 }
 0xe6d   :  { %8239 = vadd.xlane.f32.xlu1 %v8238_v41 }
 0xeeb   :  { %v8237_v60 = vpop.xlane.xlu0 %8236 }
 0xeec   :  { %v8241_v25 = vmul.f32 0.03125, %v8237_v60 }
 0xeee   :  { %v8243_v61 = vadd.f32 1e-05, %v8241_v25 }
 0xef0   :  { %10368 = vrsqrt.f32 %v8243_v61 }
 0xefa   :  { %v10369_v0 = vpop.eup %10368  ;;  %v8240_v2 = vpop.xlane.xlu1 %8239 }
 0xefb   :  { %v8242_v44 = vmul.f32 0.03125, %v8240_v2  ;;  %v8247_v4 = vmul.f32 %v10369_v0, %v8231_v30 }
 0xefd   :  { %v8244_v7 = vadd.f32 1e-05, %v8242_v44  ;;  %v8253_v8 = vmul.f32 %v8252_v62, %v8247_v4 }
 0xeff   :  { %10370 = vrsqrt.f32 %v8244_v7  ;;  %v8259_v3 = vadd.f32 %v8258_v46, %v8253_v8 }
 0xf01   :  { %9927 = vmatprep.mubr.msk.f32.mxu0 %vm335_vm1, %v8259_v3 }
 0xf09   :  { %v10371_v9 = vpop.eup %10370 }
 0xf0a   :  { %v8248_v11 = vmul.f32 %v10371_v9, %v8232_v33 }
 0xf0c   :  { %v8254_v55 = vmul.f32 %v8252_v62, %v8248_v11 }
 0xf0e   :  { %v8260_v16 = vadd.f32 %v8258_v46, %v8254_v55 }
 0xf10   :  { %9928 = vmatmul.mubr.msk.f32.vlgmr.msra.gmra.mrb[100].mxu0 %vm335_vm1, %v8260_v16 }
 0xfe3   :  { %v9929_v63 = vpop.f32.mrb[100].mxu0 }
 0xfe4   :  { %v8352_v20 = vadd.f32 %v9929_v63, %v8740_v56  ;;  %v8346_v5 = vpop.f32.mrb[101].mxu0 }
 0xfe5   :  { %v8347_v6 = vadd.f32 %v8740_v56, %v8346_v5 }
 0xfe6   :  { %v8356_v13 = vmax.f32 %v8352_v20, 0.0 }
 0xfe7   :  { %v8355_v23 = vmax.f32 %v8347_v6, 0.0 }
 0xfe9   :  { %9946 = vmatprep.mubr.msk.f32.mxu1 %vm4143_vm3, %v8355_v23 }
 0xfea   :  { %9947 = vmatmul.mubr.msk.f32.vlgmr.msra.gmra.mrb[96].mxu1 %vm4143_vm3, %v8356_v13 }
0x10bd   :  { %v9948_v28 = vpop.f32.mrb[96].mxu1 }
0x10be   :  { %v8448_v29 = vadd.f32 %v9948_v28, %v8369_v24  ;;  %v8442_v26 = vpop.f32.mrb[97].mxu1 }
0x10bf   :  { %v8443_v27 = vadd.f32 %v8442_v26, %v8369_v24 }
0x10c0   :  { %v8452_v31 = vadd.f32 %v8448_v29, %v8260_v16 }
0x10c1   :  { %v8451_v59 = vadd.f32 %v8443_v27, %v8259_v3 }
0x10c2   :  { %v8456_v34 = vsel %vm335_vm1, %v8452_v31, 0.0 }
0x10c3   :  { %8457 = vadd.xlane.f32.xlu1 %v8456_v34  ;;  %v8453_v38 = vsel %vm335_vm1, %v8451_v59, 0.0 }
0x10c4   :  { %8454 = vadd.xlane.f32.xlu0 %v8453_v38 }
0x1150   :  { %v8458_v36 = vpop.xlane.xlu1 %8457 }
0x1151   :  { %v8460_v30 = vmul.f32 0.03125, %v8458_v36  ;;  %v8455_v12 = vpop.xlane.xlu0 %8454 }
0x1152   :  { %v8459_v39 = vmul.f32 0.03125, %v8455_v12 }
0x1153   :  { %v8462_v32 = vsub.f32 %v8452_v31, %v8460_v30 }
0x1154   :  { %v8461_v40 = vsub.f32 %v8451_v59, %v8459_v39 }
0x1155   :  { %v8464_v33 = vmul.f32 %v8462_v32, %v8462_v32 }
0x1156   :  { %v8463_v42 = vmul.f32 %v8461_v40, %v8461_v40 }
0x1157   :  { %v8468_v53 = vsel %vm335_vm1, %v8464_v33, 0.0 }
0x1158   :  { %8469 = vadd.xlane.f32.xlu1 %v8468_v53  ;;  %v8465_v41 = vsel %vm335_vm1, %v8463_v42, 0.0 }
0x1159   :  { %8466 = vadd.xlane.f32.xlu0 %v8465_v41 }
0x11e5   :  { %v8470_v52 = vpop.xlane.xlu1 %8469 }
0x11e6   :  { %v8472_v48 = vmul.f32 0.03125, %v8470_v52  ;;  %v8467_v45 = vpop.xlane.xlu0 %8466 }
0x11e7   :  { %v8471_v47 = vmul.f32 0.03125, %v8467_v45 }
0x11e8   :  { %v8474_v49 = vadd.f32 1e-05, %v8472_v48 }
0x11e9   :  { %v8473_v35 = vadd.f32 1e-05, %v8471_v47 }
0x11ea   :  { %10372 = vrsqrt.f32 %v8474_v49 }
0x11eb   :  { %10374 = vrsqrt.f32 %v8473_v35 }
0x11f4   :  { %v10373_v58 = vpop.eup %10372 }
0x11f5   :  { %v10375_v1 = vpop.eup %10374  ;;  %v8478_v37 = vmul.f32 %v10373_v58, %v8462_v32 }
0x11f6   :  { %v8477_v54 = vmul.f32 %v10375_v1, %v8461_v40 }
0x11f7   :  { %v8484_v21 = vmul.f32 %v8482_v50, %v8478_v37 }
0x11f8   :  { %v8483_v22 = vmul.f32 %v8482_v50, %v8477_v54 }
0x11f9   :  { %v8490_v57 = vadd.f32 %v8488_v51, %v8484_v21 }
0x11fa   :  { %v8489_v60 = vadd.f32 %v8488_v51, %v8483_v22 }
0x11fb   :  { %8493 = vst.msk [vmem:[#allocation2 + $0x1] sm:$0x1] %vm8491_vm4, %v8490_v57 }
0x11fc   :  { %8492 = vst.msk [vmem:[#allocation2] sm:$0x1] %vm8491_vm4, %v8489_v60 }
0x11fd   :  { %10387 = shalt.err (!%p10384_p4)
}
0x11fe   :  { %s10388_s28 = scalar_lea.hbm %s11994_s11, 32 }
0x11ff   :  { %p10389_p5 = scmp.ne.s32.totalorder %s11994_s11, %s10388_s28  ;;  %p10392_p6 = scmp.lt.u32.totalorder %s10388_s28, %s11994_s11 }
0x1201   :  { %p10394_p7 = pnand %p10392_p6, %p10389_p5 }
0x1203   :  { %10397 = shalt.err (!%p10394_p7)
}
0x1204   :  { %8503 = dma.vmem_to_hbm [thread:$0]  %s8501_s9, 32, %s11994_s11, [#allocation3]  }
0x1205   :  { %10398 = dma.done.wait [#allocation3], 32  }
0x1206   :  { %10399 = vsyncadd [#allocation3], 4294967264 }
0x1207   :  { %8507 = vsyncpa [#allocation3], 1 }

</bundles_post_ra>
